<compile_context>
chip_gen: v5e
topology: v5e:2x2
jax: 0.10.0
libtpu: 0.0.40
codegen_flags: <defaults>
</compile_context>

<pallas_src>
import functools

import jax
import jax.numpy as jnp
from jax.experimental import pallas as pl
from jax.experimental.pallas import tpu as pltpu


def _round_up(n, m):
    return ((n + m - 1) // m) * m


def _largest_divisor_leq(n, cap):
    cap = max(1, min(n, cap))
    for d in range(cap, 0, -1):
        if n % d == 0:
            return d
    return 1


# ---------------------------------------------------------------------------
# Fused kernel body
# ---------------------------------------------------------------------------
def _fractal_fused_kernel(x_ref, w01_ref, wb_ref, o_ref, v01_ref, vb_ref,
                          *, tau, v_th, L):
    tt = pl.program_id(1)

    # LIF membrane potentials persist in VMEM scratch across the (inner,
    # "arbitrary") time grid axis; zero them at the first time block of each
    # batch tile.
    @pl.when(tt == 0)
    def _():
        v01_ref[...] = jnp.zeros_like(v01_ref)
        vb_ref[...] = jnp.zeros_like(vb_ref)

    t_tile, c_in, BL = x_ref.shape
    c_out = o_ref.shape[1]
    b_tile = BL // L
    inv_tau = 1.0 / tau

    # Segment-boundary masks over the fused b_tile*L lane axis (position within
    # each length-L segment).  Built ONCE per grid step and reused for every
    # timestep and every tap (JAX does not CSE broadcast_in_dim).
    lane_in = jax.lax.broadcasted_iota(jnp.int32, (c_in, BL), 1) % L
    lane_out = jax.lax.broadcasted_iota(jnp.int32, (c_out, BL), 1) % L
    in_nf, in_nl = lane_in != 0, lane_in != L - 1
    out_nf, out_nl = lane_out != 0, lane_out != L - 1

    def taps(z, nf, nl):
        # zero-padded z[l-1] / z[l] / z[l+1] per length-L segment, stacked along
        # sublanes -> [3*C, BL].  pltpu.roll needs non-negative shifts: rolling
        # by BL-1 is a shift of -1; the values rolled across a segment boundary
        # are exactly the ones masked to zero.
        zm1 = jnp.where(nf, pltpu.roll(z, shift=1, axis=1), 0.0)
        zp1 = jnp.where(nl, pltpu.roll(z, shift=BL - 1, axis=1), 0.0)
        return jnp.concatenate([zm1, z, zp1], axis=0)

    def minmax_norm(y):
        # per-(row, sample) min-max over each length-L lane segment.  Each
        # segment slice is a statically aligned 128-lane-multiple window, so no
        # relayout copies; the concat just fills adjacent lane vregs.
        pieces = []
        for b in range(b_tile):
            seg = y[:, b * L:(b + 1) * L]
            s_min = jnp.min(seg, axis=-1, keepdims=True)
            s_max = jnp.max(seg, axis=-1, keepdims=True)
            pieces.append((seg - s_min) *
                          pl.reciprocal(s_max - s_min + 1e-12, approx=False))
        return pieces[0] if b_tile == 1 else jnp.concatenate(pieces, axis=1)

    def lif(y, v_ref):
        # LIF: v <- v + (y - v)/tau ; spike = (v >= v_th) ; hard reset to 0
        v_prev = v_ref[...]
        v = v_prev + (y - v_prev) * inv_tau
        spike = (v >= v_th).astype(jnp.float32)
        v_ref[...] = v * (1.0 - spike)
        return spike

    def step(t, carry):
        x = x_ref[t].astype(jnp.float32)                       # [C_in, BL]
        x_taps = taps(x, in_nf, in_nl)                         # [3*C_in, BL]

        # Fused matmul: depth-0 col-1 and depth-1 col-0 share x_taps, so their
        # weight slabs are stacked into one [2*C_out, 3*C_in] LHS -> one matmul,
        # one min-max norm, one LIF over the fused [2*C_out, BL] slab.
        y01 = jnp.dot(w01_ref[...], x_taps,
                      preferred_element_type=jnp.float32)      # [2*C_out, BL]
        s01 = lif(minmax_norm(y01), v01_ref)
        s0 = s01[:c_out]                                       # joined0 (depth 0, col 1)
        sa = s01[c_out:]                                       # depth 1, col 0

        # depth 1, column 1 consumes joined0
        yb = jnp.dot(wb_ref[...], taps(s0, out_nf, out_nl),
                     preferred_element_type=jnp.float32)       # [C_out, BL]
        sb = lif(minmax_norm(yb), vb_ref)

        # eval-mode join: mean over the two columns
        o_ref[t] = (0.5 * (sa + sb)).astype(o_ref.dtype)
        return carry

    jax.lax.fori_loop(0, t_tile, step, 0, unroll=True)


# ---------------------------------------------------------------------------
# Wrapper
# ---------------------------------------------------------------------------
def fractal_block_forward(x, w_col1_d0, w_col0_d1, w_col1_d1, tau, v_th,
                          *, b_tile=None, t_tile=None, out_dtype=jnp.float32):
    """Eval-mode Fractal_Block forward (num_columns=2, doubling=False).

    x:         [T, B, C_in, L]   (L must be a multiple of 128)
    w_col1_d0: [3, C_out, C_in]  depth-0 column-1 conv  (C_in  -> C_out)
    w_col0_d1: [3, C_out, C_in]  depth-1 column-0 conv  (C_in  -> C_out)
    w_col1_d1: [3, C_out, C_out] depth-1 column-1 conv  (C_out -> C_out)
    """
    T, B, C_in, L = x.shape
    C_out = w_col1_d0.shape[1]
    assert L % 128 == 0, "length must be a multiple of the 128-lane vreg width"

    # Pad channels to f32 sublane multiples (8) so sublane concats / matmul
    # operands stay tile-aligned (no relayout copies in the kernel).
    C_in_p = _round_up(C_in, 8)
    C_out_p = _round_up(C_out, 8)

    def pad_w(w, co, ci):
        return jnp.pad(w.astype(jnp.float32),
                       ((0, 0), (0, co - w.shape[1]), (0, ci - w.shape[2])))

    def stack_w(w):      # [3, Co, Ci] -> [Co, 3*Ci], tap order [l-1, l, l+1]
        return jnp.concatenate([w[0], w[1], w[2]], axis=1)

    w0 = pad_w(w_col1_d0, C_out_p, C_in_p)
    wa = pad_w(w_col0_d1, C_out_p, C_in_p)
    wb = pad_w(w_col1_d1, C_out_p, C_out_p)
    w01 = jnp.concatenate([stack_w(w0), stack_w(wa)], axis=0)   # [2*C_out_p, 3*C_in_p]
    wbs = stack_w(wb)                                           # [C_out_p, 3*C_out_p]

    # Lane-dense layout for the kernel: [T, C, B*L] (layout plumbing outside the
    # kernel; inside, every matmul RHS / output block is b_tile*L lanes wide).
    xp = jnp.pad(x, ((0, 0), (0, 0), (0, C_in_p - C_in), (0, 0)))
    x_r = jnp.transpose(xp, (0, 2, 1, 3)).reshape(T, C_in_p, B * L)

    # Time blocking: several timesteps per grid step amortise the ~0.35us
    # per-grid-step overhead; the LIF state carries across time blocks.
    if t_tile is None:
        t_tile = _largest_divisor_leq(T, 8)
    assert T % t_tile == 0, (T, t_tile)

    # Batch-tile size: bounded by a VMEM budget and a lane-width cap, and (when
    # B allows) kept <= B/2 so the "parallel" batch-tile grid axis has length
    # >= 2 (megacore / v7x's two TensorCores).
    bytes_per_b = 4 * L * (2 * t_tile * (C_in_p + C_out_p) + 3 * C_out_p)
    b_cap_vmem = max(1, (24 * 1024 * 1024) // bytes_per_b)
    b_cap_lane = max(1, 2048 // L)
    if b_tile is None:
        b_tile = _largest_divisor_leq(B, min(b_cap_vmem, b_cap_lane,
                                             max(1, B // 2)))
    assert B % b_tile == 0, (B, b_tile)
    BL = b_tile * L

    est_vmem = (2 * t_tile * (C_in_p + C_out_p) * BL * 4        # dbl-buffered in/out
                + 3 * C_out_p * BL * 4                          # LIF scratch
                + 2 * (w01.size + wbs.size) * 4)                # weights (dbl-buf)
    vmem_limit = int(min(48 * 1024 * 1024, max(32 * 1024 * 1024, 2 * est_vmem)))

    kernel = functools.partial(_fractal_fused_kernel,
                               tau=float(tau), v_th=float(v_th), L=L)

    out_r = pl.pallas_call(
        kernel,
        out_shape=jax.ShapeDtypeStruct((T, C_out_p, B * L), out_dtype),
        grid_spec=pltpu.PrefetchScalarGridSpec(
            num_scalar_prefetch=0,
            grid=(B // b_tile, T // t_tile),
            in_specs=[
                pl.BlockSpec((t_tile, C_in_p, BL), lambda bt, tt: (tt, 0, bt)),
                pl.BlockSpec((2 * C_out_p, 3 * C_in_p), lambda bt, tt: (0, 0)),
                pl.BlockSpec((C_out_p, 3 * C_out_p), lambda bt, tt: (0, 0)),
            ],
            out_specs=pl.BlockSpec((t_tile, C_out_p, BL),
                                   lambda bt, tt: (tt, 0, bt)),
            scratch_shapes=[
                pltpu.VMEM((2 * C_out_p, BL), jnp.float32),  # v: d0-col1 + d1-col0
                pltpu.VMEM((C_out_p, BL), jnp.float32),      # v: d1-col1
            ],
        ),
        compiler_params=pltpu.CompilerParams(
            dimension_semantics=("parallel", "arbitrary"),
            vmem_limit_bytes=vmem_limit),
    )(x_r, w01, wbs)

    out = out_r.reshape(T, C_out_p, B, L).transpose(0, 2, 1, 3)
    return out[:, :, :C_out, :]


# ---------------------------------------------------------------------------
# Plain-JAX reference (numerical sanity check)
# ---------------------------------------------------------------------------
def conv_block_ref(x, w, tau, v_th):
    xp = jnp.pad(x, ((0, 0), (0, 0), (0, 0), (1, 1)))
    y = (jnp.einsum('oc,tbcl->tbol', w[0], xp[..., :-2])
         + jnp.einsum('oc,tbcl->tbol', w[1], xp[..., 1:-1])
         + jnp.einsum('oc,tbcl->tbol', w[2], xp[..., 2:]))
    y_min = y.min(-1, keepdims=True)
    y_max = y.max(-1, keepdims=True)
    y = (y - y_min) / (y_max - y_min + 1e-12)

    def step(v, yt):
        v = v + (yt - v) * (1.0 / tau)
        s = (v >= v_th).astype(jnp.float32)
        return v * (1.0 - s), s

    v0 = jnp.zeros(y.shape[1:], jnp.float32)
    _, spikes = jax.lax.scan(step, v0, y)
    return spikes


def fractal_block_ref(x, w10, w01, w11, tau, v_th):
    j0 = conv_block_ref(x, w10, tau, v_th)
    a = conv_block_ref(x, w01, tau, v_th)
    b = conv_block_ref(j0, w11, tau, v_th)
    return (a + b) * 0.5


if __name__ == "__main__":
    T, B, C_in, C_out, L = 8, 4, 8, 8, 128
    tau, v_th = 2.0, 0.5          # snn1 uses v_threshold = 0.5

    key = jax.random.PRNGKey(0)
    kx, k1, k2, k3 = jax.random.split(key, 4)
    x = jax.random.normal(kx, (T, B, C_in, L), jnp.float32)
    w_col1_d0 = 0.2 * jax.random.normal(k1, (3, C_out, C_in), jnp.float32)
    w_col0_d1 = 0.2 * jax.random.normal(k2, (3, C_out, C_in), jnp.float32)
    w_col1_d1 = 0.2 * jax.random.normal(k3, (3, C_out, C_out), jnp.float32)

    out = fractal_block_forward(x, w_col1_d0, w_col0_d1, w_col1_d1, tau, v_th)
    out = jax.block_until_ready(out)

    ref = fractal_block_ref(x, w_col1_d0, w_col0_d1, w_col1_d1, tau, v_th)
    # Spikes are binary; a different matmul accumulation order can in principle
    # flip an exactly-at-threshold spike, so bound the flip fraction rather than
    # using allclose.
    mismatch = float(jnp.mean((jnp.abs(out.astype(jnp.float32) - ref) > 1e-3)
                              .astype(jnp.float32)))
    assert out.shape == (T, B, C_out, L), out.shape
    assert mismatch < 0.02, f"mismatch fraction too high: {mismatch}"
    print("KERNEL_OK")
</pallas_src>

<mosaic_0001>
module attributes {stable_mosaic.version = 11 : i64} {
  func.func @_fractal_fused_kernel(%arg0: i32, %arg1: i32, %arg2: memref<8x8x256xf32, #tpu.memory_space<vmem>>, %arg3: memref<16x24xf32, #tpu.memory_space<vmem>>, %arg4: memref<8x24xf32, #tpu.memory_space<vmem>>, %arg5: memref<8x8x256xf32, #tpu.memory_space<vmem>>, %arg6: memref<16x256xf32, #tpu.memory_space<vmem>>, %arg7: memref<8x256xf32, #tpu.memory_space<vmem>>) attributes {dimension_semantics = [#tpu.dimension_semantics<parallel>, #tpu.dimension_semantics<arbitrary>], iteration_bounds = array<i64: 2, 1>, scalar_prefetch = 0 : i64, scratch_operands = 2 : i64, tpu.core_type = #tpu.core_type<tc>, window_params = [{transform_indices = @transform_0, window_bounds = array<i64: 8, 8, 256>}, {pipeline_mode = #tpu.pipeline_mode<synchronous>, transform_indices = @transform_1, window_bounds = array<i64: 16, 24>}, {pipeline_mode = #tpu.pipeline_mode<synchronous>, transform_indices = @transform_2, window_bounds = array<i64: 8, 24>}, {transform_indices = @transform_3, window_bounds = array<i64: 8, 8, 256>}]} {
    %c0_i32 = arith.constant 0 : i32
    %0 = arith.cmpi eq, %arg1, %c0_i32 : i32
    %1 = arith.extui %0 : i1 to i32
    %c0_i32_0 = arith.constant 0 : i32
    %2 = arith.cmpi ne, %1, %c0_i32_0 : i32
    scf.if %2 {
      %cst_373 = arith.constant 0.000000e+00 : f32
      %925 = vector.broadcast %cst_373 : f32 to vector<16x256xf32>
      %c0_374 = arith.constant 0 : index
      %c0_375 = arith.constant 0 : index
      %926 = vector.load %arg6[%c0_374, %c0_375] : memref<16x256xf32, #tpu.memory_space<vmem>>, vector<16x256xf32>
      tpu.vector_store %arg6[%c0_374, %c0_375], %925 {strides = array<i32>} : memref<16x256xf32, #tpu.memory_space<vmem>>, vector<16x256xf32>,
      %cst_376 = arith.constant 0.000000e+00 : f32
      %927 = vector.broadcast %cst_376 : f32 to vector<8x256xf32>
      %c0_377 = arith.constant 0 : index
      %c0_378 = arith.constant 0 : index
      %928 = vector.load %arg7[%c0_377, %c0_378] : memref<8x256xf32, #tpu.memory_space<vmem>>, vector<8x256xf32>
      tpu.vector_store %arg7[%c0_377, %c0_378], %927 {strides = array<i32>} : memref<8x256xf32, #tpu.memory_space<vmem>>, vector<8x256xf32>,
    } else {
    }
    %3 = tpu.iota {dimensions = array<i32: 1>} : vector<8x256xi32>
    %c128_i32 = arith.constant 128 : i32
    %c0_i32_1 = arith.constant 0 : i32
    %4 = arith.cmpi eq, %c128_i32, %c0_i32_1 : i32
    %c1_i32 = arith.constant 1 : i32
    %5 = arith.select %4, %c1_i32, %c128_i32 : i32
    %6 = vector.broadcast %5 : i32 to vector<8x256xi32>
    %7 = arith.remsi %3, %6 : vector<8x256xi32>
    %c0_i32_2 = arith.constant 0 : i32
    %8 = vector.broadcast %c0_i32_2 : i32 to vector<8x256xi32>
    %9 = arith.cmpi ne, %7, %8 : vector<8x256xi32>
    %c0_i32_3 = arith.constant 0 : i32
    %10 = vector.broadcast %c0_i32_3 : i32 to vector<8x256xi32>
    %11 = arith.cmpi slt, %7, %10 : vector<8x256xi32>
    %c0_i32_4 = arith.constant 0 : i32
    %12 = arith.cmpi slt, %5, %c0_i32_4 : i32
    %13 = vector.broadcast %12 : i1 to vector<8x256xi1>
    %14 = vector.broadcast %13 : vector<8x256xi1> to vector<8x256xi1>
    %15 = arith.xori %11, %14 : vector<8x256xi1>
    %16 = arith.andi %15, %9 : vector<8x256xi1>
    %17 = vector.broadcast %5 : i32 to vector<8x256xi32>
    %18 = arith.addi %7, %17 : vector<8x256xi32>
    %19 = arith.select %16, %18, %7 : vector<8x256xi1>, vector<8x256xi32>
    %20 = tpu.iota {dimensions = array<i32: 1>} : vector<8x256xi32>
    %c128_i32_5 = arith.constant 128 : i32
    %c0_i32_6 = arith.constant 0 : i32
    %21 = arith.cmpi eq, %c128_i32_5, %c0_i32_6 : i32
    %c1_i32_7 = arith.constant 1 : i32
    %22 = arith.select %21, %c1_i32_7, %c128_i32_5 : i32
    %23 = vector.broadcast %22 : i32 to vector<8x256xi32>
    %24 = arith.remsi %20, %23 : vector<8x256xi32>
    %c0_i32_8 = arith.constant 0 : i32
    %25 = vector.broadcast %c0_i32_8 : i32 to vector<8x256xi32>
    %26 = arith.cmpi ne, %24, %25 : vector<8x256xi32>
    %c0_i32_9 = arith.constant 0 : i32
    %27 = vector.broadcast %c0_i32_9 : i32 to vector<8x256xi32>
    %28 = arith.cmpi slt, %24, %27 : vector<8x256xi32>
    %c0_i32_10 = arith.constant 0 : i32
    %29 = arith.cmpi slt, %22, %c0_i32_10 : i32
    %30 = vector.broadcast %29 : i1 to vector<8x256xi1>
    %31 = vector.broadcast %30 : vector<8x256xi1> to vector<8x256xi1>
    %32 = arith.xori %28, %31 : vector<8x256xi1>
    %33 = arith.andi %32, %26 : vector<8x256xi1>
    %34 = vector.broadcast %22 : i32 to vector<8x256xi32>
    %35 = arith.addi %24, %34 : vector<8x256xi32>
    %36 = arith.select %33, %35, %24 : vector<8x256xi1>, vector<8x256xi32>
    %c0_i32_11 = arith.constant 0 : i32
    %37 = vector.broadcast %c0_i32_11 : i32 to vector<8x256xi32>
    %38 = arith.cmpi ne, %19, %37 : vector<8x256xi32>
    %c127_i32 = arith.constant 127 : i32
    %39 = vector.broadcast %c127_i32 : i32 to vector<8x256xi32>
    %40 = arith.cmpi ne, %19, %39 : vector<8x256xi32>
    %c0_i32_12 = arith.constant 0 : i32
    %41 = vector.broadcast %c0_i32_12 : i32 to vector<8x256xi32>
    %42 = arith.cmpi ne, %36, %41 : vector<8x256xi32>
    %c127_i32_13 = arith.constant 127 : i32
    %43 = vector.broadcast %c127_i32_13 : i32 to vector<8x256xi32>
    %44 = arith.cmpi ne, %36, %43 : vector<8x256xi32>
    %c0_i32_14 = arith.constant 0 : i32
    %45 = arith.index_cast %c0_i32_14 : i32 to index
    %c0 = arith.constant 0 : index
    %c0_15 = arith.constant 0 : index
    %46 = vector.load %arg2[%45, %c0, %c0_15] : memref<8x8x256xf32, #tpu.memory_space<vmem>>, vector<1x8x256xf32>
    %47 = vector.shape_cast %46 : vector<1x8x256xf32> to vector<8x256xf32>
    %c1_i32_16 = arith.constant 1 : i32
    %48 = tpu.dynamic_rotate %47 by %c1_i32_16 dim 1 : vector<8x256xf32>, i32 -> vector<8x256xf32>
    %cst = arith.constant 0.000000e+00 : f32
    %49 = vector.broadcast %cst : f32 to vector<8x256xf32>
    %50 = arith.select %38, %48, %49 : vector<8x256xi1>, vector<8x256xf32>
    %c255_i32 = arith.constant 255 : i32
    %51 = tpu.dynamic_rotate %47 by %c255_i32 dim 1 : vector<8x256xf32>, i32 -> vector<8x256xf32>
    %cst_17 = arith.constant 0.000000e+00 : f32
    %52 = vector.broadcast %cst_17 : f32 to vector<8x256xf32>
    %53 = arith.select %40, %51, %52 : vector<8x256xi1>, vector<8x256xf32>
    %54 = tpu.concatenate %50, %47, %53 in 0 : vector<8x256xf32>, vector<8x256xf32>, vector<8x256xf32> -> vector<24x256xf32>
    %c0_18 = arith.constant 0 : index
    %c0_19 = arith.constant 0 : index
    %55 = vector.load %arg3[%c0_18, %c0_19] : memref<16x24xf32, #tpu.memory_space<vmem>>, vector<16x24xf32>
    %cst_20 = arith.constant dense<0.000000e+00> : vector<16x256xf32>
    %56 = tpu.matmul %55, %54, %cst_20 {dimension_numbers = #tpu.dot_dimension_numbers<[1], [0], [0], [1], [0, 0, 1, 1], [], []>} : vector<16x24xf32>, vector<24x256xf32>, vector<16x256xf32> -> vector<16x256xf32>
    %57 = vector.extract_strided_slice %56 {offsets = [0, 0], sizes = [16, 128], strides = [1, 1]} : vector<16x256xf32> to vector<16x128xf32>
    %cst_21 = arith.constant dense<0x7F800000> : vector<16xf32>
    %58 = vector.multi_reduction <minimumf>, %57, %cst_21 [1] : vector<16x128xf32> to vector<16xf32>
    %59 = vector.shape_cast %58 : vector<16xf32> to vector<16x1xf32>
    %cst_22 = arith.constant dense<0xFF800000> : vector<16xf32>
    %60 = vector.multi_reduction <maximumf>, %57, %cst_22 [1] : vector<16x128xf32> to vector<16xf32>
    %61 = vector.shape_cast %60 : vector<16xf32> to vector<16x1xf32>
    %62 = vector.broadcast %59 : vector<16x1xf32> to vector<16x128xf32>
    %63 = arith.subf %57, %62 : vector<16x128xf32>
    %64 = arith.subf %61, %59 : vector<16x1xf32>
    %cst_23 = arith.constant 9.99999996E-13 : f32
    %65 = vector.broadcast %cst_23 : f32 to vector<16x1xf32>
    %66 = arith.addf %64, %65 : vector<16x1xf32>
    %67 = tpu.reciprocal %66 : vector<16x1xf32> -> vector<16x1xf32>
    %68 = vector.broadcast %67 : vector<16x1xf32> to vector<16x128xf32>
    %69 = arith.mulf %63, %68 : vector<16x128xf32>
    %70 = vector.extract_strided_slice %56 {offsets = [0, 128], sizes = [16, 128], strides = [1, 1]} : vector<16x256xf32> to vector<16x128xf32>
    %cst_24 = arith.constant dense<0x7F800000> : vector<16xf32>
    %71 = vector.multi_reduction <minimumf>, %70, %cst_24 [1] : vector<16x128xf32> to vector<16xf32>
    %72 = vector.shape_cast %71 : vector<16xf32> to vector<16x1xf32>
    %cst_25 = arith.constant dense<0xFF800000> : vector<16xf32>
    %73 = vector.multi_reduction <maximumf>, %70, %cst_25 [1] : vector<16x128xf32> to vector<16xf32>
    %74 = vector.shape_cast %73 : vector<16xf32> to vector<16x1xf32>
    %75 = vector.broadcast %72 : vector<16x1xf32> to vector<16x128xf32>
    %76 = arith.subf %70, %75 : vector<16x128xf32>
    %77 = arith.subf %74, %72 : vector<16x1xf32>
    %cst_26 = arith.constant 9.99999996E-13 : f32
    %78 = vector.broadcast %cst_26 : f32 to vector<16x1xf32>
    %79 = arith.addf %77, %78 : vector<16x1xf32>
    %80 = tpu.reciprocal %79 : vector<16x1xf32> -> vector<16x1xf32>
    %81 = vector.broadcast %80 : vector<16x1xf32> to vector<16x128xf32>
    %82 = arith.mulf %76, %81 : vector<16x128xf32>
    %83 = tpu.concatenate %69, %82 in 1 : vector<16x128xf32>, vector<16x128xf32> -> vector<16x256xf32>
    %c0_27 = arith.constant 0 : index
    %c0_28 = arith.constant 0 : index
    %84 = vector.load %arg6[%c0_27, %c0_28] : memref<16x256xf32, #tpu.memory_space<vmem>>, vector<16x256xf32>
    %85 = arith.subf %83, %84 : vector<16x256xf32>
    %cst_29 = arith.constant 5.000000e-01 : f32
    %86 = vector.broadcast %cst_29 : f32 to vector<16x256xf32>
    %87 = arith.mulf %85, %86 : vector<16x256xf32>
    %88 = arith.addf %84, %87 : vector<16x256xf32>
    %cst_30 = arith.constant 5.000000e-01 : f32
    %89 = vector.broadcast %cst_30 : f32 to vector<16x256xf32>
    %90 = arith.cmpf oge, %88, %89 : vector<16x256xf32>
    %91 = arith.extui %90 : vector<16x256xi1> to vector<16x256xi32>
    %92 = arith.sitofp %91 : vector<16x256xi32> to vector<16x256xf32>
    %cst_31 = arith.constant 1.000000e+00 : f32
    %93 = vector.broadcast %cst_31 : f32 to vector<16x256xf32>
    %94 = arith.subf %93, %92 : vector<16x256xf32>
    %95 = arith.mulf %88, %94 : vector<16x256xf32>
    %c0_32 = arith.constant 0 : index
    %c0_33 = arith.constant 0 : index
    %96 = vector.load %arg6[%c0_32, %c0_33] : memref<16x256xf32, #tpu.memory_space<vmem>>, vector<16x256xf32>
    tpu.vector_store %arg6[%c0_32, %c0_33], %95 {strides = array<i32>} : memref<16x256xf32, #tpu.memory_space<vmem>>, vector<16x256xf32>,
    %97 = vector.extract_strided_slice %92 {offsets = [0, 0], sizes = [8, 256], strides = [1, 1]} : vector<16x256xf32> to vector<8x256xf32>
    %98 = vector.extract_strided_slice %92 {offsets = [8, 0], sizes = [8, 256], strides = [1, 1]} : vector<16x256xf32> to vector<8x256xf32>
    %c0_34 = arith.constant 0 : index
    %c0_35 = arith.constant 0 : index
    %99 = vector.load %arg4[%c0_34, %c0_35] : memref<8x24xf32, #tpu.memory_space<vmem>>, vector<8x24xf32>
    %c1_i32_36 = arith.constant 1 : i32
    %100 = tpu.dynamic_rotate %97 by %c1_i32_36 dim 1 : vector<8x256xf32>, i32 -> vector<8x256xf32>
    %cst_37 = arith.constant 0.000000e+00 : f32
    %101 = vector.broadcast %cst_37 : f32 to vector<8x256xf32>
    %102 = arith.select %42, %100, %101 : vector<8x256xi1>, vector<8x256xf32>
    %c255_i32_38 = arith.constant 255 : i32
    %103 = tpu.dynamic_rotate %97 by %c255_i32_38 dim 1 : vector<8x256xf32>, i32 -> vector<8x256xf32>
    %cst_39 = arith.constant 0.000000e+00 : f32
    %104 = vector.broadcast %cst_39 : f32 to vector<8x256xf32>
    %105 = arith.select %44, %103, %104 : vector<8x256xi1>, vector<8x256xf32>
    %106 = tpu.concatenate %102, %97, %105 in 0 : vector<8x256xf32>, vector<8x256xf32>, vector<8x256xf32> -> vector<24x256xf32>
    %cst_40 = arith.constant dense<0.000000e+00> : vector<8x256xf32>
    %107 = tpu.matmul %99, %106, %cst_40 {dimension_numbers = #tpu.dot_dimension_numbers<[1], [0], [0], [1], [0, 0, 1, 1], [], []>} : vector<8x24xf32>, vector<24x256xf32>, vector<8x256xf32> -> vector<8x256xf32>
    %108 = vector.extract_strided_slice %107 {offsets = [0, 0], sizes = [8, 128], strides = [1, 1]} : vector<8x256xf32> to vector<8x128xf32>
    %cst_41 = arith.constant dense<0x7F800000> : vector<8xf32>
    %109 = vector.multi_reduction <minimumf>, %108, %cst_41 [1] : vector<8x128xf32> to vector<8xf32>
    %110 = vector.shape_cast %109 : vector<8xf32> to vector<8x1xf32>
    %cst_42 = arith.constant dense<0xFF800000> : vector<8xf32>
    %111 = vector.multi_reduction <maximumf>, %108, %cst_42 [1] : vector<8x128xf32> to vector<8xf32>
    %112 = vector.shape_cast %111 : vector<8xf32> to vector<8x1xf32>
    %113 = vector.broadcast %110 : vector<8x1xf32> to vector<8x128xf32>
    %114 = arith.subf %108, %113 : vector<8x128xf32>
    %115 = arith.subf %112, %110 : vector<8x1xf32>
    %cst_43 = arith.constant 9.99999996E-13 : f32
    %116 = vector.broadcast %cst_43 : f32 to vector<8x1xf32>
    %117 = arith.addf %115, %116 : vector<8x1xf32>
    %118 = tpu.reciprocal %117 : vector<8x1xf32> -> vector<8x1xf32>
    %119 = vector.broadcast %118 : vector<8x1xf32> to vector<8x128xf32>
    %120 = arith.mulf %114, %119 : vector<8x128xf32>
    %121 = vector.extract_strided_slice %107 {offsets = [0, 128], sizes = [8, 128], strides = [1, 1]} : vector<8x256xf32> to vector<8x128xf32>
    %cst_44 = arith.constant dense<0x7F800000> : vector<8xf32>
    %122 = vector.multi_reduction <minimumf>, %121, %cst_44 [1] : vector<8x128xf32> to vector<8xf32>
    %123 = vector.shape_cast %122 : vector<8xf32> to vector<8x1xf32>
    %cst_45 = arith.constant dense<0xFF800000> : vector<8xf32>
    %124 = vector.multi_reduction <maximumf>, %121, %cst_45 [1] : vector<8x128xf32> to vector<8xf32>
    %125 = vector.shape_cast %124 : vector<8xf32> to vector<8x1xf32>
    %126 = vector.broadcast %123 : vector<8x1xf32> to vector<8x128xf32>
    %127 = arith.subf %121, %126 : vector<8x128xf32>
    %128 = arith.subf %125, %123 : vector<8x1xf32>
    %cst_46 = arith.constant 9.99999996E-13 : f32
    %129 = vector.broadcast %cst_46 : f32 to vector<8x1xf32>
    %130 = arith.addf %128, %129 : vector<8x1xf32>
    %131 = tpu.reciprocal %130 : vector<8x1xf32> -> vector<8x1xf32>
    %132 = vector.broadcast %131 : vector<8x1xf32> to vector<8x128xf32>
    %133 = arith.mulf %127, %132 : vector<8x128xf32>
    %134 = tpu.concatenate %120, %133 in 1 : vector<8x128xf32>, vector<8x128xf32> -> vector<8x256xf32>
    %c0_47 = arith.constant 0 : index
    %c0_48 = arith.constant 0 : index
    %135 = vector.load %arg7[%c0_47, %c0_48] : memref<8x256xf32, #tpu.memory_space<vmem>>, vector<8x256xf32>
    %136 = arith.subf %134, %135 : vector<8x256xf32>
    %cst_49 = arith.constant 5.000000e-01 : f32
    %137 = vector.broadcast %cst_49 : f32 to vector<8x256xf32>
    %138 = arith.mulf %136, %137 : vector<8x256xf32>
    %139 = arith.addf %135, %138 : vector<8x256xf32>
    %cst_50 = arith.constant 5.000000e-01 : f32
    %140 = vector.broadcast %cst_50 : f32 to vector<8x256xf32>
    %141 = arith.cmpf oge, %139, %140 : vector<8x256xf32>
    %142 = arith.extui %141 : vector<8x256xi1> to vector<8x256xi32>
    %143 = arith.sitofp %142 : vector<8x256xi32> to vector<8x256xf32>
    %cst_51 = arith.constant 1.000000e+00 : f32
    %144 = vector.broadcast %cst_51 : f32 to vector<8x256xf32>
    %145 = arith.subf %144, %143 : vector<8x256xf32>
    %146 = arith.mulf %139, %145 : vector<8x256xf32>
    %c0_52 = arith.constant 0 : index
    %c0_53 = arith.constant 0 : index
    %147 = vector.load %arg7[%c0_52, %c0_53] : memref<8x256xf32, #tpu.memory_space<vmem>>, vector<8x256xf32>
    tpu.vector_store %arg7[%c0_52, %c0_53], %146 {strides = array<i32>} : memref<8x256xf32, #tpu.memory_space<vmem>>, vector<8x256xf32>,
    %148 = arith.addf %98, %143 : vector<8x256xf32>
    %cst_54 = arith.constant 5.000000e-01 : f32
    %149 = vector.broadcast %cst_54 : f32 to vector<8x256xf32>
    %150 = arith.mulf %149, %148 : vector<8x256xf32>
    %151 = arith.index_cast %c0_i32_14 : i32 to index
    %c0_55 = arith.constant 0 : index
    %c0_56 = arith.constant 0 : index
    %152 = vector.load %arg5[%151, %c0_55, %c0_56] : memref<8x8x256xf32, #tpu.memory_space<vmem>>, vector<1x8x256xf32>
    %153 = vector.shape_cast %152 : vector<1x8x256xf32> to vector<8x256xf32>
    %154 = vector.shape_cast %150 : vector<8x256xf32> to vector<1x8x256xf32>
    tpu.vector_store %arg5[%151, %c0_55, %c0_56], %154 {strides = array<i32>} : memref<8x8x256xf32, #tpu.memory_space<vmem>>, vector<1x8x256xf32>,
    %c1_i32_57 = arith.constant 1 : i32
    %155 = arith.index_cast %c1_i32_57 : i32 to index
    %c0_58 = arith.constant 0 : index
    %c0_59 = arith.constant 0 : index
    %156 = vector.load %arg2[%155, %c0_58, %c0_59] : memref<8x8x256xf32, #tpu.memory_space<vmem>>, vector<1x8x256xf32>
    %157 = vector.shape_cast %156 : vector<1x8x256xf32> to vector<8x256xf32>
    %c1_i32_60 = arith.constant 1 : i32
    %158 = tpu.dynamic_rotate %157 by %c1_i32_60 dim 1 : vector<8x256xf32>, i32 -> vector<8x256xf32>
    %cst_61 = arith.constant 0.000000e+00 : f32
    %159 = vector.broadcast %cst_61 : f32 to vector<8x256xf32>
    %160 = arith.select %38, %158, %159 : vector<8x256xi1>, vector<8x256xf32>
    %c255_i32_62 = arith.constant 255 : i32
    %161 = tpu.dynamic_rotate %157 by %c255_i32_62 dim 1 : vector<8x256xf32>, i32 -> vector<8x256xf32>
    %cst_63 = arith.constant 0.000000e+00 : f32
    %162 = vector.broadcast %cst_63 : f32 to vector<8x256xf32>
    %163 = arith.select %40, %161, %162 : vector<8x256xi1>, vector<8x256xf32>
    %164 = tpu.concatenate %160, %157, %163 in 0 : vector<8x256xf32>, vector<8x256xf32>, vector<8x256xf32> -> vector<24x256xf32>
    %c0_64 = arith.constant 0 : index
    %c0_65 = arith.constant 0 : index
    %165 = vector.load %arg3[%c0_64, %c0_65] : memref<16x24xf32, #tpu.memory_space<vmem>>, vector<16x24xf32>
    %cst_66 = arith.constant dense<0.000000e+00> : vector<16x256xf32>
    %166 = tpu.matmul %165, %164, %cst_66 {dimension_numbers = #tpu.dot_dimension_numbers<[1], [0], [0], [1], [0, 0, 1, 1], [], []>} : vector<16x24xf32>, vector<24x256xf32>, vector<16x256xf32> -> vector<16x256xf32>
    %167 = vector.extract_strided_slice %166 {offsets = [0, 0], sizes = [16, 128], strides = [1, 1]} : vector<16x256xf32> to vector<16x128xf32>
    %cst_67 = arith.constant dense<0x7F800000> : vector<16xf32>
    %168 = vector.multi_reduction <minimumf>, %167, %cst_67 [1] : vector<16x128xf32> to vector<16xf32>
    %169 = vector.shape_cast %168 : vector<16xf32> to vector<16x1xf32>
    %cst_68 = arith.constant dense<0xFF800000> : vector<16xf32>
    %170 = vector.multi_reduction <maximumf>, %167, %cst_68 [1] : vector<16x128xf32> to vector<16xf32>
    %171 = vector.shape_cast %170 : vector<16xf32> to vector<16x1xf32>
    %172 = vector.broadcast %169 : vector<16x1xf32> to vector<16x128xf32>
    %173 = arith.subf %167, %172 : vector<16x128xf32>
    %174 = arith.subf %171, %169 : vector<16x1xf32>
    %cst_69 = arith.constant 9.99999996E-13 : f32
    %175 = vector.broadcast %cst_69 : f32 to vector<16x1xf32>
    %176 = arith.addf %174, %175 : vector<16x1xf32>
    %177 = tpu.reciprocal %176 : vector<16x1xf32> -> vector<16x1xf32>
    %178 = vector.broadcast %177 : vector<16x1xf32> to vector<16x128xf32>
    %179 = arith.mulf %173, %178 : vector<16x128xf32>
    %180 = vector.extract_strided_slice %166 {offsets = [0, 128], sizes = [16, 128], strides = [1, 1]} : vector<16x256xf32> to vector<16x128xf32>
    %cst_70 = arith.constant dense<0x7F800000> : vector<16xf32>
    %181 = vector.multi_reduction <minimumf>, %180, %cst_70 [1] : vector<16x128xf32> to vector<16xf32>
    %182 = vector.shape_cast %181 : vector<16xf32> to vector<16x1xf32>
    %cst_71 = arith.constant dense<0xFF800000> : vector<16xf32>
    %183 = vector.multi_reduction <maximumf>, %180, %cst_71 [1] : vector<16x128xf32> to vector<16xf32>
    %184 = vector.shape_cast %183 : vector<16xf32> to vector<16x1xf32>
    %185 = vector.broadcast %182 : vector<16x1xf32> to vector<16x128xf32>
    %186 = arith.subf %180, %185 : vector<16x128xf32>
    %187 = arith.subf %184, %182 : vector<16x1xf32>
    %cst_72 = arith.constant 9.99999996E-13 : f32
    %188 = vector.broadcast %cst_72 : f32 to vector<16x1xf32>
    %189 = arith.addf %187, %188 : vector<16x1xf32>
    %190 = tpu.reciprocal %189 : vector<16x1xf32> -> vector<16x1xf32>
    %191 = vector.broadcast %190 : vector<16x1xf32> to vector<16x128xf32>
    %192 = arith.mulf %186, %191 : vector<16x128xf32>
    %193 = tpu.concatenate %179, %192 in 1 : vector<16x128xf32>, vector<16x128xf32> -> vector<16x256xf32>
    %c0_73 = arith.constant 0 : index
    %c0_74 = arith.constant 0 : index
    %194 = vector.load %arg6[%c0_73, %c0_74] : memref<16x256xf32, #tpu.memory_space<vmem>>, vector<16x256xf32>
    %195 = arith.subf %193, %194 : vector<16x256xf32>
    %cst_75 = arith.constant 5.000000e-01 : f32
    %196 = vector.broadcast %cst_75 : f32 to vector<16x256xf32>
    %197 = arith.mulf %195, %196 : vector<16x256xf32>
    %198 = arith.addf %194, %197 : vector<16x256xf32>
    %cst_76 = arith.constant 5.000000e-01 : f32
    %199 = vector.broadcast %cst_76 : f32 to vector<16x256xf32>
    %200 = arith.cmpf oge, %198, %199 : vector<16x256xf32>
    %201 = arith.extui %200 : vector<16x256xi1> to vector<16x256xi32>
    %202 = arith.sitofp %201 : vector<16x256xi32> to vector<16x256xf32>
    %cst_77 = arith.constant 1.000000e+00 : f32
    %203 = vector.broadcast %cst_77 : f32 to vector<16x256xf32>
    %204 = arith.subf %203, %202 : vector<16x256xf32>
    %205 = arith.mulf %198, %204 : vector<16x256xf32>
    %c0_78 = arith.constant 0 : index
    %c0_79 = arith.constant 0 : index
    %206 = vector.load %arg6[%c0_78, %c0_79] : memref<16x256xf32, #tpu.memory_space<vmem>>, vector<16x256xf32>
    tpu.vector_store %arg6[%c0_78, %c0_79], %205 {strides = array<i32>} : memref<16x256xf32, #tpu.memory_space<vmem>>, vector<16x256xf32>,
    %207 = vector.extract_strided_slice %202 {offsets = [0, 0], sizes = [8, 256], strides = [1, 1]} : vector<16x256xf32> to vector<8x256xf32>
    %208 = vector.extract_strided_slice %202 {offsets = [8, 0], sizes = [8, 256], strides = [1, 1]} : vector<16x256xf32> to vector<8x256xf32>
    %c0_80 = arith.constant 0 : index
    %c0_81 = arith.constant 0 : index
    %209 = vector.load %arg4[%c0_80, %c0_81] : memref<8x24xf32, #tpu.memory_space<vmem>>, vector<8x24xf32>
    %c1_i32_82 = arith.constant 1 : i32
    %210 = tpu.dynamic_rotate %207 by %c1_i32_82 dim 1 : vector<8x256xf32>, i32 -> vector<8x256xf32>
    %cst_83 = arith.constant 0.000000e+00 : f32
    %211 = vector.broadcast %cst_83 : f32 to vector<8x256xf32>
    %212 = arith.select %42, %210, %211 : vector<8x256xi1>, vector<8x256xf32>
    %c255_i32_84 = arith.constant 255 : i32
    %213 = tpu.dynamic_rotate %207 by %c255_i32_84 dim 1 : vector<8x256xf32>, i32 -> vector<8x256xf32>
    %cst_85 = arith.constant 0.000000e+00 : f32
    %214 = vector.broadcast %cst_85 : f32 to vector<8x256xf32>
    %215 = arith.select %44, %213, %214 : vector<8x256xi1>, vector<8x256xf32>
    %216 = tpu.concatenate %212, %207, %215 in 0 : vector<8x256xf32>, vector<8x256xf32>, vector<8x256xf32> -> vector<24x256xf32>
    %cst_86 = arith.constant dense<0.000000e+00> : vector<8x256xf32>
    %217 = tpu.matmul %209, %216, %cst_86 {dimension_numbers = #tpu.dot_dimension_numbers<[1], [0], [0], [1], [0, 0, 1, 1], [], []>} : vector<8x24xf32>, vector<24x256xf32>, vector<8x256xf32> -> vector<8x256xf32>
    %218 = vector.extract_strided_slice %217 {offsets = [0, 0], sizes = [8, 128], strides = [1, 1]} : vector<8x256xf32> to vector<8x128xf32>
    %cst_87 = arith.constant dense<0x7F800000> : vector<8xf32>
    %219 = vector.multi_reduction <minimumf>, %218, %cst_87 [1] : vector<8x128xf32> to vector<8xf32>
    %220 = vector.shape_cast %219 : vector<8xf32> to vector<8x1xf32>
    %cst_88 = arith.constant dense<0xFF800000> : vector<8xf32>
    %221 = vector.multi_reduction <maximumf>, %218, %cst_88 [1] : vector<8x128xf32> to vector<8xf32>
    %222 = vector.shape_cast %221 : vector<8xf32> to vector<8x1xf32>
    %223 = vector.broadcast %220 : vector<8x1xf32> to vector<8x128xf32>
    %224 = arith.subf %218, %223 : vector<8x128xf32>
    %225 = arith.subf %222, %220 : vector<8x1xf32>
    %cst_89 = arith.constant 9.99999996E-13 : f32
    %226 = vector.broadcast %cst_89 : f32 to vector<8x1xf32>
    %227 = arith.addf %225, %226 : vector<8x1xf32>
    %228 = tpu.reciprocal %227 : vector<8x1xf32> -> vector<8x1xf32>
    %229 = vector.broadcast %228 : vector<8x1xf32> to vector<8x128xf32>
    %230 = arith.mulf %224, %229 : vector<8x128xf32>
    %231 = vector.extract_strided_slice %217 {offsets = [0, 128], sizes = [8, 128], strides = [1, 1]} : vector<8x256xf32> to vector<8x128xf32>
    %cst_90 = arith.constant dense<0x7F800000> : vector<8xf32>
    %232 = vector.multi_reduction <minimumf>, %231, %cst_90 [1] : vector<8x128xf32> to vector<8xf32>
    %233 = vector.shape_cast %232 : vector<8xf32> to vector<8x1xf32>
    %cst_91 = arith.constant dense<0xFF800000> : vector<8xf32>
    %234 = vector.multi_reduction <maximumf>, %231, %cst_91 [1] : vector<8x128xf32> to vector<8xf32>
    %235 = vector.shape_cast %234 : vector<8xf32> to vector<8x1xf32>
    %236 = vector.broadcast %233 : vector<8x1xf32> to vector<8x128xf32>
    %237 = arith.subf %231, %236 : vector<8x128xf32>
    %238 = arith.subf %235, %233 : vector<8x1xf32>
    %cst_92 = arith.constant 9.99999996E-13 : f32
    %239 = vector.broadcast %cst_92 : f32 to vector<8x1xf32>
    %240 = arith.addf %238, %239 : vector<8x1xf32>
    %241 = tpu.reciprocal %240 : vector<8x1xf32> -> vector<8x1xf32>
    %242 = vector.broadcast %241 : vector<8x1xf32> to vector<8x128xf32>
    %243 = arith.mulf %237, %242 : vector<8x128xf32>
    %244 = tpu.concatenate %230, %243 in 1 : vector<8x128xf32>, vector<8x128xf32> -> vector<8x256xf32>
    %c0_93 = arith.constant 0 : index
    %c0_94 = arith.constant 0 : index
    %245 = vector.load %arg7[%c0_93, %c0_94] : memref<8x256xf32, #tpu.memory_space<vmem>>, vector<8x256xf32>
    %246 = arith.subf %244, %245 : vector<8x256xf32>
    %cst_95 = arith.constant 5.000000e-01 : f32
    %247 = vector.broadcast %cst_95 : f32 to vector<8x256xf32>
    %248 = arith.mulf %246, %247 : vector<8x256xf32>
    %249 = arith.addf %245, %248 : vector<8x256xf32>
    %cst_96 = arith.constant 5.000000e-01 : f32
    %250 = vector.broadcast %cst_96 : f32 to vector<8x256xf32>
    %251 = arith.cmpf oge, %249, %250 : vector<8x256xf32>
    %252 = arith.extui %251 : vector<8x256xi1> to vector<8x256xi32>
    %253 = arith.sitofp %252 : vector<8x256xi32> to vector<8x256xf32>
    %cst_97 = arith.constant 1.000000e+00 : f32
    %254 = vector.broadcast %cst_97 : f32 to vector<8x256xf32>
    %255 = arith.subf %254, %253 : vector<8x256xf32>
    %256 = arith.mulf %249, %255 : vector<8x256xf32>
    %c0_98 = arith.constant 0 : index
    %c0_99 = arith.constant 0 : index
    %257 = vector.load %arg7[%c0_98, %c0_99] : memref<8x256xf32, #tpu.memory_space<vmem>>, vector<8x256xf32>
    tpu.vector_store %arg7[%c0_98, %c0_99], %256 {strides = array<i32>} : memref<8x256xf32, #tpu.memory_space<vmem>>, vector<8x256xf32>,
    %258 = arith.addf %208, %253 : vector<8x256xf32>
    %cst_100 = arith.constant 5.000000e-01 : f32
    %259 = vector.broadcast %cst_100 : f32 to vector<8x256xf32>
    %260 = arith.mulf %259, %258 : vector<8x256xf32>
    %261 = arith.index_cast %c1_i32_57 : i32 to index
    %c0_101 = arith.constant 0 : index
    %c0_102 = arith.constant 0 : index
    %262 = vector.load %arg5[%261, %c0_101, %c0_102] : memref<8x8x256xf32, #tpu.memory_space<vmem>>, vector<1x8x256xf32>
    %263 = vector.shape_cast %262 : vector<1x8x256xf32> to vector<8x256xf32>
    %264 = vector.shape_cast %260 : vector<8x256xf32> to vector<1x8x256xf32>
    tpu.vector_store %arg5[%261, %c0_101, %c0_102], %264 {strides = array<i32>} : memref<8x8x256xf32, #tpu.memory_space<vmem>>, vector<1x8x256xf32>,
    %c2_i32 = arith.constant 2 : i32
    %265 = arith.index_cast %c2_i32 : i32 to index
    %c0_103 = arith.constant 0 : index
    %c0_104 = arith.constant 0 : index
    %266 = vector.load %arg2[%265, %c0_103, %c0_104] : memref<8x8x256xf32, #tpu.memory_space<vmem>>, vector<1x8x256xf32>
    %267 = vector.shape_cast %266 : vector<1x8x256xf32> to vector<8x256xf32>
    %c1_i32_105 = arith.constant 1 : i32
    %268 = tpu.dynamic_rotate %267 by %c1_i32_105 dim 1 : vector<8x256xf32>, i32 -> vector<8x256xf32>
    %cst_106 = arith.constant 0.000000e+00 : f32
    %269 = vector.broadcast %cst_106 : f32 to vector<8x256xf32>
    %270 = arith.select %38, %268, %269 : vector<8x256xi1>, vector<8x256xf32>
    %c255_i32_107 = arith.constant 255 : i32
    %271 = tpu.dynamic_rotate %267 by %c255_i32_107 dim 1 : vector<8x256xf32>, i32 -> vector<8x256xf32>
    %cst_108 = arith.constant 0.000000e+00 : f32
    %272 = vector.broadcast %cst_108 : f32 to vector<8x256xf32>
    %273 = arith.select %40, %271, %272 : vector<8x256xi1>, vector<8x256xf32>
    %274 = tpu.concatenate %270, %267, %273 in 0 : vector<8x256xf32>, vector<8x256xf32>, vector<8x256xf32> -> vector<24x256xf32>
    %c0_109 = arith.constant 0 : index
    %c0_110 = arith.constant 0 : index
    %275 = vector.load %arg3[%c0_109, %c0_110] : memref<16x24xf32, #tpu.memory_space<vmem>>, vector<16x24xf32>
    %cst_111 = arith.constant dense<0.000000e+00> : vector<16x256xf32>
    %276 = tpu.matmul %275, %274, %cst_111 {dimension_numbers = #tpu.dot_dimension_numbers<[1], [0], [0], [1], [0, 0, 1, 1], [], []>} : vector<16x24xf32>, vector<24x256xf32>, vector<16x256xf32> -> vector<16x256xf32>
    %277 = vector.extract_strided_slice %276 {offsets = [0, 0], sizes = [16, 128], strides = [1, 1]} : vector<16x256xf32> to vector<16x128xf32>
    %cst_112 = arith.constant dense<0x7F800000> : vector<16xf32>
    %278 = vector.multi_reduction <minimumf>, %277, %cst_112 [1] : vector<16x128xf32> to vector<16xf32>
    %279 = vector.shape_cast %278 : vector<16xf32> to vector<16x1xf32>
    %cst_113 = arith.constant dense<0xFF800000> : vector<16xf32>
    %280 = vector.multi_reduction <maximumf>, %277, %cst_113 [1] : vector<16x128xf32> to vector<16xf32>
    %281 = vector.shape_cast %280 : vector<16xf32> to vector<16x1xf32>
    %282 = vector.broadcast %279 : vector<16x1xf32> to vector<16x128xf32>
    %283 = arith.subf %277, %282 : vector<16x128xf32>
    %284 = arith.subf %281, %279 : vector<16x1xf32>
    %cst_114 = arith.constant 9.99999996E-13 : f32
    %285 = vector.broadcast %cst_114 : f32 to vector<16x1xf32>
    %286 = arith.addf %284, %285 : vector<16x1xf32>
    %287 = tpu.reciprocal %286 : vector<16x1xf32> -> vector<16x1xf32>
    %288 = vector.broadcast %287 : vector<16x1xf32> to vector<16x128xf32>
    %289 = arith.mulf %283, %288 : vector<16x128xf32>
    %290 = vector.extract_strided_slice %276 {offsets = [0, 128], sizes = [16, 128], strides = [1, 1]} : vector<16x256xf32> to vector<16x128xf32>
    %cst_115 = arith.constant dense<0x7F800000> : vector<16xf32>
    %291 = vector.multi_reduction <minimumf>, %290, %cst_115 [1] : vector<16x128xf32> to vector<16xf32>
    %292 = vector.shape_cast %291 : vector<16xf32> to vector<16x1xf32>
    %cst_116 = arith.constant dense<0xFF800000> : vector<16xf32>
    %293 = vector.multi_reduction <maximumf>, %290, %cst_116 [1] : vector<16x128xf32> to vector<16xf32>
    %294 = vector.shape_cast %293 : vector<16xf32> to vector<16x1xf32>
    %295 = vector.broadcast %292 : vector<16x1xf32> to vector<16x128xf32>
    %296 = arith.subf %290, %295 : vector<16x128xf32>
    %297 = arith.subf %294, %292 : vector<16x1xf32>
    %cst_117 = arith.constant 9.99999996E-13 : f32
    %298 = vector.broadcast %cst_117 : f32 to vector<16x1xf32>
    %299 = arith.addf %297, %298 : vector<16x1xf32>
    %300 = tpu.reciprocal %299 : vector<16x1xf32> -> vector<16x1xf32>
    %301 = vector.broadcast %300 : vector<16x1xf32> to vector<16x128xf32>
    %302 = arith.mulf %296, %301 : vector<16x128xf32>
    %303 = tpu.concatenate %289, %302 in 1 : vector<16x128xf32>, vector<16x128xf32> -> vector<16x256xf32>
    %c0_118 = arith.constant 0 : index
    %c0_119 = arith.constant 0 : index
    %304 = vector.load %arg6[%c0_118, %c0_119] : memref<16x256xf32, #tpu.memory_space<vmem>>, vector<16x256xf32>
    %305 = arith.subf %303, %304 : vector<16x256xf32>
    %cst_120 = arith.constant 5.000000e-01 : f32
    %306 = vector.broadcast %cst_120 : f32 to vector<16x256xf32>
    %307 = arith.mulf %305, %306 : vector<16x256xf32>
    %308 = arith.addf %304, %307 : vector<16x256xf32>
    %cst_121 = arith.constant 5.000000e-01 : f32
    %309 = vector.broadcast %cst_121 : f32 to vector<16x256xf32>
    %310 = arith.cmpf oge, %308, %309 : vector<16x256xf32>
    %311 = arith.extui %310 : vector<16x256xi1> to vector<16x256xi32>
    %312 = arith.sitofp %311 : vector<16x256xi32> to vector<16x256xf32>
    %cst_122 = arith.constant 1.000000e+00 : f32
    %313 = vector.broadcast %cst_122 : f32 to vector<16x256xf32>
    %314 = arith.subf %313, %312 : vector<16x256xf32>
    %315 = arith.mulf %308, %314 : vector<16x256xf32>
    %c0_123 = arith.constant 0 : index
    %c0_124 = arith.constant 0 : index
    %316 = vector.load %arg6[%c0_123, %c0_124] : memref<16x256xf32, #tpu.memory_space<vmem>>, vector<16x256xf32>
    tpu.vector_store %arg6[%c0_123, %c0_124], %315 {strides = array<i32>} : memref<16x256xf32, #tpu.memory_space<vmem>>, vector<16x256xf32>,
    %317 = vector.extract_strided_slice %312 {offsets = [0, 0], sizes = [8, 256], strides = [1, 1]} : vector<16x256xf32> to vector<8x256xf32>
    %318 = vector.extract_strided_slice %312 {offsets = [8, 0], sizes = [8, 256], strides = [1, 1]} : vector<16x256xf32> to vector<8x256xf32>
    %c0_125 = arith.constant 0 : index
    %c0_126 = arith.constant 0 : index
    %319 = vector.load %arg4[%c0_125, %c0_126] : memref<8x24xf32, #tpu.memory_space<vmem>>, vector<8x24xf32>
    %c1_i32_127 = arith.constant 1 : i32
    %320 = tpu.dynamic_rotate %317 by %c1_i32_127 dim 1 : vector<8x256xf32>, i32 -> vector<8x256xf32>
    %cst_128 = arith.constant 0.000000e+00 : f32
    %321 = vector.broadcast %cst_128 : f32 to vector<8x256xf32>
    %322 = arith.select %42, %320, %321 : vector<8x256xi1>, vector<8x256xf32>
    %c255_i32_129 = arith.constant 255 : i32
    %323 = tpu.dynamic_rotate %317 by %c255_i32_129 dim 1 : vector<8x256xf32>, i32 -> vector<8x256xf32>
    %cst_130 = arith.constant 0.000000e+00 : f32
    %324 = vector.broadcast %cst_130 : f32 to vector<8x256xf32>
    %325 = arith.select %44, %323, %324 : vector<8x256xi1>, vector<8x256xf32>
    %326 = tpu.concatenate %322, %317, %325 in 0 : vector<8x256xf32>, vector<8x256xf32>, vector<8x256xf32> -> vector<24x256xf32>
    %cst_131 = arith.constant dense<0.000000e+00> : vector<8x256xf32>
    %327 = tpu.matmul %319, %326, %cst_131 {dimension_numbers = #tpu.dot_dimension_numbers<[1], [0], [0], [1], [0, 0, 1, 1], [], []>} : vector<8x24xf32>, vector<24x256xf32>, vector<8x256xf32> -> vector<8x256xf32>
    %328 = vector.extract_strided_slice %327 {offsets = [0, 0], sizes = [8, 128], strides = [1, 1]} : vector<8x256xf32> to vector<8x128xf32>
    %cst_132 = arith.constant dense<0x7F800000> : vector<8xf32>
    %329 = vector.multi_reduction <minimumf>, %328, %cst_132 [1] : vector<8x128xf32> to vector<8xf32>
    %330 = vector.shape_cast %329 : vector<8xf32> to vector<8x1xf32>
    %cst_133 = arith.constant dense<0xFF800000> : vector<8xf32>
    %331 = vector.multi_reduction <maximumf>, %328, %cst_133 [1] : vector<8x128xf32> to vector<8xf32>
    %332 = vector.shape_cast %331 : vector<8xf32> to vector<8x1xf32>
    %333 = vector.broadcast %330 : vector<8x1xf32> to vector<8x128xf32>
    %334 = arith.subf %328, %333 : vector<8x128xf32>
    %335 = arith.subf %332, %330 : vector<8x1xf32>
    %cst_134 = arith.constant 9.99999996E-13 : f32
    %336 = vector.broadcast %cst_134 : f32 to vector<8x1xf32>
    %337 = arith.addf %335, %336 : vector<8x1xf32>
    %338 = tpu.reciprocal %337 : vector<8x1xf32> -> vector<8x1xf32>
    %339 = vector.broadcast %338 : vector<8x1xf32> to vector<8x128xf32>
    %340 = arith.mulf %334, %339 : vector<8x128xf32>
    %341 = vector.extract_strided_slice %327 {offsets = [0, 128], sizes = [8, 128], strides = [1, 1]} : vector<8x256xf32> to vector<8x128xf32>
    %cst_135 = arith.constant dense<0x7F800000> : vector<8xf32>
    %342 = vector.multi_reduction <minimumf>, %341, %cst_135 [1] : vector<8x128xf32> to vector<8xf32>
    %343 = vector.shape_cast %342 : vector<8xf32> to vector<8x1xf32>
    %cst_136 = arith.constant dense<0xFF800000> : vector<8xf32>
    %344 = vector.multi_reduction <maximumf>, %341, %cst_136 [1] : vector<8x128xf32> to vector<8xf32>
    %345 = vector.shape_cast %344 : vector<8xf32> to vector<8x1xf32>
    %346 = vector.broadcast %343 : vector<8x1xf32> to vector<8x128xf32>
    %347 = arith.subf %341, %346 : vector<8x128xf32>
    %348 = arith.subf %345, %343 : vector<8x1xf32>
    %cst_137 = arith.constant 9.99999996E-13 : f32
    %349 = vector.broadcast %cst_137 : f32 to vector<8x1xf32>
    %350 = arith.addf %348, %349 : vector<8x1xf32>
    %351 = tpu.reciprocal %350 : vector<8x1xf32> -> vector<8x1xf32>
    %352 = vector.broadcast %351 : vector<8x1xf32> to vector<8x128xf32>
    %353 = arith.mulf %347, %352 : vector<8x128xf32>
    %354 = tpu.concatenate %340, %353 in 1 : vector<8x128xf32>, vector<8x128xf32> -> vector<8x256xf32>
    %c0_138 = arith.constant 0 : index
    %c0_139 = arith.constant 0 : index
    %355 = vector.load %arg7[%c0_138, %c0_139] : memref<8x256xf32, #tpu.memory_space<vmem>>, vector<8x256xf32>
    %356 = arith.subf %354, %355 : vector<8x256xf32>
    %cst_140 = arith.constant 5.000000e-01 : f32
    %357 = vector.broadcast %cst_140 : f32 to vector<8x256xf32>
    %358 = arith.mulf %356, %357 : vector<8x256xf32>
    %359 = arith.addf %355, %358 : vector<8x256xf32>
    %cst_141 = arith.constant 5.000000e-01 : f32
    %360 = vector.broadcast %cst_141 : f32 to vector<8x256xf32>
    %361 = arith.cmpf oge, %359, %360 : vector<8x256xf32>
    %362 = arith.extui %361 : vector<8x256xi1> to vector<8x256xi32>
    %363 = arith.sitofp %362 : vector<8x256xi32> to vector<8x256xf32>
    %cst_142 = arith.constant 1.000000e+00 : f32
    %364 = vector.broadcast %cst_142 : f32 to vector<8x256xf32>
    %365 = arith.subf %364, %363 : vector<8x256xf32>
    %366 = arith.mulf %359, %365 : vector<8x256xf32>
    %c0_143 = arith.constant 0 : index
    %c0_144 = arith.constant 0 : index
    %367 = vector.load %arg7[%c0_143, %c0_144] : memref<8x256xf32, #tpu.memory_space<vmem>>, vector<8x256xf32>
    tpu.vector_store %arg7[%c0_143, %c0_144], %366 {strides = array<i32>} : memref<8x256xf32, #tpu.memory_space<vmem>>, vector<8x256xf32>,
    %368 = arith.addf %318, %363 : vector<8x256xf32>
    %cst_145 = arith.constant 5.000000e-01 : f32
    %369 = vector.broadcast %cst_145 : f32 to vector<8x256xf32>
    %370 = arith.mulf %369, %368 : vector<8x256xf32>
    %371 = arith.index_cast %c2_i32 : i32 to index
    %c0_146 = arith.constant 0 : index
    %c0_147 = arith.constant 0 : index
    %372 = vector.load %arg5[%371, %c0_146, %c0_147] : memref<8x8x256xf32, #tpu.memory_space<vmem>>, vector<1x8x256xf32>
    %373 = vector.shape_cast %372 : vector<1x8x256xf32> to vector<8x256xf32>
    %374 = vector.shape_cast %370 : vector<8x256xf32> to vector<1x8x256xf32>
    tpu.vector_store %arg5[%371, %c0_146, %c0_147], %374 {strides = array<i32>} : memref<8x8x256xf32, #tpu.memory_space<vmem>>, vector<1x8x256xf32>,
    %c3_i32 = arith.constant 3 : i32
    %375 = arith.index_cast %c3_i32 : i32 to index
    %c0_148 = arith.constant 0 : index
    %c0_149 = arith.constant 0 : index
    %376 = vector.load %arg2[%375, %c0_148, %c0_149] : memref<8x8x256xf32, #tpu.memory_space<vmem>>, vector<1x8x256xf32>
    %377 = vector.shape_cast %376 : vector<1x8x256xf32> to vector<8x256xf32>
    %c1_i32_150 = arith.constant 1 : i32
    %378 = tpu.dynamic_rotate %377 by %c1_i32_150 dim 1 : vector<8x256xf32>, i32 -> vector<8x256xf32>
    %cst_151 = arith.constant 0.000000e+00 : f32
    %379 = vector.broadcast %cst_151 : f32 to vector<8x256xf32>
    %380 = arith.select %38, %378, %379 : vector<8x256xi1>, vector<8x256xf32>
    %c255_i32_152 = arith.constant 255 : i32
    %381 = tpu.dynamic_rotate %377 by %c255_i32_152 dim 1 : vector<8x256xf32>, i32 -> vector<8x256xf32>
    %cst_153 = arith.constant 0.000000e+00 : f32
    %382 = vector.broadcast %cst_153 : f32 to vector<8x256xf32>
    %383 = arith.select %40, %381, %382 : vector<8x256xi1>, vector<8x256xf32>
    %384 = tpu.concatenate %380, %377, %383 in 0 : vector<8x256xf32>, vector<8x256xf32>, vector<8x256xf32> -> vector<24x256xf32>
    %c0_154 = arith.constant 0 : index
    %c0_155 = arith.constant 0 : index
    %385 = vector.load %arg3[%c0_154, %c0_155] : memref<16x24xf32, #tpu.memory_space<vmem>>, vector<16x24xf32>
    %cst_156 = arith.constant dense<0.000000e+00> : vector<16x256xf32>
    %386 = tpu.matmul %385, %384, %cst_156 {dimension_numbers = #tpu.dot_dimension_numbers<[1], [0], [0], [1], [0, 0, 1, 1], [], []>} : vector<16x24xf32>, vector<24x256xf32>, vector<16x256xf32> -> vector<16x256xf32>
    %387 = vector.extract_strided_slice %386 {offsets = [0, 0], sizes = [16, 128], strides = [1, 1]} : vector<16x256xf32> to vector<16x128xf32>
    %cst_157 = arith.constant dense<0x7F800000> : vector<16xf32>
    %388 = vector.multi_reduction <minimumf>, %387, %cst_157 [1] : vector<16x128xf32> to vector<16xf32>
    %389 = vector.shape_cast %388 : vector<16xf32> to vector<16x1xf32>
    %cst_158 = arith.constant dense<0xFF800000> : vector<16xf32>
    %390 = vector.multi_reduction <maximumf>, %387, %cst_158 [1] : vector<16x128xf32> to vector<16xf32>
    %391 = vector.shape_cast %390 : vector<16xf32> to vector<16x1xf32>
    %392 = vector.broadcast %389 : vector<16x1xf32> to vector<16x128xf32>
    %393 = arith.subf %387, %392 : vector<16x128xf32>
    %394 = arith.subf %391, %389 : vector<16x1xf32>
    %cst_159 = arith.constant 9.99999996E-13 : f32
    %395 = vector.broadcast %cst_159 : f32 to vector<16x1xf32>
    %396 = arith.addf %394, %395 : vector<16x1xf32>
    %397 = tpu.reciprocal %396 : vector<16x1xf32> -> vector<16x1xf32>
    %398 = vector.broadcast %397 : vector<16x1xf32> to vector<16x128xf32>
    %399 = arith.mulf %393, %398 : vector<16x128xf32>
    %400 = vector.extract_strided_slice %386 {offsets = [0, 128], sizes = [16, 128], strides = [1, 1]} : vector<16x256xf32> to vector<16x128xf32>
    %cst_160 = arith.constant dense<0x7F800000> : vector<16xf32>
    %401 = vector.multi_reduction <minimumf>, %400, %cst_160 [1] : vector<16x128xf32> to vector<16xf32>
    %402 = vector.shape_cast %401 : vector<16xf32> to vector<16x1xf32>
    %cst_161 = arith.constant dense<0xFF800000> : vector<16xf32>
    %403 = vector.multi_reduction <maximumf>, %400, %cst_161 [1] : vector<16x128xf32> to vector<16xf32>
    %404 = vector.shape_cast %403 : vector<16xf32> to vector<16x1xf32>
    %405 = vector.broadcast %402 : vector<16x1xf32> to vector<16x128xf32>
    %406 = arith.subf %400, %405 : vector<16x128xf32>
    %407 = arith.subf %404, %402 : vector<16x1xf32>
    %cst_162 = arith.constant 9.99999996E-13 : f32
    %408 = vector.broadcast %cst_162 : f32 to vector<16x1xf32>
    %409 = arith.addf %407, %408 : vector<16x1xf32>
    %410 = tpu.reciprocal %409 : vector<16x1xf32> -> vector<16x1xf32>
    %411 = vector.broadcast %410 : vector<16x1xf32> to vector<16x128xf32>
    %412 = arith.mulf %406, %411 : vector<16x128xf32>
    %413 = tpu.concatenate %399, %412 in 1 : vector<16x128xf32>, vector<16x128xf32> -> vector<16x256xf32>
    %c0_163 = arith.constant 0 : index
    %c0_164 = arith.constant 0 : index
    %414 = vector.load %arg6[%c0_163, %c0_164] : memref<16x256xf32, #tpu.memory_space<vmem>>, vector<16x256xf32>
    %415 = arith.subf %413, %414 : vector<16x256xf32>
    %cst_165 = arith.constant 5.000000e-01 : f32
    %416 = vector.broadcast %cst_165 : f32 to vector<16x256xf32>
    %417 = arith.mulf %415, %416 : vector<16x256xf32>
    %418 = arith.addf %414, %417 : vector<16x256xf32>
    %cst_166 = arith.constant 5.000000e-01 : f32
    %419 = vector.broadcast %cst_166 : f32 to vector<16x256xf32>
    %420 = arith.cmpf oge, %418, %419 : vector<16x256xf32>
    %421 = arith.extui %420 : vector<16x256xi1> to vector<16x256xi32>
    %422 = arith.sitofp %421 : vector<16x256xi32> to vector<16x256xf32>
    %cst_167 = arith.constant 1.000000e+00 : f32
    %423 = vector.broadcast %cst_167 : f32 to vector<16x256xf32>
    %424 = arith.subf %423, %422 : vector<16x256xf32>
    %425 = arith.mulf %418, %424 : vector<16x256xf32>
    %c0_168 = arith.constant 0 : index
    %c0_169 = arith.constant 0 : index
    %426 = vector.load %arg6[%c0_168, %c0_169] : memref<16x256xf32, #tpu.memory_space<vmem>>, vector<16x256xf32>
    tpu.vector_store %arg6[%c0_168, %c0_169], %425 {strides = array<i32>} : memref<16x256xf32, #tpu.memory_space<vmem>>, vector<16x256xf32>,
    %427 = vector.extract_strided_slice %422 {offsets = [0, 0], sizes = [8, 256], strides = [1, 1]} : vector<16x256xf32> to vector<8x256xf32>
    %428 = vector.extract_strided_slice %422 {offsets = [8, 0], sizes = [8, 256], strides = [1, 1]} : vector<16x256xf32> to vector<8x256xf32>
    %c0_170 = arith.constant 0 : index
    %c0_171 = arith.constant 0 : index
    %429 = vector.load %arg4[%c0_170, %c0_171] : memref<8x24xf32, #tpu.memory_space<vmem>>, vector<8x24xf32>
    %c1_i32_172 = arith.constant 1 : i32
    %430 = tpu.dynamic_rotate %427 by %c1_i32_172 dim 1 : vector<8x256xf32>, i32 -> vector<8x256xf32>
    %cst_173 = arith.constant 0.000000e+00 : f32
    %431 = vector.broadcast %cst_173 : f32 to vector<8x256xf32>
    %432 = arith.select %42, %430, %431 : vector<8x256xi1>, vector<8x256xf32>
    %c255_i32_174 = arith.constant 255 : i32
    %433 = tpu.dynamic_rotate %427 by %c255_i32_174 dim 1 : vector<8x256xf32>, i32 -> vector<8x256xf32>
    %cst_175 = arith.constant 0.000000e+00 : f32
    %434 = vector.broadcast %cst_175 : f32 to vector<8x256xf32>
    %435 = arith.select %44, %433, %434 : vector<8x256xi1>, vector<8x256xf32>
    %436 = tpu.concatenate %432, %427, %435 in 0 : vector<8x256xf32>, vector<8x256xf32>, vector<8x256xf32> -> vector<24x256xf32>
    %cst_176 = arith.constant dense<0.000000e+00> : vector<8x256xf32>
    %437 = tpu.matmul %429, %436, %cst_176 {dimension_numbers = #tpu.dot_dimension_numbers<[1], [0], [0], [1], [0, 0, 1, 1], [], []>} : vector<8x24xf32>, vector<24x256xf32>, vector<8x256xf32> -> vector<8x256xf32>
    %438 = vector.extract_strided_slice %437 {offsets = [0, 0], sizes = [8, 128], strides = [1, 1]} : vector<8x256xf32> to vector<8x128xf32>
    %cst_177 = arith.constant dense<0x7F800000> : vector<8xf32>
    %439 = vector.multi_reduction <minimumf>, %438, %cst_177 [1] : vector<8x128xf32> to vector<8xf32>
    %440 = vector.shape_cast %439 : vector<8xf32> to vector<8x1xf32>
    %cst_178 = arith.constant dense<0xFF800000> : vector<8xf32>
    %441 = vector.multi_reduction <maximumf>, %438, %cst_178 [1] : vector<8x128xf32> to vector<8xf32>
    %442 = vector.shape_cast %441 : vector<8xf32> to vector<8x1xf32>
    %443 = vector.broadcast %440 : vector<8x1xf32> to vector<8x128xf32>
    %444 = arith.subf %438, %443 : vector<8x128xf32>
    %445 = arith.subf %442, %440 : vector<8x1xf32>
    %cst_179 = arith.constant 9.99999996E-13 : f32
    %446 = vector.broadcast %cst_179 : f32 to vector<8x1xf32>
    %447 = arith.addf %445, %446 : vector<8x1xf32>
    %448 = tpu.reciprocal %447 : vector<8x1xf32> -> vector<8x1xf32>
    %449 = vector.broadcast %448 : vector<8x1xf32> to vector<8x128xf32>
    %450 = arith.mulf %444, %449 : vector<8x128xf32>
    %451 = vector.extract_strided_slice %437 {offsets = [0, 128], sizes = [8, 128], strides = [1, 1]} : vector<8x256xf32> to vector<8x128xf32>
    %cst_180 = arith.constant dense<0x7F800000> : vector<8xf32>
    %452 = vector.multi_reduction <minimumf>, %451, %cst_180 [1] : vector<8x128xf32> to vector<8xf32>
    %453 = vector.shape_cast %452 : vector<8xf32> to vector<8x1xf32>
    %cst_181 = arith.constant dense<0xFF800000> : vector<8xf32>
    %454 = vector.multi_reduction <maximumf>, %451, %cst_181 [1] : vector<8x128xf32> to vector<8xf32>
    %455 = vector.shape_cast %454 : vector<8xf32> to vector<8x1xf32>
    %456 = vector.broadcast %453 : vector<8x1xf32> to vector<8x128xf32>
    %457 = arith.subf %451, %456 : vector<8x128xf32>
    %458 = arith.subf %455, %453 : vector<8x1xf32>
    %cst_182 = arith.constant 9.99999996E-13 : f32
    %459 = vector.broadcast %cst_182 : f32 to vector<8x1xf32>
    %460 = arith.addf %458, %459 : vector<8x1xf32>
    %461 = tpu.reciprocal %460 : vector<8x1xf32> -> vector<8x1xf32>
    %462 = vector.broadcast %461 : vector<8x1xf32> to vector<8x128xf32>
    %463 = arith.mulf %457, %462 : vector<8x128xf32>
    %464 = tpu.concatenate %450, %463 in 1 : vector<8x128xf32>, vector<8x128xf32> -> vector<8x256xf32>
    %c0_183 = arith.constant 0 : index
    %c0_184 = arith.constant 0 : index
    %465 = vector.load %arg7[%c0_183, %c0_184] : memref<8x256xf32, #tpu.memory_space<vmem>>, vector<8x256xf32>
    %466 = arith.subf %464, %465 : vector<8x256xf32>
    %cst_185 = arith.constant 5.000000e-01 : f32
    %467 = vector.broadcast %cst_185 : f32 to vector<8x256xf32>
    %468 = arith.mulf %466, %467 : vector<8x256xf32>
    %469 = arith.addf %465, %468 : vector<8x256xf32>
    %cst_186 = arith.constant 5.000000e-01 : f32
    %470 = vector.broadcast %cst_186 : f32 to vector<8x256xf32>
    %471 = arith.cmpf oge, %469, %470 : vector<8x256xf32>
    %472 = arith.extui %471 : vector<8x256xi1> to vector<8x256xi32>
    %473 = arith.sitofp %472 : vector<8x256xi32> to vector<8x256xf32>
    %cst_187 = arith.constant 1.000000e+00 : f32
    %474 = vector.broadcast %cst_187 : f32 to vector<8x256xf32>
    %475 = arith.subf %474, %473 : vector<8x256xf32>
    %476 = arith.mulf %469, %475 : vector<8x256xf32>
    %c0_188 = arith.constant 0 : index
    %c0_189 = arith.constant 0 : index
    %477 = vector.load %arg7[%c0_188, %c0_189] : memref<8x256xf32, #tpu.memory_space<vmem>>, vector<8x256xf32>
    tpu.vector_store %arg7[%c0_188, %c0_189], %476 {strides = array<i32>} : memref<8x256xf32, #tpu.memory_space<vmem>>, vector<8x256xf32>,
    %478 = arith.addf %428, %473 : vector<8x256xf32>
    %cst_190 = arith.constant 5.000000e-01 : f32
    %479 = vector.broadcast %cst_190 : f32 to vector<8x256xf32>
    %480 = arith.mulf %479, %478 : vector<8x256xf32>
    %481 = arith.index_cast %c3_i32 : i32 to index
    %c0_191 = arith.constant 0 : index
    %c0_192 = arith.constant 0 : index
    %482 = vector.load %arg5[%481, %c0_191, %c0_192] : memref<8x8x256xf32, #tpu.memory_space<vmem>>, vector<1x8x256xf32>
    %483 = vector.shape_cast %482 : vector<1x8x256xf32> to vector<8x256xf32>
    %484 = vector.shape_cast %480 : vector<8x256xf32> to vector<1x8x256xf32>
    tpu.vector_store %arg5[%481, %c0_191, %c0_192], %484 {strides = array<i32>} : memref<8x8x256xf32, #tpu.memory_space<vmem>>, vector<1x8x256xf32>,
    %c4_i32 = arith.constant 4 : i32
    %485 = arith.index_cast %c4_i32 : i32 to index
    %c0_193 = arith.constant 0 : index
    %c0_194 = arith.constant 0 : index
    %486 = vector.load %arg2[%485, %c0_193, %c0_194] : memref<8x8x256xf32, #tpu.memory_space<vmem>>, vector<1x8x256xf32>
    %487 = vector.shape_cast %486 : vector<1x8x256xf32> to vector<8x256xf32>
    %c1_i32_195 = arith.constant 1 : i32
    %488 = tpu.dynamic_rotate %487 by %c1_i32_195 dim 1 : vector<8x256xf32>, i32 -> vector<8x256xf32>
    %cst_196 = arith.constant 0.000000e+00 : f32
    %489 = vector.broadcast %cst_196 : f32 to vector<8x256xf32>
    %490 = arith.select %38, %488, %489 : vector<8x256xi1>, vector<8x256xf32>
    %c255_i32_197 = arith.constant 255 : i32
    %491 = tpu.dynamic_rotate %487 by %c255_i32_197 dim 1 : vector<8x256xf32>, i32 -> vector<8x256xf32>
    %cst_198 = arith.constant 0.000000e+00 : f32
    %492 = vector.broadcast %cst_198 : f32 to vector<8x256xf32>
    %493 = arith.select %40, %491, %492 : vector<8x256xi1>, vector<8x256xf32>
    %494 = tpu.concatenate %490, %487, %493 in 0 : vector<8x256xf32>, vector<8x256xf32>, vector<8x256xf32> -> vector<24x256xf32>
    %c0_199 = arith.constant 0 : index
    %c0_200 = arith.constant 0 : index
    %495 = vector.load %arg3[%c0_199, %c0_200] : memref<16x24xf32, #tpu.memory_space<vmem>>, vector<16x24xf32>
    %cst_201 = arith.constant dense<0.000000e+00> : vector<16x256xf32>
    %496 = tpu.matmul %495, %494, %cst_201 {dimension_numbers = #tpu.dot_dimension_numbers<[1], [0], [0], [1], [0, 0, 1, 1], [], []>} : vector<16x24xf32>, vector<24x256xf32>, vector<16x256xf32> -> vector<16x256xf32>
    %497 = vector.extract_strided_slice %496 {offsets = [0, 0], sizes = [16, 128], strides = [1, 1]} : vector<16x256xf32> to vector<16x128xf32>
    %cst_202 = arith.constant dense<0x7F800000> : vector<16xf32>
    %498 = vector.multi_reduction <minimumf>, %497, %cst_202 [1] : vector<16x128xf32> to vector<16xf32>
    %499 = vector.shape_cast %498 : vector<16xf32> to vector<16x1xf32>
    %cst_203 = arith.constant dense<0xFF800000> : vector<16xf32>
    %500 = vector.multi_reduction <maximumf>, %497, %cst_203 [1] : vector<16x128xf32> to vector<16xf32>
    %501 = vector.shape_cast %500 : vector<16xf32> to vector<16x1xf32>
    %502 = vector.broadcast %499 : vector<16x1xf32> to vector<16x128xf32>
    %503 = arith.subf %497, %502 : vector<16x128xf32>
    %504 = arith.subf %501, %499 : vector<16x1xf32>
    %cst_204 = arith.constant 9.99999996E-13 : f32
    %505 = vector.broadcast %cst_204 : f32 to vector<16x1xf32>
    %506 = arith.addf %504, %505 : vector<16x1xf32>
    %507 = tpu.reciprocal %506 : vector<16x1xf32> -> vector<16x1xf32>
    %508 = vector.broadcast %507 : vector<16x1xf32> to vector<16x128xf32>
    %509 = arith.mulf %503, %508 : vector<16x128xf32>
    %510 = vector.extract_strided_slice %496 {offsets = [0, 128], sizes = [16, 128], strides = [1, 1]} : vector<16x256xf32> to vector<16x128xf32>
    %cst_205 = arith.constant dense<0x7F800000> : vector<16xf32>
    %511 = vector.multi_reduction <minimumf>, %510, %cst_205 [1] : vector<16x128xf32> to vector<16xf32>
    %512 = vector.shape_cast %511 : vector<16xf32> to vector<16x1xf32>
    %cst_206 = arith.constant dense<0xFF800000> : vector<16xf32>
    %513 = vector.multi_reduction <maximumf>, %510, %cst_206 [1] : vector<16x128xf32> to vector<16xf32>
    %514 = vector.shape_cast %513 : vector<16xf32> to vector<16x1xf32>
    %515 = vector.broadcast %512 : vector<16x1xf32> to vector<16x128xf32>
    %516 = arith.subf %510, %515 : vector<16x128xf32>
    %517 = arith.subf %514, %512 : vector<16x1xf32>
    %cst_207 = arith.constant 9.99999996E-13 : f32
    %518 = vector.broadcast %cst_207 : f32 to vector<16x1xf32>
    %519 = arith.addf %517, %518 : vector<16x1xf32>
    %520 = tpu.reciprocal %519 : vector<16x1xf32> -> vector<16x1xf32>
    %521 = vector.broadcast %520 : vector<16x1xf32> to vector<16x128xf32>
    %522 = arith.mulf %516, %521 : vector<16x128xf32>
    %523 = tpu.concatenate %509, %522 in 1 : vector<16x128xf32>, vector<16x128xf32> -> vector<16x256xf32>
    %c0_208 = arith.constant 0 : index
    %c0_209 = arith.constant 0 : index
    %524 = vector.load %arg6[%c0_208, %c0_209] : memref<16x256xf32, #tpu.memory_space<vmem>>, vector<16x256xf32>
    %525 = arith.subf %523, %524 : vector<16x256xf32>
    %cst_210 = arith.constant 5.000000e-01 : f32
    %526 = vector.broadcast %cst_210 : f32 to vector<16x256xf32>
    %527 = arith.mulf %525, %526 : vector<16x256xf32>
    %528 = arith.addf %524, %527 : vector<16x256xf32>
    %cst_211 = arith.constant 5.000000e-01 : f32
    %529 = vector.broadcast %cst_211 : f32 to vector<16x256xf32>
    %530 = arith.cmpf oge, %528, %529 : vector<16x256xf32>
    %531 = arith.extui %530 : vector<16x256xi1> to vector<16x256xi32>
    %532 = arith.sitofp %531 : vector<16x256xi32> to vector<16x256xf32>
    %cst_212 = arith.constant 1.000000e+00 : f32
    %533 = vector.broadcast %cst_212 : f32 to vector<16x256xf32>
    %534 = arith.subf %533, %532 : vector<16x256xf32>
    %535 = arith.mulf %528, %534 : vector<16x256xf32>
    %c0_213 = arith.constant 0 : index
    %c0_214 = arith.constant 0 : index
    %536 = vector.load %arg6[%c0_213, %c0_214] : memref<16x256xf32, #tpu.memory_space<vmem>>, vector<16x256xf32>
    tpu.vector_store %arg6[%c0_213, %c0_214], %535 {strides = array<i32>} : memref<16x256xf32, #tpu.memory_space<vmem>>, vector<16x256xf32>,
    %537 = vector.extract_strided_slice %532 {offsets = [0, 0], sizes = [8, 256], strides = [1, 1]} : vector<16x256xf32> to vector<8x256xf32>
    %538 = vector.extract_strided_slice %532 {offsets = [8, 0], sizes = [8, 256], strides = [1, 1]} : vector<16x256xf32> to vector<8x256xf32>
    %c0_215 = arith.constant 0 : index
    %c0_216 = arith.constant 0 : index
    %539 = vector.load %arg4[%c0_215, %c0_216] : memref<8x24xf32, #tpu.memory_space<vmem>>, vector<8x24xf32>
    %c1_i32_217 = arith.constant 1 : i32
    %540 = tpu.dynamic_rotate %537 by %c1_i32_217 dim 1 : vector<8x256xf32>, i32 -> vector<8x256xf32>
    %cst_218 = arith.constant 0.000000e+00 : f32
    %541 = vector.broadcast %cst_218 : f32 to vector<8x256xf32>
    %542 = arith.select %42, %540, %541 : vector<8x256xi1>, vector<8x256xf32>
    %c255_i32_219 = arith.constant 255 : i32
    %543 = tpu.dynamic_rotate %537 by %c255_i32_219 dim 1 : vector<8x256xf32>, i32 -> vector<8x256xf32>
    %cst_220 = arith.constant 0.000000e+00 : f32
    %544 = vector.broadcast %cst_220 : f32 to vector<8x256xf32>
    %545 = arith.select %44, %543, %544 : vector<8x256xi1>, vector<8x256xf32>
    %546 = tpu.concatenate %542, %537, %545 in 0 : vector<8x256xf32>, vector<8x256xf32>, vector<8x256xf32> -> vector<24x256xf32>
    %cst_221 = arith.constant dense<0.000000e+00> : vector<8x256xf32>
    %547 = tpu.matmul %539, %546, %cst_221 {dimension_numbers = #tpu.dot_dimension_numbers<[1], [0], [0], [1], [0, 0, 1, 1], [], []>} : vector<8x24xf32>, vector<24x256xf32>, vector<8x256xf32> -> vector<8x256xf32>
    %548 = vector.extract_strided_slice %547 {offsets = [0, 0], sizes = [8, 128], strides = [1, 1]} : vector<8x256xf32> to vector<8x128xf32>
    %cst_222 = arith.constant dense<0x7F800000> : vector<8xf32>
    %549 = vector.multi_reduction <minimumf>, %548, %cst_222 [1] : vector<8x128xf32> to vector<8xf32>
    %550 = vector.shape_cast %549 : vector<8xf32> to vector<8x1xf32>
    %cst_223 = arith.constant dense<0xFF800000> : vector<8xf32>
    %551 = vector.multi_reduction <maximumf>, %548, %cst_223 [1] : vector<8x128xf32> to vector<8xf32>
    %552 = vector.shape_cast %551 : vector<8xf32> to vector<8x1xf32>
    %553 = vector.broadcast %550 : vector<8x1xf32> to vector<8x128xf32>
    %554 = arith.subf %548, %553 : vector<8x128xf32>
    %555 = arith.subf %552, %550 : vector<8x1xf32>
    %cst_224 = arith.constant 9.99999996E-13 : f32
    %556 = vector.broadcast %cst_224 : f32 to vector<8x1xf32>
    %557 = arith.addf %555, %556 : vector<8x1xf32>
    %558 = tpu.reciprocal %557 : vector<8x1xf32> -> vector<8x1xf32>
    %559 = vector.broadcast %558 : vector<8x1xf32> to vector<8x128xf32>
    %560 = arith.mulf %554, %559 : vector<8x128xf32>
    %561 = vector.extract_strided_slice %547 {offsets = [0, 128], sizes = [8, 128], strides = [1, 1]} : vector<8x256xf32> to vector<8x128xf32>
    %cst_225 = arith.constant dense<0x7F800000> : vector<8xf32>
    %562 = vector.multi_reduction <minimumf>, %561, %cst_225 [1] : vector<8x128xf32> to vector<8xf32>
    %563 = vector.shape_cast %562 : vector<8xf32> to vector<8x1xf32>
    %cst_226 = arith.constant dense<0xFF800000> : vector<8xf32>
    %564 = vector.multi_reduction <maximumf>, %561, %cst_226 [1] : vector<8x128xf32> to vector<8xf32>
    %565 = vector.shape_cast %564 : vector<8xf32> to vector<8x1xf32>
    %566 = vector.broadcast %563 : vector<8x1xf32> to vector<8x128xf32>
    %567 = arith.subf %561, %566 : vector<8x128xf32>
    %568 = arith.subf %565, %563 : vector<8x1xf32>
    %cst_227 = arith.constant 9.99999996E-13 : f32
    %569 = vector.broadcast %cst_227 : f32 to vector<8x1xf32>
    %570 = arith.addf %568, %569 : vector<8x1xf32>
    %571 = tpu.reciprocal %570 : vector<8x1xf32> -> vector<8x1xf32>
    %572 = vector.broadcast %571 : vector<8x1xf32> to vector<8x128xf32>
    %573 = arith.mulf %567, %572 : vector<8x128xf32>
    %574 = tpu.concatenate %560, %573 in 1 : vector<8x128xf32>, vector<8x128xf32> -> vector<8x256xf32>
    %c0_228 = arith.constant 0 : index
    %c0_229 = arith.constant 0 : index
    %575 = vector.load %arg7[%c0_228, %c0_229] : memref<8x256xf32, #tpu.memory_space<vmem>>, vector<8x256xf32>
    %576 = arith.subf %574, %575 : vector<8x256xf32>
    %cst_230 = arith.constant 5.000000e-01 : f32
    %577 = vector.broadcast %cst_230 : f32 to vector<8x256xf32>
    %578 = arith.mulf %576, %577 : vector<8x256xf32>
    %579 = arith.addf %575, %578 : vector<8x256xf32>
    %cst_231 = arith.constant 5.000000e-01 : f32
    %580 = vector.broadcast %cst_231 : f32 to vector<8x256xf32>
    %581 = arith.cmpf oge, %579, %580 : vector<8x256xf32>
    %582 = arith.extui %581 : vector<8x256xi1> to vector<8x256xi32>
    %583 = arith.sitofp %582 : vector<8x256xi32> to vector<8x256xf32>
    %cst_232 = arith.constant 1.000000e+00 : f32
    %584 = vector.broadcast %cst_232 : f32 to vector<8x256xf32>
    %585 = arith.subf %584, %583 : vector<8x256xf32>
    %586 = arith.mulf %579, %585 : vector<8x256xf32>
    %c0_233 = arith.constant 0 : index
    %c0_234 = arith.constant 0 : index
    %587 = vector.load %arg7[%c0_233, %c0_234] : memref<8x256xf32, #tpu.memory_space<vmem>>, vector<8x256xf32>
    tpu.vector_store %arg7[%c0_233, %c0_234], %586 {strides = array<i32>} : memref<8x256xf32, #tpu.memory_space<vmem>>, vector<8x256xf32>,
    %588 = arith.addf %538, %583 : vector<8x256xf32>
    %cst_235 = arith.constant 5.000000e-01 : f32
    %589 = vector.broadcast %cst_235 : f32 to vector<8x256xf32>
    %590 = arith.mulf %589, %588 : vector<8x256xf32>
    %591 = arith.index_cast %c4_i32 : i32 to index
    %c0_236 = arith.constant 0 : index
    %c0_237 = arith.constant 0 : index
    %592 = vector.load %arg5[%591, %c0_236, %c0_237] : memref<8x8x256xf32, #tpu.memory_space<vmem>>, vector<1x8x256xf32>
    %593 = vector.shape_cast %592 : vector<1x8x256xf32> to vector<8x256xf32>
    %594 = vector.shape_cast %590 : vector<8x256xf32> to vector<1x8x256xf32>
    tpu.vector_store %arg5[%591, %c0_236, %c0_237], %594 {strides = array<i32>} : memref<8x8x256xf32, #tpu.memory_space<vmem>>, vector<1x8x256xf32>,
    %c5_i32 = arith.constant 5 : i32
    %595 = arith.index_cast %c5_i32 : i32 to index
    %c0_238 = arith.constant 0 : index
    %c0_239 = arith.constant 0 : index
    %596 = vector.load %arg2[%595, %c0_238, %c0_239] : memref<8x8x256xf32, #tpu.memory_space<vmem>>, vector<1x8x256xf32>
    %597 = vector.shape_cast %596 : vector<1x8x256xf32> to vector<8x256xf32>
    %c1_i32_240 = arith.constant 1 : i32
    %598 = tpu.dynamic_rotate %597 by %c1_i32_240 dim 1 : vector<8x256xf32>, i32 -> vector<8x256xf32>
    %cst_241 = arith.constant 0.000000e+00 : f32
    %599 = vector.broadcast %cst_241 : f32 to vector<8x256xf32>
    %600 = arith.select %38, %598, %599 : vector<8x256xi1>, vector<8x256xf32>
    %c255_i32_242 = arith.constant 255 : i32
    %601 = tpu.dynamic_rotate %597 by %c255_i32_242 dim 1 : vector<8x256xf32>, i32 -> vector<8x256xf32>
    %cst_243 = arith.constant 0.000000e+00 : f32
    %602 = vector.broadcast %cst_243 : f32 to vector<8x256xf32>
    %603 = arith.select %40, %601, %602 : vector<8x256xi1>, vector<8x256xf32>
    %604 = tpu.concatenate %600, %597, %603 in 0 : vector<8x256xf32>, vector<8x256xf32>, vector<8x256xf32> -> vector<24x256xf32>
    %c0_244 = arith.constant 0 : index
    %c0_245 = arith.constant 0 : index
    %605 = vector.load %arg3[%c0_244, %c0_245] : memref<16x24xf32, #tpu.memory_space<vmem>>, vector<16x24xf32>
    %cst_246 = arith.constant dense<0.000000e+00> : vector<16x256xf32>
    %606 = tpu.matmul %605, %604, %cst_246 {dimension_numbers = #tpu.dot_dimension_numbers<[1], [0], [0], [1], [0, 0, 1, 1], [], []>} : vector<16x24xf32>, vector<24x256xf32>, vector<16x256xf32> -> vector<16x256xf32>
    %607 = vector.extract_strided_slice %606 {offsets = [0, 0], sizes = [16, 128], strides = [1, 1]} : vector<16x256xf32> to vector<16x128xf32>
    %cst_247 = arith.constant dense<0x7F800000> : vector<16xf32>
    %608 = vector.multi_reduction <minimumf>, %607, %cst_247 [1] : vector<16x128xf32> to vector<16xf32>
    %609 = vector.shape_cast %608 : vector<16xf32> to vector<16x1xf32>
    %cst_248 = arith.constant dense<0xFF800000> : vector<16xf32>
    %610 = vector.multi_reduction <maximumf>, %607, %cst_248 [1] : vector<16x128xf32> to vector<16xf32>
    %611 = vector.shape_cast %610 : vector<16xf32> to vector<16x1xf32>
    %612 = vector.broadcast %609 : vector<16x1xf32> to vector<16x128xf32>
    %613 = arith.subf %607, %612 : vector<16x128xf32>
    %614 = arith.subf %611, %609 : vector<16x1xf32>
    %cst_249 = arith.constant 9.99999996E-13 : f32
    %615 = vector.broadcast %cst_249 : f32 to vector<16x1xf32>
    %616 = arith.addf %614, %615 : vector<16x1xf32>
    %617 = tpu.reciprocal %616 : vector<16x1xf32> -> vector<16x1xf32>
    %618 = vector.broadcast %617 : vector<16x1xf32> to vector<16x128xf32>
    %619 = arith.mulf %613, %618 : vector<16x128xf32>
    %620 = vector.extract_strided_slice %606 {offsets = [0, 128], sizes = [16, 128], strides = [1, 1]} : vector<16x256xf32> to vector<16x128xf32>
    %cst_250 = arith.constant dense<0x7F800000> : vector<16xf32>
    %621 = vector.multi_reduction <minimumf>, %620, %cst_250 [1] : vector<16x128xf32> to vector<16xf32>
    %622 = vector.shape_cast %621 : vector<16xf32> to vector<16x1xf32>
    %cst_251 = arith.constant dense<0xFF800000> : vector<16xf32>
    %623 = vector.multi_reduction <maximumf>, %620, %cst_251 [1] : vector<16x128xf32> to vector<16xf32>
    %624 = vector.shape_cast %623 : vector<16xf32> to vector<16x1xf32>
    %625 = vector.broadcast %622 : vector<16x1xf32> to vector<16x128xf32>
    %626 = arith.subf %620, %625 : vector<16x128xf32>
    %627 = arith.subf %624, %622 : vector<16x1xf32>
    %cst_252 = arith.constant 9.99999996E-13 : f32
    %628 = vector.broadcast %cst_252 : f32 to vector<16x1xf32>
    %629 = arith.addf %627, %628 : vector<16x1xf32>
    %630 = tpu.reciprocal %629 : vector<16x1xf32> -> vector<16x1xf32>
    %631 = vector.broadcast %630 : vector<16x1xf32> to vector<16x128xf32>
    %632 = arith.mulf %626, %631 : vector<16x128xf32>
    %633 = tpu.concatenate %619, %632 in 1 : vector<16x128xf32>, vector<16x128xf32> -> vector<16x256xf32>
    %c0_253 = arith.constant 0 : index
    %c0_254 = arith.constant 0 : index
    %634 = vector.load %arg6[%c0_253, %c0_254] : memref<16x256xf32, #tpu.memory_space<vmem>>, vector<16x256xf32>
    %635 = arith.subf %633, %634 : vector<16x256xf32>
    %cst_255 = arith.constant 5.000000e-01 : f32
    %636 = vector.broadcast %cst_255 : f32 to vector<16x256xf32>
    %637 = arith.mulf %635, %636 : vector<16x256xf32>
    %638 = arith.addf %634, %637 : vector<16x256xf32>
    %cst_256 = arith.constant 5.000000e-01 : f32
    %639 = vector.broadcast %cst_256 : f32 to vector<16x256xf32>
    %640 = arith.cmpf oge, %638, %639 : vector<16x256xf32>
    %641 = arith.extui %640 : vector<16x256xi1> to vector<16x256xi32>
    %642 = arith.sitofp %641 : vector<16x256xi32> to vector<16x256xf32>
    %cst_257 = arith.constant 1.000000e+00 : f32
    %643 = vector.broadcast %cst_257 : f32 to vector<16x256xf32>
    %644 = arith.subf %643, %642 : vector<16x256xf32>
    %645 = arith.mulf %638, %644 : vector<16x256xf32>
    %c0_258 = arith.constant 0 : index
    %c0_259 = arith.constant 0 : index
    %646 = vector.load %arg6[%c0_258, %c0_259] : memref<16x256xf32, #tpu.memory_space<vmem>>, vector<16x256xf32>
    tpu.vector_store %arg6[%c0_258, %c0_259], %645 {strides = array<i32>} : memref<16x256xf32, #tpu.memory_space<vmem>>, vector<16x256xf32>,
    %647 = vector.extract_strided_slice %642 {offsets = [0, 0], sizes = [8, 256], strides = [1, 1]} : vector<16x256xf32> to vector<8x256xf32>
    %648 = vector.extract_strided_slice %642 {offsets = [8, 0], sizes = [8, 256], strides = [1, 1]} : vector<16x256xf32> to vector<8x256xf32>
    %c0_260 = arith.constant 0 : index
    %c0_261 = arith.constant 0 : index
    %649 = vector.load %arg4[%c0_260, %c0_261] : memref<8x24xf32, #tpu.memory_space<vmem>>, vector<8x24xf32>
    %c1_i32_262 = arith.constant 1 : i32
    %650 = tpu.dynamic_rotate %647 by %c1_i32_262 dim 1 : vector<8x256xf32>, i32 -> vector<8x256xf32>
    %cst_263 = arith.constant 0.000000e+00 : f32
    %651 = vector.broadcast %cst_263 : f32 to vector<8x256xf32>
    %652 = arith.select %42, %650, %651 : vector<8x256xi1>, vector<8x256xf32>
    %c255_i32_264 = arith.constant 255 : i32
    %653 = tpu.dynamic_rotate %647 by %c255_i32_264 dim 1 : vector<8x256xf32>, i32 -> vector<8x256xf32>
    %cst_265 = arith.constant 0.000000e+00 : f32
    %654 = vector.broadcast %cst_265 : f32 to vector<8x256xf32>
    %655 = arith.select %44, %653, %654 : vector<8x256xi1>, vector<8x256xf32>
    %656 = tpu.concatenate %652, %647, %655 in 0 : vector<8x256xf32>, vector<8x256xf32>, vector<8x256xf32> -> vector<24x256xf32>
    %cst_266 = arith.constant dense<0.000000e+00> : vector<8x256xf32>
    %657 = tpu.matmul %649, %656, %cst_266 {dimension_numbers = #tpu.dot_dimension_numbers<[1], [0], [0], [1], [0, 0, 1, 1], [], []>} : vector<8x24xf32>, vector<24x256xf32>, vector<8x256xf32> -> vector<8x256xf32>
    %658 = vector.extract_strided_slice %657 {offsets = [0, 0], sizes = [8, 128], strides = [1, 1]} : vector<8x256xf32> to vector<8x128xf32>
    %cst_267 = arith.constant dense<0x7F800000> : vector<8xf32>
    %659 = vector.multi_reduction <minimumf>, %658, %cst_267 [1] : vector<8x128xf32> to vector<8xf32>
    %660 = vector.shape_cast %659 : vector<8xf32> to vector<8x1xf32>
    %cst_268 = arith.constant dense<0xFF800000> : vector<8xf32>
    %661 = vector.multi_reduction <maximumf>, %658, %cst_268 [1] : vector<8x128xf32> to vector<8xf32>
    %662 = vector.shape_cast %661 : vector<8xf32> to vector<8x1xf32>
    %663 = vector.broadcast %660 : vector<8x1xf32> to vector<8x128xf32>
    %664 = arith.subf %658, %663 : vector<8x128xf32>
    %665 = arith.subf %662, %660 : vector<8x1xf32>
    %cst_269 = arith.constant 9.99999996E-13 : f32
    %666 = vector.broadcast %cst_269 : f32 to vector<8x1xf32>
    %667 = arith.addf %665, %666 : vector<8x1xf32>
    %668 = tpu.reciprocal %667 : vector<8x1xf32> -> vector<8x1xf32>
    %669 = vector.broadcast %668 : vector<8x1xf32> to vector<8x128xf32>
    %670 = arith.mulf %664, %669 : vector<8x128xf32>
    %671 = vector.extract_strided_slice %657 {offsets = [0, 128], sizes = [8, 128], strides = [1, 1]} : vector<8x256xf32> to vector<8x128xf32>
    %cst_270 = arith.constant dense<0x7F800000> : vector<8xf32>
    %672 = vector.multi_reduction <minimumf>, %671, %cst_270 [1] : vector<8x128xf32> to vector<8xf32>
    %673 = vector.shape_cast %672 : vector<8xf32> to vector<8x1xf32>
    %cst_271 = arith.constant dense<0xFF800000> : vector<8xf32>
    %674 = vector.multi_reduction <maximumf>, %671, %cst_271 [1] : vector<8x128xf32> to vector<8xf32>
    %675 = vector.shape_cast %674 : vector<8xf32> to vector<8x1xf32>
    %676 = vector.broadcast %673 : vector<8x1xf32> to vector<8x128xf32>
    %677 = arith.subf %671, %676 : vector<8x128xf32>
    %678 = arith.subf %675, %673 : vector<8x1xf32>
    %cst_272 = arith.constant 9.99999996E-13 : f32
    %679 = vector.broadcast %cst_272 : f32 to vector<8x1xf32>
    %680 = arith.addf %678, %679 : vector<8x1xf32>
    %681 = tpu.reciprocal %680 : vector<8x1xf32> -> vector<8x1xf32>
    %682 = vector.broadcast %681 : vector<8x1xf32> to vector<8x128xf32>
    %683 = arith.mulf %677, %682 : vector<8x128xf32>
    %684 = tpu.concatenate %670, %683 in 1 : vector<8x128xf32>, vector<8x128xf32> -> vector<8x256xf32>
    %c0_273 = arith.constant 0 : index
    %c0_274 = arith.constant 0 : index
    %685 = vector.load %arg7[%c0_273, %c0_274] : memref<8x256xf32, #tpu.memory_space<vmem>>, vector<8x256xf32>
    %686 = arith.subf %684, %685 : vector<8x256xf32>
    %cst_275 = arith.constant 5.000000e-01 : f32
    %687 = vector.broadcast %cst_275 : f32 to vector<8x256xf32>
    %688 = arith.mulf %686, %687 : vector<8x256xf32>
    %689 = arith.addf %685, %688 : vector<8x256xf32>
    %cst_276 = arith.constant 5.000000e-01 : f32
    %690 = vector.broadcast %cst_276 : f32 to vector<8x256xf32>
    %691 = arith.cmpf oge, %689, %690 : vector<8x256xf32>
    %692 = arith.extui %691 : vector<8x256xi1> to vector<8x256xi32>
    %693 = arith.sitofp %692 : vector<8x256xi32> to vector<8x256xf32>
    %cst_277 = arith.constant 1.000000e+00 : f32
    %694 = vector.broadcast %cst_277 : f32 to vector<8x256xf32>
    %695 = arith.subf %694, %693 : vector<8x256xf32>
    %696 = arith.mulf %689, %695 : vector<8x256xf32>
    %c0_278 = arith.constant 0 : index
    %c0_279 = arith.constant 0 : index
    %697 = vector.load %arg7[%c0_278, %c0_279] : memref<8x256xf32, #tpu.memory_space<vmem>>, vector<8x256xf32>
    tpu.vector_store %arg7[%c0_278, %c0_279], %696 {strides = array<i32>} : memref<8x256xf32, #tpu.memory_space<vmem>>, vector<8x256xf32>,
    %698 = arith.addf %648, %693 : vector<8x256xf32>
    %cst_280 = arith.constant 5.000000e-01 : f32
    %699 = vector.broadcast %cst_280 : f32 to vector<8x256xf32>
    %700 = arith.mulf %699, %698 : vector<8x256xf32>
    %701 = arith.index_cast %c5_i32 : i32 to index
    %c0_281 = arith.constant 0 : index
    %c0_282 = arith.constant 0 : index
    %702 = vector.load %arg5[%701, %c0_281, %c0_282] : memref<8x8x256xf32, #tpu.memory_space<vmem>>, vector<1x8x256xf32>
    %703 = vector.shape_cast %702 : vector<1x8x256xf32> to vector<8x256xf32>
    %704 = vector.shape_cast %700 : vector<8x256xf32> to vector<1x8x256xf32>
    tpu.vector_store %arg5[%701, %c0_281, %c0_282], %704 {strides = array<i32>} : memref<8x8x256xf32, #tpu.memory_space<vmem>>, vector<1x8x256xf32>,
    %c6_i32 = arith.constant 6 : i32
    %705 = arith.index_cast %c6_i32 : i32 to index
    %c0_283 = arith.constant 0 : index
    %c0_284 = arith.constant 0 : index
    %706 = vector.load %arg2[%705, %c0_283, %c0_284] : memref<8x8x256xf32, #tpu.memory_space<vmem>>, vector<1x8x256xf32>
    %707 = vector.shape_cast %706 : vector<1x8x256xf32> to vector<8x256xf32>
    %c1_i32_285 = arith.constant 1 : i32
    %708 = tpu.dynamic_rotate %707 by %c1_i32_285 dim 1 : vector<8x256xf32>, i32 -> vector<8x256xf32>
    %cst_286 = arith.constant 0.000000e+00 : f32
    %709 = vector.broadcast %cst_286 : f32 to vector<8x256xf32>
    %710 = arith.select %38, %708, %709 : vector<8x256xi1>, vector<8x256xf32>
    %c255_i32_287 = arith.constant 255 : i32
    %711 = tpu.dynamic_rotate %707 by %c255_i32_287 dim 1 : vector<8x256xf32>, i32 -> vector<8x256xf32>
    %cst_288 = arith.constant 0.000000e+00 : f32
    %712 = vector.broadcast %cst_288 : f32 to vector<8x256xf32>
    %713 = arith.select %40, %711, %712 : vector<8x256xi1>, vector<8x256xf32>
    %714 = tpu.concatenate %710, %707, %713 in 0 : vector<8x256xf32>, vector<8x256xf32>, vector<8x256xf32> -> vector<24x256xf32>
    %c0_289 = arith.constant 0 : index
    %c0_290 = arith.constant 0 : index
    %715 = vector.load %arg3[%c0_289, %c0_290] : memref<16x24xf32, #tpu.memory_space<vmem>>, vector<16x24xf32>
    %cst_291 = arith.constant dense<0.000000e+00> : vector<16x256xf32>
    %716 = tpu.matmul %715, %714, %cst_291 {dimension_numbers = #tpu.dot_dimension_numbers<[1], [0], [0], [1], [0, 0, 1, 1], [], []>} : vector<16x24xf32>, vector<24x256xf32>, vector<16x256xf32> -> vector<16x256xf32>
    %717 = vector.extract_strided_slice %716 {offsets = [0, 0], sizes = [16, 128], strides = [1, 1]} : vector<16x256xf32> to vector<16x128xf32>
    %cst_292 = arith.constant dense<0x7F800000> : vector<16xf32>
    %718 = vector.multi_reduction <minimumf>, %717, %cst_292 [1] : vector<16x128xf32> to vector<16xf32>
    %719 = vector.shape_cast %718 : vector<16xf32> to vector<16x1xf32>
    %cst_293 = arith.constant dense<0xFF800000> : vector<16xf32>
    %720 = vector.multi_reduction <maximumf>, %717, %cst_293 [1] : vector<16x128xf32> to vector<16xf32>
    %721 = vector.shape_cast %720 : vector<16xf32> to vector<16x1xf32>
    %722 = vector.broadcast %719 : vector<16x1xf32> to vector<16x128xf32>
    %723 = arith.subf %717, %722 : vector<16x128xf32>
    %724 = arith.subf %721, %719 : vector<16x1xf32>
    %cst_294 = arith.constant 9.99999996E-13 : f32
    %725 = vector.broadcast %cst_294 : f32 to vector<16x1xf32>
    %726 = arith.addf %724, %725 : vector<16x1xf32>
    %727 = tpu.reciprocal %726 : vector<16x1xf32> -> vector<16x1xf32>
    %728 = vector.broadcast %727 : vector<16x1xf32> to vector<16x128xf32>
    %729 = arith.mulf %723, %728 : vector<16x128xf32>
    %730 = vector.extract_strided_slice %716 {offsets = [0, 128], sizes = [16, 128], strides = [1, 1]} : vector<16x256xf32> to vector<16x128xf32>
    %cst_295 = arith.constant dense<0x7F800000> : vector<16xf32>
    %731 = vector.multi_reduction <minimumf>, %730, %cst_295 [1] : vector<16x128xf32> to vector<16xf32>
    %732 = vector.shape_cast %731 : vector<16xf32> to vector<16x1xf32>
    %cst_296 = arith.constant dense<0xFF800000> : vector<16xf32>
    %733 = vector.multi_reduction <maximumf>, %730, %cst_296 [1] : vector<16x128xf32> to vector<16xf32>
    %734 = vector.shape_cast %733 : vector<16xf32> to vector<16x1xf32>
    %735 = vector.broadcast %732 : vector<16x1xf32> to vector<16x128xf32>
    %736 = arith.subf %730, %735 : vector<16x128xf32>
    %737 = arith.subf %734, %732 : vector<16x1xf32>
    %cst_297 = arith.constant 9.99999996E-13 : f32
    %738 = vector.broadcast %cst_297 : f32 to vector<16x1xf32>
    %739 = arith.addf %737, %738 : vector<16x1xf32>
    %740 = tpu.reciprocal %739 : vector<16x1xf32> -> vector<16x1xf32>
    %741 = vector.broadcast %740 : vector<16x1xf32> to vector<16x128xf32>
    %742 = arith.mulf %736, %741 : vector<16x128xf32>
    %743 = tpu.concatenate %729, %742 in 1 : vector<16x128xf32>, vector<16x128xf32> -> vector<16x256xf32>
    %c0_298 = arith.constant 0 : index
    %c0_299 = arith.constant 0 : index
    %744 = vector.load %arg6[%c0_298, %c0_299] : memref<16x256xf32, #tpu.memory_space<vmem>>, vector<16x256xf32>
    %745 = arith.subf %743, %744 : vector<16x256xf32>
    %cst_300 = arith.constant 5.000000e-01 : f32
    %746 = vector.broadcast %cst_300 : f32 to vector<16x256xf32>
    %747 = arith.mulf %745, %746 : vector<16x256xf32>
    %748 = arith.addf %744, %747 : vector<16x256xf32>
    %cst_301 = arith.constant 5.000000e-01 : f32
    %749 = vector.broadcast %cst_301 : f32 to vector<16x256xf32>
    %750 = arith.cmpf oge, %748, %749 : vector<16x256xf32>
    %751 = arith.extui %750 : vector<16x256xi1> to vector<16x256xi32>
    %752 = arith.sitofp %751 : vector<16x256xi32> to vector<16x256xf32>
    %cst_302 = arith.constant 1.000000e+00 : f32
    %753 = vector.broadcast %cst_302 : f32 to vector<16x256xf32>
    %754 = arith.subf %753, %752 : vector<16x256xf32>
    %755 = arith.mulf %748, %754 : vector<16x256xf32>
    %c0_303 = arith.constant 0 : index
    %c0_304 = arith.constant 0 : index
    %756 = vector.load %arg6[%c0_303, %c0_304] : memref<16x256xf32, #tpu.memory_space<vmem>>, vector<16x256xf32>
    tpu.vector_store %arg6[%c0_303, %c0_304], %755 {strides = array<i32>} : memref<16x256xf32, #tpu.memory_space<vmem>>, vector<16x256xf32>,
    %757 = vector.extract_strided_slice %752 {offsets = [0, 0], sizes = [8, 256], strides = [1, 1]} : vector<16x256xf32> to vector<8x256xf32>
    %758 = vector.extract_strided_slice %752 {offsets = [8, 0], sizes = [8, 256], strides = [1, 1]} : vector<16x256xf32> to vector<8x256xf32>
    %c0_305 = arith.constant 0 : index
    %c0_306 = arith.constant 0 : index
    %759 = vector.load %arg4[%c0_305, %c0_306] : memref<8x24xf32, #tpu.memory_space<vmem>>, vector<8x24xf32>
    %c1_i32_307 = arith.constant 1 : i32
    %760 = tpu.dynamic_rotate %757 by %c1_i32_307 dim 1 : vector<8x256xf32>, i32 -> vector<8x256xf32>
    %cst_308 = arith.constant 0.000000e+00 : f32
    %761 = vector.broadcast %cst_308 : f32 to vector<8x256xf32>
    %762 = arith.select %42, %760, %761 : vector<8x256xi1>, vector<8x256xf32>
    %c255_i32_309 = arith.constant 255 : i32
    %763 = tpu.dynamic_rotate %757 by %c255_i32_309 dim 1 : vector<8x256xf32>, i32 -> vector<8x256xf32>
    %cst_310 = arith.constant 0.000000e+00 : f32
    %764 = vector.broadcast %cst_310 : f32 to vector<8x256xf32>
    %765 = arith.select %44, %763, %764 : vector<8x256xi1>, vector<8x256xf32>
    %766 = tpu.concatenate %762, %757, %765 in 0 : vector<8x256xf32>, vector<8x256xf32>, vector<8x256xf32> -> vector<24x256xf32>
    %cst_311 = arith.constant dense<0.000000e+00> : vector<8x256xf32>
    %767 = tpu.matmul %759, %766, %cst_311 {dimension_numbers = #tpu.dot_dimension_numbers<[1], [0], [0], [1], [0, 0, 1, 1], [], []>} : vector<8x24xf32>, vector<24x256xf32>, vector<8x256xf32> -> vector<8x256xf32>
    %768 = vector.extract_strided_slice %767 {offsets = [0, 0], sizes = [8, 128], strides = [1, 1]} : vector<8x256xf32> to vector<8x128xf32>
    %cst_312 = arith.constant dense<0x7F800000> : vector<8xf32>
    %769 = vector.multi_reduction <minimumf>, %768, %cst_312 [1] : vector<8x128xf32> to vector<8xf32>
    %770 = vector.shape_cast %769 : vector<8xf32> to vector<8x1xf32>
    %cst_313 = arith.constant dense<0xFF800000> : vector<8xf32>
    %771 = vector.multi_reduction <maximumf>, %768, %cst_313 [1] : vector<8x128xf32> to vector<8xf32>
    %772 = vector.shape_cast %771 : vector<8xf32> to vector<8x1xf32>
    %773 = vector.broadcast %770 : vector<8x1xf32> to vector<8x128xf32>
    %774 = arith.subf %768, %773 : vector<8x128xf32>
    %775 = arith.subf %772, %770 : vector<8x1xf32>
    %cst_314 = arith.constant 9.99999996E-13 : f32
    %776 = vector.broadcast %cst_314 : f32 to vector<8x1xf32>
    %777 = arith.addf %775, %776 : vector<8x1xf32>
    %778 = tpu.reciprocal %777 : vector<8x1xf32> -> vector<8x1xf32>
    %779 = vector.broadcast %778 : vector<8x1xf32> to vector<8x128xf32>
    %780 = arith.mulf %774, %779 : vector<8x128xf32>
    %781 = vector.extract_strided_slice %767 {offsets = [0, 128], sizes = [8, 128], strides = [1, 1]} : vector<8x256xf32> to vector<8x128xf32>
    %cst_315 = arith.constant dense<0x7F800000> : vector<8xf32>
    %782 = vector.multi_reduction <minimumf>, %781, %cst_315 [1] : vector<8x128xf32> to vector<8xf32>
    %783 = vector.shape_cast %782 : vector<8xf32> to vector<8x1xf32>
    %cst_316 = arith.constant dense<0xFF800000> : vector<8xf32>
    %784 = vector.multi_reduction <maximumf>, %781, %cst_316 [1] : vector<8x128xf32> to vector<8xf32>
    %785 = vector.shape_cast %784 : vector<8xf32> to vector<8x1xf32>
    %786 = vector.broadcast %783 : vector<8x1xf32> to vector<8x128xf32>
    %787 = arith.subf %781, %786 : vector<8x128xf32>
    %788 = arith.subf %785, %783 : vector<8x1xf32>
    %cst_317 = arith.constant 9.99999996E-13 : f32
    %789 = vector.broadcast %cst_317 : f32 to vector<8x1xf32>
    %790 = arith.addf %788, %789 : vector<8x1xf32>
    %791 = tpu.reciprocal %790 : vector<8x1xf32> -> vector<8x1xf32>
    %792 = vector.broadcast %791 : vector<8x1xf32> to vector<8x128xf32>
    %793 = arith.mulf %787, %792 : vector<8x128xf32>
    %794 = tpu.concatenate %780, %793 in 1 : vector<8x128xf32>, vector<8x128xf32> -> vector<8x256xf32>
    %c0_318 = arith.constant 0 : index
    %c0_319 = arith.constant 0 : index
    %795 = vector.load %arg7[%c0_318, %c0_319] : memref<8x256xf32, #tpu.memory_space<vmem>>, vector<8x256xf32>
    %796 = arith.subf %794, %795 : vector<8x256xf32>
    %cst_320 = arith.constant 5.000000e-01 : f32
    %797 = vector.broadcast %cst_320 : f32 to vector<8x256xf32>
    %798 = arith.mulf %796, %797 : vector<8x256xf32>
    %799 = arith.addf %795, %798 : vector<8x256xf32>
    %cst_321 = arith.constant 5.000000e-01 : f32
    %800 = vector.broadcast %cst_321 : f32 to vector<8x256xf32>
    %801 = arith.cmpf oge, %799, %800 : vector<8x256xf32>
    %802 = arith.extui %801 : vector<8x256xi1> to vector<8x256xi32>
    %803 = arith.sitofp %802 : vector<8x256xi32> to vector<8x256xf32>
    %cst_322 = arith.constant 1.000000e+00 : f32
    %804 = vector.broadcast %cst_322 : f32 to vector<8x256xf32>
    %805 = arith.subf %804, %803 : vector<8x256xf32>
    %806 = arith.mulf %799, %805 : vector<8x256xf32>
    %c0_323 = arith.constant 0 : index
    %c0_324 = arith.constant 0 : index
    %807 = vector.load %arg7[%c0_323, %c0_324] : memref<8x256xf32, #tpu.memory_space<vmem>>, vector<8x256xf32>
    tpu.vector_store %arg7[%c0_323, %c0_324], %806 {strides = array<i32>} : memref<8x256xf32, #tpu.memory_space<vmem>>, vector<8x256xf32>,
    %808 = arith.addf %758, %803 : vector<8x256xf32>
    %cst_325 = arith.constant 5.000000e-01 : f32
    %809 = vector.broadcast %cst_325 : f32 to vector<8x256xf32>
    %810 = arith.mulf %809, %808 : vector<8x256xf32>
    %811 = arith.index_cast %c6_i32 : i32 to index
    %c0_326 = arith.constant 0 : index
    %c0_327 = arith.constant 0 : index
    %812 = vector.load %arg5[%811, %c0_326, %c0_327] : memref<8x8x256xf32, #tpu.memory_space<vmem>>, vector<1x8x256xf32>
    %813 = vector.shape_cast %812 : vector<1x8x256xf32> to vector<8x256xf32>
    %814 = vector.shape_cast %810 : vector<8x256xf32> to vector<1x8x256xf32>
    tpu.vector_store %arg5[%811, %c0_326, %c0_327], %814 {strides = array<i32>} : memref<8x8x256xf32, #tpu.memory_space<vmem>>, vector<1x8x256xf32>,
    %c7_i32 = arith.constant 7 : i32
    %815 = arith.index_cast %c7_i32 : i32 to index
    %c0_328 = arith.constant 0 : index
    %c0_329 = arith.constant 0 : index
    %816 = vector.load %arg2[%815, %c0_328, %c0_329] : memref<8x8x256xf32, #tpu.memory_space<vmem>>, vector<1x8x256xf32>
    %817 = vector.shape_cast %816 : vector<1x8x256xf32> to vector<8x256xf32>
    %c1_i32_330 = arith.constant 1 : i32
    %818 = tpu.dynamic_rotate %817 by %c1_i32_330 dim 1 : vector<8x256xf32>, i32 -> vector<8x256xf32>
    %cst_331 = arith.constant 0.000000e+00 : f32
    %819 = vector.broadcast %cst_331 : f32 to vector<8x256xf32>
    %820 = arith.select %38, %818, %819 : vector<8x256xi1>, vector<8x256xf32>
    %c255_i32_332 = arith.constant 255 : i32
    %821 = tpu.dynamic_rotate %817 by %c255_i32_332 dim 1 : vector<8x256xf32>, i32 -> vector<8x256xf32>
    %cst_333 = arith.constant 0.000000e+00 : f32
    %822 = vector.broadcast %cst_333 : f32 to vector<8x256xf32>
    %823 = arith.select %40, %821, %822 : vector<8x256xi1>, vector<8x256xf32>
    %824 = tpu.concatenate %820, %817, %823 in 0 : vector<8x256xf32>, vector<8x256xf32>, vector<8x256xf32> -> vector<24x256xf32>
    %c0_334 = arith.constant 0 : index
    %c0_335 = arith.constant 0 : index
    %825 = vector.load %arg3[%c0_334, %c0_335] : memref<16x24xf32, #tpu.memory_space<vmem>>, vector<16x24xf32>
    %cst_336 = arith.constant dense<0.000000e+00> : vector<16x256xf32>
    %826 = tpu.matmul %825, %824, %cst_336 {dimension_numbers = #tpu.dot_dimension_numbers<[1], [0], [0], [1], [0, 0, 1, 1], [], []>} : vector<16x24xf32>, vector<24x256xf32>, vector<16x256xf32> -> vector<16x256xf32>
    %827 = vector.extract_strided_slice %826 {offsets = [0, 0], sizes = [16, 128], strides = [1, 1]} : vector<16x256xf32> to vector<16x128xf32>
    %cst_337 = arith.constant dense<0x7F800000> : vector<16xf32>
    %828 = vector.multi_reduction <minimumf>, %827, %cst_337 [1] : vector<16x128xf32> to vector<16xf32>
    %829 = vector.shape_cast %828 : vector<16xf32> to vector<16x1xf32>
    %cst_338 = arith.constant dense<0xFF800000> : vector<16xf32>
    %830 = vector.multi_reduction <maximumf>, %827, %cst_338 [1] : vector<16x128xf32> to vector<16xf32>
    %831 = vector.shape_cast %830 : vector<16xf32> to vector<16x1xf32>
    %832 = vector.broadcast %829 : vector<16x1xf32> to vector<16x128xf32>
    %833 = arith.subf %827, %832 : vector<16x128xf32>
    %834 = arith.subf %831, %829 : vector<16x1xf32>
    %cst_339 = arith.constant 9.99999996E-13 : f32
    %835 = vector.broadcast %cst_339 : f32 to vector<16x1xf32>
    %836 = arith.addf %834, %835 : vector<16x1xf32>
    %837 = tpu.reciprocal %836 : vector<16x1xf32> -> vector<16x1xf32>
    %838 = vector.broadcast %837 : vector<16x1xf32> to vector<16x128xf32>
    %839 = arith.mulf %833, %838 : vector<16x128xf32>
    %840 = vector.extract_strided_slice %826 {offsets = [0, 128], sizes = [16, 128], strides = [1, 1]} : vector<16x256xf32> to vector<16x128xf32>
    %cst_340 = arith.constant dense<0x7F800000> : vector<16xf32>
    %841 = vector.multi_reduction <minimumf>, %840, %cst_340 [1] : vector<16x128xf32> to vector<16xf32>
    %842 = vector.shape_cast %841 : vector<16xf32> to vector<16x1xf32>
    %cst_341 = arith.constant dense<0xFF800000> : vector<16xf32>
    %843 = vector.multi_reduction <maximumf>, %840, %cst_341 [1] : vector<16x128xf32> to vector<16xf32>
    %844 = vector.shape_cast %843 : vector<16xf32> to vector<16x1xf32>
    %845 = vector.broadcast %842 : vector<16x1xf32> to vector<16x128xf32>
    %846 = arith.subf %840, %845 : vector<16x128xf32>
    %847 = arith.subf %844, %842 : vector<16x1xf32>
    %cst_342 = arith.constant 9.99999996E-13 : f32
    %848 = vector.broadcast %cst_342 : f32 to vector<16x1xf32>
    %849 = arith.addf %847, %848 : vector<16x1xf32>
    %850 = tpu.reciprocal %849 : vector<16x1xf32> -> vector<16x1xf32>
    %851 = vector.broadcast %850 : vector<16x1xf32> to vector<16x128xf32>
    %852 = arith.mulf %846, %851 : vector<16x128xf32>
    %853 = tpu.concatenate %839, %852 in 1 : vector<16x128xf32>, vector<16x128xf32> -> vector<16x256xf32>
    %c0_343 = arith.constant 0 : index
    %c0_344 = arith.constant 0 : index
    %854 = vector.load %arg6[%c0_343, %c0_344] : memref<16x256xf32, #tpu.memory_space<vmem>>, vector<16x256xf32>
    %855 = arith.subf %853, %854 : vector<16x256xf32>
    %cst_345 = arith.constant 5.000000e-01 : f32
    %856 = vector.broadcast %cst_345 : f32 to vector<16x256xf32>
    %857 = arith.mulf %855, %856 : vector<16x256xf32>
    %858 = arith.addf %854, %857 : vector<16x256xf32>
    %cst_346 = arith.constant 5.000000e-01 : f32
    %859 = vector.broadcast %cst_346 : f32 to vector<16x256xf32>
    %860 = arith.cmpf oge, %858, %859 : vector<16x256xf32>
    %861 = arith.extui %860 : vector<16x256xi1> to vector<16x256xi32>
    %862 = arith.sitofp %861 : vector<16x256xi32> to vector<16x256xf32>
    %cst_347 = arith.constant 1.000000e+00 : f32
    %863 = vector.broadcast %cst_347 : f32 to vector<16x256xf32>
    %864 = arith.subf %863, %862 : vector<16x256xf32>
    %865 = arith.mulf %858, %864 : vector<16x256xf32>
    %c0_348 = arith.constant 0 : index
    %c0_349 = arith.constant 0 : index
    %866 = vector.load %arg6[%c0_348, %c0_349] : memref<16x256xf32, #tpu.memory_space<vmem>>, vector<16x256xf32>
    tpu.vector_store %arg6[%c0_348, %c0_349], %865 {strides = array<i32>} : memref<16x256xf32, #tpu.memory_space<vmem>>, vector<16x256xf32>,
    %867 = vector.extract_strided_slice %862 {offsets = [0, 0], sizes = [8, 256], strides = [1, 1]} : vector<16x256xf32> to vector<8x256xf32>
    %868 = vector.extract_strided_slice %862 {offsets = [8, 0], sizes = [8, 256], strides = [1, 1]} : vector<16x256xf32> to vector<8x256xf32>
    %c0_350 = arith.constant 0 : index
    %c0_351 = arith.constant 0 : index
    %869 = vector.load %arg4[%c0_350, %c0_351] : memref<8x24xf32, #tpu.memory_space<vmem>>, vector<8x24xf32>
    %c1_i32_352 = arith.constant 1 : i32
    %870 = tpu.dynamic_rotate %867 by %c1_i32_352 dim 1 : vector<8x256xf32>, i32 -> vector<8x256xf32>
    %cst_353 = arith.constant 0.000000e+00 : f32
    %871 = vector.broadcast %cst_353 : f32 to vector<8x256xf32>
    %872 = arith.select %42, %870, %871 : vector<8x256xi1>, vector<8x256xf32>
    %c255_i32_354 = arith.constant 255 : i32
    %873 = tpu.dynamic_rotate %867 by %c255_i32_354 dim 1 : vector<8x256xf32>, i32 -> vector<8x256xf32>
    %cst_355 = arith.constant 0.000000e+00 : f32
    %874 = vector.broadcast %cst_355 : f32 to vector<8x256xf32>
    %875 = arith.select %44, %873, %874 : vector<8x256xi1>, vector<8x256xf32>
    %876 = tpu.concatenate %872, %867, %875 in 0 : vector<8x256xf32>, vector<8x256xf32>, vector<8x256xf32> -> vector<24x256xf32>
    %cst_356 = arith.constant dense<0.000000e+00> : vector<8x256xf32>
    %877 = tpu.matmul %869, %876, %cst_356 {dimension_numbers = #tpu.dot_dimension_numbers<[1], [0], [0], [1], [0, 0, 1, 1], [], []>} : vector<8x24xf32>, vector<24x256xf32>, vector<8x256xf32> -> vector<8x256xf32>
    %878 = vector.extract_strided_slice %877 {offsets = [0, 0], sizes = [8, 128], strides = [1, 1]} : vector<8x256xf32> to vector<8x128xf32>
    %cst_357 = arith.constant dense<0x7F800000> : vector<8xf32>
    %879 = vector.multi_reduction <minimumf>, %878, %cst_357 [1] : vector<8x128xf32> to vector<8xf32>
    %880 = vector.shape_cast %879 : vector<8xf32> to vector<8x1xf32>
    %cst_358 = arith.constant dense<0xFF800000> : vector<8xf32>
    %881 = vector.multi_reduction <maximumf>, %878, %cst_358 [1] : vector<8x128xf32> to vector<8xf32>
    %882 = vector.shape_cast %881 : vector<8xf32> to vector<8x1xf32>
    %883 = vector.broadcast %880 : vector<8x1xf32> to vector<8x128xf32>
    %884 = arith.subf %878, %883 : vector<8x128xf32>
    %885 = arith.subf %882, %880 : vector<8x1xf32>
    %cst_359 = arith.constant 9.99999996E-13 : f32
    %886 = vector.broadcast %cst_359 : f32 to vector<8x1xf32>
    %887 = arith.addf %885, %886 : vector<8x1xf32>
    %888 = tpu.reciprocal %887 : vector<8x1xf32> -> vector<8x1xf32>
    %889 = vector.broadcast %888 : vector<8x1xf32> to vector<8x128xf32>
    %890 = arith.mulf %884, %889 : vector<8x128xf32>
    %891 = vector.extract_strided_slice %877 {offsets = [0, 128], sizes = [8, 128], strides = [1, 1]} : vector<8x256xf32> to vector<8x128xf32>
    %cst_360 = arith.constant dense<0x7F800000> : vector<8xf32>
    %892 = vector.multi_reduction <minimumf>, %891, %cst_360 [1] : vector<8x128xf32> to vector<8xf32>
    %893 = vector.shape_cast %892 : vector<8xf32> to vector<8x1xf32>
    %cst_361 = arith.constant dense<0xFF800000> : vector<8xf32>
    %894 = vector.multi_reduction <maximumf>, %891, %cst_361 [1] : vector<8x128xf32> to vector<8xf32>
    %895 = vector.shape_cast %894 : vector<8xf32> to vector<8x1xf32>
    %896 = vector.broadcast %893 : vector<8x1xf32> to vector<8x128xf32>
    %897 = arith.subf %891, %896 : vector<8x128xf32>
    %898 = arith.subf %895, %893 : vector<8x1xf32>
    %cst_362 = arith.constant 9.99999996E-13 : f32
    %899 = vector.broadcast %cst_362 : f32 to vector<8x1xf32>
    %900 = arith.addf %898, %899 : vector<8x1xf32>
    %901 = tpu.reciprocal %900 : vector<8x1xf32> -> vector<8x1xf32>
    %902 = vector.broadcast %901 : vector<8x1xf32> to vector<8x128xf32>
    %903 = arith.mulf %897, %902 : vector<8x128xf32>
    %904 = tpu.concatenate %890, %903 in 1 : vector<8x128xf32>, vector<8x128xf32> -> vector<8x256xf32>
    %c0_363 = arith.constant 0 : index
    %c0_364 = arith.constant 0 : index
    %905 = vector.load %arg7[%c0_363, %c0_364] : memref<8x256xf32, #tpu.memory_space<vmem>>, vector<8x256xf32>
    %906 = arith.subf %904, %905 : vector<8x256xf32>
    %cst_365 = arith.constant 5.000000e-01 : f32
    %907 = vector.broadcast %cst_365 : f32 to vector<8x256xf32>
    %908 = arith.mulf %906, %907 : vector<8x256xf32>
    %909 = arith.addf %905, %908 : vector<8x256xf32>
    %cst_366 = arith.constant 5.000000e-01 : f32
    %910 = vector.broadcast %cst_366 : f32 to vector<8x256xf32>
    %911 = arith.cmpf oge, %909, %910 : vector<8x256xf32>
    %912 = arith.extui %911 : vector<8x256xi1> to vector<8x256xi32>
    %913 = arith.sitofp %912 : vector<8x256xi32> to vector<8x256xf32>
    %cst_367 = arith.constant 1.000000e+00 : f32
    %914 = vector.broadcast %cst_367 : f32 to vector<8x256xf32>
    %915 = arith.subf %914, %913 : vector<8x256xf32>
    %916 = arith.mulf %909, %915 : vector<8x256xf32>
    %c0_368 = arith.constant 0 : index
    %c0_369 = arith.constant 0 : index
    %917 = vector.load %arg7[%c0_368, %c0_369] : memref<8x256xf32, #tpu.memory_space<vmem>>, vector<8x256xf32>
    tpu.vector_store %arg7[%c0_368, %c0_369], %916 {strides = array<i32>} : memref<8x256xf32, #tpu.memory_space<vmem>>, vector<8x256xf32>,
    %918 = arith.addf %868, %913 : vector<8x256xf32>
    %cst_370 = arith.constant 5.000000e-01 : f32
    %919 = vector.broadcast %cst_370 : f32 to vector<8x256xf32>
    %920 = arith.mulf %919, %918 : vector<8x256xf32>
    %921 = arith.index_cast %c7_i32 : i32 to index
    %c0_371 = arith.constant 0 : index
    %c0_372 = arith.constant 0 : index
    %922 = vector.load %arg5[%921, %c0_371, %c0_372] : memref<8x8x256xf32, #tpu.memory_space<vmem>>, vector<1x8x256xf32>
    %923 = vector.shape_cast %922 : vector<1x8x256xf32> to vector<8x256xf32>
    %924 = vector.shape_cast %920 : vector<8x256xf32> to vector<1x8x256xf32>
    tpu.vector_store %arg5[%921, %c0_371, %c0_372], %924 {strides = array<i32>} : memref<8x8x256xf32, #tpu.memory_space<vmem>>, vector<1x8x256xf32>,
    %c8_i32 = arith.constant 8 : i32
    return
  }
  func.func @transform_0(%arg0: i32, %arg1: i32) -> (i32, i32, i32) {
    %c0_i32 = arith.constant 0 : i32
    %c0_i32_0 = arith.constant 0 : i32
    return %arg1, %c0_i32, %arg0 : i32, i32, i32
  }
  func.func @transform_1(%arg0: i32, %arg1: i32) -> (i32, i32) {
    %c0_i32 = arith.constant 0 : i32
    %c0_i32_0 = arith.constant 0 : i32
    %c0_i32_1 = arith.constant 0 : i32
    return %c0_i32, %c0_i32_0 : i32, i32
  }
  func.func @transform_2(%arg0: i32, %arg1: i32) -> (i32, i32) {
    %c0_i32 = arith.constant 0 : i32
    %c0_i32_0 = arith.constant 0 : i32
    %c0_i32_1 = arith.constant 0 : i32
    return %c0_i32, %c0_i32_0 : i32, i32
  }
  func.func @transform_3(%arg0: i32, %arg1: i32) -> (i32, i32, i32) {
    %c0_i32 = arith.constant 0 : i32
    %c0_i32_0 = arith.constant 0 : i32
    return %arg1, %c0_i32, %arg0 : i32, i32, i32
  }
}

</mosaic_0001>

<bundles_post_ra>
// kernel: tpu_custom_call.1
= control target key start
LH: loop header
LB: loop body
LE: loop exit
PB: predicated region body
PF: predicated region fallthrough
CT: control target
= control target key end

     0   :  { %s5342_s0 = inlined_call_operand.hbm [shape: f32[8,8,512], index: 0, kind: input, shape index: {}]   ;;  %s5343_s1 = inlined_call_operand.hbm [shape: f32[16,24], index: 1, kind: input, shape index: {}]   ;;  %s5344_s2 = inlined_call_operand.hbm [shape: f32[8,24], index: 2, kind: input, shape index: {}]   ;;  %s5345_s3 = inlined_call_operand.hbm [shape: f32[8,8,512], index: 3, kind: output, shape index: {}]  }
   0x1   :  { %5349 = sst [smem:[#allocation14_spill]] %s5343_s1 }
   0x2   :  { %8 = vsyncpa [#allocation5], 0 }
   0x3   :  { %10 = vsyncpa [#allocation5 + $0x1], 0 }
   0x4   :  { %11 = vsyncpa [#allocation8], 0 }
   0x5   :  { %12 = vsyncpa [#allocation6], 0 }
   0x6   :  { %14 = vsyncpa [#allocation6 + $0x1], 0  ;;  %s3776_s12 = smov 0   ;;  %s3778_s13 = smov 0  }
   0x7   :  { %s3780_s14 = smov 0   ;;  %s3782_s15 = smov 0  }
   0x8   :  { %s3784_s16 = smov 0   ;;  %s3786_s17 = smov 0  }
   0x9 LB: > { %s3068_s18 = sadd.s32 4294967295, %s3740_s17   ;;  %s3069_s19 = sadd.s32 4294967294, %s3740_s17   ;;  %s3740_s17 = sphi %s3786_s17, %s20_s17   ;;  %s3736_s16 = sphi %s3784_s16, %s5405_s16   ;;  %s3732_s15 = sphi %s3782_s15, %s5404_s15   ;;  %s3728_s14 = sphi %s3780_s14, %s5403_s14   ;;  %s3724_s13 = sphi %s3778_s13, %s5402_s13   ;;  %s3720_s12 = sphi %s3776_s12, %s5401_s12  }
   0xa   : > { %p54_p0 = scmp.ne.s32.totalorder %s3724_s13, %s3720_s12  ;;  %p3810_p1 = scmp.eq.s32.totalorder %s3068_s18, 0 }
   0xb   : > { %p3814_p2 = scmp.eq.s32.totalorder %s3068_s18, 1  ;;  %p128_p3 = scmp.eq.s32.totalorder %s3069_s19, 1 }
   0xc   : > { %p3820_p4 = por %p3810_p1, %p54_p0  ;;  %p3070_p5 = scmp.ge.s32.totalorder %s3740_s17, 1 }
   0xd   : > { %p3825_p6 = por %p128_p3, %p54_p0  ;;  %p135_p7 = scmp.lt.s32.totalorder %s3740_s17, 3 }
   0xe   : > { %s5354_s1 = sld [smem:[#allocation14_spill]]  ;;  %s3742_s28 = smov [#allocation7]  }
   0xf   : > { %p3833_p8 = pnand %p3070_p5, %p135_p7  ;;  %s148_s29 = sshll.u32 %s3742_s28, 4  ;;  %s149_s29 = int_to_ptr.vmem [resolvable:$true] %s148_s29 }
  0x10   : > { %p3073_p11 = scmp.ge.s32.totalorder %s3740_s17, 2  ;;  %s161_s5 = sshll.u32 %s5344_s2, 4  ;;  %s162_s5 = int_to_ptr.hbm [resolvable:$true] %s161_s5 }
  0x11   : > { %p3305_p9 = pneg %p3833_p8  ;;  %s3743_s6 = smov 128  }
  0x12   : > { %s3744_s7 = smov 8   ;;  %s3745_s8 = smov [#allocation9]  }
  0x13   : > { %p3306_p10 = pnand %p3305_p9, %p3810_p1  ;;  %s163_s9 = sshll.u32 %s3745_s8, 4  ;;  %s164_s9 = int_to_ptr.vmem [resolvable:$true] %s163_s9 }
  0x14   : > { %s146_s26 = sshll.u32 %s5354_s1, 4  ;;  %s32_s10 = sadd.s32 1, %s3736_s16  ;;  %s147_s26 = int_to_ptr.hbm [resolvable:$true] %s146_s26 }
  0x15   : > { %3308 = dma.hbm_to_vmem [thread:$0]  (!%p3306_p10), %s147_s26, 256, %s149_s29, [#allocation8], %s3743_s6, %s3743_s6, %s3744_s7  }
  0x16   : > { %3311 = dma.hbm_to_vmem [thread:$0]  (!%p3306_p10), %s162_s5, 128, %s164_s9, [#allocation8]  }
  0x17   : > { %s41_s11 = sadd.s32 1, %s3728_s14  ;;  %p34_p12 = scmp.ge.s32.totalorder %s32_s10, 2 }
  0x18   : > { %p48_p13 = scmp.ne.s32.totalorder %s3728_s14, %s3724_s13  ;;  %p49_p0 = scmp.eq.s32.totalorder %s3740_s17, 0 }
  0x19   : > { %p3322_p3 = scmp.lt.s32.totalorder %s3740_s17, 2  ;;  %s5407_s10 = smov (%p34_p12, %s32_s10), 0 }
  0x1a   : > { %p3853_p5 = por %p49_p0, %p48_p13  ;;  %p3859_p7 = por %p3814_p2, %p48_p13 }
  0x1b   : > { %s37_s24 = ssub.s32 %s3736_s16, %s5407_s10  ;;  %s174_s25 = sand.u32 1, %s3728_s14  }
  0x1c   : > { %p39_p9 = scmp.eq.s32.totalorder %s37_s24, 0  ;;  %s3074_s26 = sshll.u32 %s174_s25, 7 }
  0x1d   : > { %s3291_s28 = sshll.u32 %s3736_s16, 4  ;;  %s178_s7 = scalar_lea.vmem [#allocation4], %s3074_s26 }
  0x1e   : > { %s3868_s29 = scalar_select %p39_p9, %s3728_s14, %s41_s11  }
  0x1f   : > { %s186_s5 = scalar_lea.hbm %s5342_s0, %s3291_s28  ;;  %s189_s8 = sshll.u32 %s178_s7, 4  ;;  %s190_s8 = int_to_ptr.vmem [resolvable:$true] %s189_s8 }
  0x20   : > { %s187_s6 = sshll.u32 %s186_s5, 4  ;;  %p3313_p2 = pnand %p3322_p3, %p3853_p5  ;;  %s188_s6 = int_to_ptr.hbm [resolvable:$true] %s187_s6 }
  0x21   : > { %s175_s21 = scalar_lea.sflag [#allocation5], %s174_s25  ;;  %s3746_s9 = smov 512  }
  0x22   : > { %s3747_s1 = smov 256   ;;  %s3748_s24 = smov 16  }
  0x23   : > { %3315 = dma.hbm_to_vmem [thread:$0]  (!%p3313_p2), %s188_s6, 2048, %s190_s8, %s175_s21, %s3746_s9, %s3747_s1, %s3748_s24  }
  0x24   : > { %201 = sbr.rel (%p3833_p8) target bundleno = 3811 (0xee3), region = 32  ;;  %s3880_s11 = sand.u32 (!%p3833_p8), 1, %s3724_s13  }
  0x25   : > { %s3078_s26 = sshll.u32 (!%p3833_p8), %s3880_s11, 7  ;;  %s204_s28 = scalar_lea.sflag (!%p3833_p8), [#allocation5], %s3880_s11 }
  0x26   : > { %s3886_s18 = scalar_lea.vmem (!%p3833_p8), [#allocation4], %s3078_s26 }
  0x29   : > { %3707 = dma.done.wait (%p3820_p4), %s204_s28, 2048  }
  0x2a   : > { %3709 = vsyncadd (%p3820_p4), %s204_s28, 4294965248 }
  0x2b   : > { %3711 = dma.done.wait (%p3810_p1), [#allocation8], 384  }
  0x2c   : > { %3713 = vsyncadd (%p3810_p1), [#allocation8], 4294966912  ;;  %v286_v0 = vld [vmem:[%s3886_s18] sm:$0xff]  ;;  %s3749_s1 = smov 1   ;;  %s3750_s27 = smov 127   ;;  %v287_v1 = vld [vmem:[%s3886_s18 + $0x8] sm:$0xff]  ;;  %v255_v2 = vlaneseq }
  0x2d   : > { %288 = vrot.lane.b32.xlu1 %v286_v0, %s3749_s1  ;;  %297 = vrot.lane.b32.xlu0 %v286_v0, %s3750_s27  ;;  %v3925_v14 = vld [vmem:[#allocation7] sm:$0xff]  ;;  %vm5348_vm6 = vcmask 195584   ;;  %v3940_v19 = vld [vmem:[%s3886_s18 + $0x10] sm:$0xff]  ;;  %v3943_v20 = vld [vmem:[%s3886_s18 + $0x18] sm:$0xff]  ;;  %v3751_v49 = vmov 0.0   ;;  %s4524_s20 = scalar_lea.vmem [#allocation10], %s3078_s26 }
  0x2e   : > { %v3902_v3 = vand.u32 127, %v255_v2  ;;  %s3292_s22 = sshll.u32 %s3732_s15, 4  ;;  %s2959_s5 = sshll.u32 %s4524_s20, 4  ;;  %s2960_s5 = int_to_ptr.vmem [resolvable:$true] %s2959_s5 }
  0x2f   : > { %s2958_s4 = scalar_lea.hbm %s5345_s3, %s3292_s22  ;;  %s2944_s15 = scalar_lea.sflag [#allocation6], %s3880_s11 }
  0x30   : > { %v257_v4 = vadd.s32 128, %v3902_v3  ;;  %vm301_vm0 = vcmp.lt.s32.totalorder %v3902_v3, 127  ;;  %vm284_vm1 = vcmp.ne.s32.totalorder %v3902_v3, 127  ;;  %vm292_vm3 = vcmp.lt.s32.totalorder %v3902_v3, 1  ;;  %s2961_s6 = sshll.u32 %s2958_s4, 4  ;;  %s3674_s24 = scalar_lea.hbm %s5345_s3, 256  ;;  %s2962_s6 = int_to_ptr.hbm [resolvable:$true] %s2961_s6 }
  0x31   : > { %vm282_vm4 = vcmp.ne.s32.totalorder %v3902_v3, 0  ;;  %s3668_s7 = sshra.s32 %s2962_s6, 4  ;;  %s3669_s7 = int_to_ptr.hbm [resolvable:$true] %s3668_s7 }
  0x32   : > { %v269_v7 = vand.u32 127, %v257_v4  ;;  %s3670_s8 = scalar_lea.hbm %s3669_s7, 128  ;;  %p3675_p10 = scmp.lt.s32.totalorder %s3669_s7, %s5345_s3 }
  0x33   : > { %p3671_p1 = scmp.ne.s32.totalorder %s3669_s7, %s3670_s8  ;;  %p3676_p12 = scmp.lt.s32.totalorder %s3674_s24, %s3670_s8 }
  0x34   : > { %vm3907_vm2 = vcmp.ne.s32.totalorder %v269_v7, 127  ;;  %vm3921_vm5 = vcmp.ne.s32.totalorder %v269_v7, 0 }
  0x35   : > { %290 = vrot.lane.b32.xlu1 %v287_v1, %s3749_s1  ;;  %299 = vrot.lane.b32.xlu0 %v287_v1, %s3750_s27  ;;  %p3672_p4 = pnand %p3671_p1, %p3859_p7  ;;  %p3677_p13 = por %p3676_p12, %p3675_p10 }
  0x37   : > { %p3673_p8 = pneg %p3672_p4 }
  0x39   : > { %p3678_p0 = pnand %p3677_p13, %p3673_p8 }
  0x9f   : > { %v289_v5 = vpop.permute.xlu1 %288  ;;  %v298_v6 = vpop.permute.xlu0 %297 }
  0xa7   : > { %v300_v9 = vpop.permute.xlu0 %299  ;;  %v291_v12 = vpop.permute.xlu1 %290 }
  0xa8   : > { %v302_v10 = vsel %vm301_vm0, %v298_v6, %v300_v9  ;;  %v303_v11 = vsel %vm301_vm0, %v300_v9, %v298_v6  ;;  %v294_v15 = vsel %vm292_vm3, %v291_v12, %v289_v5  ;;  %v293_v16 = vsel %vm292_vm3, %v289_v5, %v291_v12 }
  0xa9   : > { %3082 = vmatpush.msk.msra.mxu0 %vm284_vm1, %v302_v10  ;;  %3086 = vmatpush.msk.msra.mxu1 %vm3907_vm2, %v303_v11  ;;  %v5346_v6 = vmov 1.0   ;;  %v3975_v11 = vld [vmem:[#allocation9] sm:$0xff] }
  0xab   : > { %329 = vmatpush.msra.mxu0 %v286_v0  ;;  %352 = vmatpush.msra.mxu1 %v287_v1 }
  0xad   : > { %3083 = vmatpush.msk.msra.mxu0 %vm282_vm4, %v294_v15  ;;  %3087 = vmatpush.msk.msra.mxu1 %vm3921_vm5, %v293_v16 }
  0xae   : > { %3084 = vmatmul.msk.f32.vlgmr.msra.gmra.mxu0 %vm5348_vm6, %v3925_v14  ;;  %3088 = vmatmul.msk.f32.vlgmr.msra.gmra.mxu1 %vm5348_vm6, %v3925_v14 }
 0x12b   : > { %v332_v17 = vpop.f32.mrf.mxu0  ;;  %v355_v18 = vpop.f32.mrf.mxu1 }
 0x12c   : > { %409 = vmax.xlane.f32.xlu1 %v355_v18  ;;  %405 = vmin.xlane.f32.xlu0 %v355_v18 }
 0x12d   : > { %361 = vmin.xlane.f32.xlu2 %v332_v17 }
 0x135   : > { %365 = vmax.xlane.f32.xlu2 %v332_v17 }
 0x140   : > { %622 = vrot.lane.b32.xlu0 %v3940_v19, %s3749_s1 }
 0x145   : > { %624 = vrot.lane.b32.xlu1 %v3943_v20, %s3749_s1 }
 0x14d   : > { %630 = vrot.lane.b32.xlu2 %v3940_v19, %s3750_s27 }
 0x19f   : > { %v410_v21 = vpop.xlane.xlu1 %409  ;;  %v406_v22 = vpop.xlane.xlu0 %405 }
 0x1a0   : > { %v415_v23 = vsub.f32 %v410_v21, %v406_v22  ;;  %v362_v24 = vpop.xlane.xlu2 %361  ;;  %v413_v38 = vsub.f32 %v355_v18, %v406_v22 }
 0x1a1   : > { %v369_v53 = vsub.f32 %v332_v17, %v362_v24 }
 0x1a2   : > { %v417_v25 = vadd.f32 1e-12, %v415_v23 }
 0x1a4   : > { %3468 = vrcp.f32 %v417_v25  ;;  %v430_v32 = vand.u32 2147483648, %v417_v25  ;;  %vm424_vm7 = vweird.f32 %v417_v25  ;;  %v428_v34 = vand.u32 2147483647, %v417_v25 }
 0x1a6   : > { %v431_v36 = vor.u32 1.1754944e-38, %v430_v32  ;;  %vm429_vm10 = vcmp.eq.f32.partialorder %v428_v34, 8.507059e+37  ;;  %v4016_v34 = vld [vmem:[%s3886_s18 + $0x20] sm:$0xff] }
 0x1a8   : > { %v366_v26 = vpop.xlane.xlu2 %365 }
 0x1a9   : > { %v371_v27 = vsub.f32 %v366_v26, %v362_v24 }
 0x1aa   : > { %v3469_v28 = vpop.eup %3468 }
 0x1ab   : > { %v420_v29 = vmul.f32 %v3469_v28, %v417_v25  ;;  %v373_v30 = vadd.f32 1e-12, %v371_v27  ;;  %vm425_vm8 = vweird.f32 %v3469_v28 }
 0x1ac   : > { %vm426_vm9 = vmor %vm424_vm7, %vm425_vm8 }
 0x1ad   : > { %v421_v31 = vsub.f32 1.0, %v420_v29  ;;  %3470 = vrcp.f32 %v373_v30  ;;  %v386_v45 = vand.u32 2147483648, %v373_v30  ;;  %v384_v47 = vand.u32 2147483647, %v373_v30 }
 0x1ae   : > { %vm380_vm13 = vweird.f32 %v373_v30 }
 0x1af   : > { %v422_v33 = vmul.f32 %v3469_v28, %v421_v31  ;;  %v387_v51 = vor.u32 1.1754944e-38, %v386_v45  ;;  %vm385_vm15 = vcmp.eq.f32.partialorder %v384_v47, 8.507059e+37 }
 0x1b0   : > { %v631_v63 = vpop.permute.xlu2 %630 }
 0x1b1   : > { %v423_v35 = vadd.f32 %v3469_v28, %v422_v33 }
 0x1b2   : > { %v623_v18 = vpop.permute.xlu0 %622 }
 0x1b3   : > { %v3471_v37 = vpop.eup %3470  ;;  %v427_v39 = vsel %vm426_vm9, %v3469_v28, %v423_v35 }
 0x1b4   : > { %v432_v40 = vsel %vm429_vm10, %v431_v36, %v427_v39  ;;  %v376_v41 = vmul.f32 %v3471_v37, %v373_v30  ;;  %vm381_vm11 = vweird.f32 %v3471_v37 }
 0x1b5   : > { %v447_v42 = vmul.f32 %v432_v40, %v413_v38  ;;  %vm382_vm14 = vmor %vm380_vm13, %vm381_vm11 }
 0x1b6   : > { %v377_v43 = vsub.f32 1.0, %v376_v41 }
 0x1b7   : > { %v458_v44 = vmul.f32 0.5, %v447_v42  ;;  %v625_v16 = vpop.permute.xlu1 %624 }
 0x1b8   : > { %v378_v46 = vmul.f32 %v3471_v37, %v377_v43  ;;  %v627_v23 = vsel %vm292_vm3, %v625_v16, %v623_v18  ;;  %v626_v24 = vsel %vm292_vm3, %v623_v18, %v625_v16 }
 0x1b9   : > { %vm466_vm12 = vcmp.ge.f32.partialorder %v458_v44, 0.5 }
 0x1ba   : > { %v379_v48 = vadd.f32 %v3471_v37, %v378_v46  ;;  %v3091_v50 = vsel %vm466_vm12, 1.0, %v3751_v49 }
 0x1bb   : > { %v478_v52 = vsub.f32 1.0, %v3091_v50 }
 0x1bc   : > { %v383_v54 = vsel %vm382_vm14, %v3471_v37, %v379_v48 }
 0x1bd   : > { %v388_v55 = vsel %vm385_vm15, %v387_v51, %v383_v54  ;;  %v3953_v56 = vmul.f32 %v478_v52, %v458_v44 }
 0x1be   : > { %v403_v57 = vmul.f32 %v388_v55, %v369_v53 }
 0x1c0   : > { %v457_v58 = vmul.f32 0.5, %v403_v57 }
 0x1c2   : > { %vm465_vm7 = vcmp.ge.f32.partialorder %v457_v58, 0.5 }
 0x1c3   : > { %v3090_v59 = vsel %vm465_vm7, 1.0, %v3751_v49 }
 0x1c4   : > { %v3388_v60 = vpack.i.bf16 %v3091_v50, %v3090_v59  ;;  %v477_v61 = vsub.f32 1.0, %v3090_v59 }
 0x1c6   : > { %3389 = vrot.lane.b32.xlu2 %v3388_v60, %s3750_s27  ;;  %v3958_v62 = vmul.f32 %v477_v61, %v457_v58 }
 0x1ce   : > { %3394 = vrot.lane.b32.xlu2 %v3388_v60, %s3749_s1 }
 0x1d6   : > { %632 = vrot.lane.b32.xlu2 %v3943_v20, %s3750_s27 }
 0x220   : > { %v3390_v0 = vpop.permute.xlu2 %3389 }
 0x221   : > { %v3392_v1 = vunpack.i.h.bf16 %v3390_v0  ;;  %v3391_v2 = vunpack.i.l.bf16 %v3390_v0 }
 0x223   : > { %v502_v4 = vsel %vm301_vm0, %v3391_v2, %v3392_v1  ;;  %v503_v5 = vsel %vm301_vm0, %v3392_v1, %v3391_v2 }
 0x224   : > { %3094 = vmatpush.msk.msra.mxu2 %vm284_vm1, %v502_v4  ;;  %3098 = vmatpush.msk.msra.mxu3 %vm3907_vm2, %v503_v5 }
 0x226   : > { %3095 = vmatpush.msk.msra.mxu2 %vm465_vm7, %v5346_v6  ;;  %3099 = vmatpush.msk.msra.mxu3 %vm466_vm12, %v5346_v6 }
 0x228   : > { %v3395_v7 = vpop.permute.xlu2 %3394 }
 0x229   : > { %v3397_v9 = vunpack.i.h.bf16 %v3395_v7  ;;  %v3396_v10 = vunpack.i.l.bf16 %v3395_v7 }
 0x22b   : > { %v495_v12 = vsel %vm292_vm3, %v3397_v9, %v3396_v10  ;;  %v494_v15 = vsel %vm292_vm3, %v3396_v10, %v3397_v9 }
 0x22c   : > { %3096 = vmatpush.msk.msra.mxu2 %vm282_vm4, %v495_v12  ;;  %3100 = vmatpush.msk.msra.mxu3 %vm3921_vm5, %v494_v15 }
 0x22d   : > { %3097 = vmatmul.msk.f32.vlgmr.msra.gmra.mxu2 %vm5348_vm6, %v3975_v11  ;;  %3101 = vmatmul.msk.f32.vlgmr.msra.gmra.mxu3 %vm5348_vm6, %v3975_v11 }
 0x230   : > { %v633_v17 = vpop.permute.xlu2 %632 }
 0x231   : > { %v634_v21 = vsel %vm301_vm0, %v631_v63, %v633_v17  ;;  %v635_v22 = vsel %vm301_vm0, %v633_v17, %v631_v63  ;;  %v3131_v17 = vld [vmem:[%s3886_s18 + $0x28] sm:$0xff] }
 0x232   : > { %3106 = vmatpush.msk.msrb.mxu2 %vm284_vm1, %v634_v21  ;;  %3110 = vmatpush.msk.msrb.mxu3 %vm3907_vm2, %v635_v22 }
 0x234   : > { %660 = vmatpush.msrb.mxu2 %v3940_v19  ;;  %683 = vmatpush.msrb.mxu3 %v3943_v20 }
 0x236   : > { %3107 = vmatpush.msk.msrb.mxu2 %vm282_vm4, %v627_v23  ;;  %3111 = vmatpush.msk.msrb.mxu3 %vm3921_vm5, %v626_v24 }
 0x237   : > { %3108 = vmatmul.msk.f32.vlgmr.msrb.gmra.mxu2 %vm5348_vm6, %v3925_v14  ;;  %3112 = vmatmul.msk.f32.vlgmr.msrb.gmra.mxu3 %vm5348_vm6, %v3925_v14 }
 0x2b0   : > { %v4011_v25 = vpop.f32.mrf.mxu2  ;;  %v4013_v26 = vpop.f32.mrf.mxu3 }
 0x2ba   : > { %v663_v19 = vpop.f32.mrf.mxu2  ;;  %v686_v27 = vpop.f32.mrf.mxu3 }
 0x2bb   : > { %736 = vmin.xlane.f32.xlu1 %v686_v27  ;;  %696 = vmax.xlane.f32.xlu0 %v663_v19 }
 0x2bc   : > { %692 = vmin.xlane.f32.xlu2 %v663_v19 }
 0x2c4   : > { %740 = vmax.xlane.f32.xlu2 %v686_v27 }
 0x2d4   : > { %962 = vrot.lane.b32.xlu1 %v4016_v34, %s3750_s27 }
 0x32e   : > { %v697_v20 = vpop.xlane.xlu0 %696  ;;  %v737_v31 = vpop.xlane.xlu1 %736 }
 0x32f   : > { %v693_v28 = vpop.xlane.xlu2 %692  ;;  %v744_v60 = vsub.f32 %v686_v27, %v737_v31 }
 0x330   : > { %v702_v29 = vsub.f32 %v697_v20, %v693_v28  ;;  %v700_v45 = vsub.f32 %v663_v19, %v693_v28 }
 0x332   : > { %v704_v30 = vadd.f32 1e-12, %v702_v29 }
 0x334   : > { %3472 = vrcp.f32 %v704_v30  ;;  %v717_v39 = vand.u32 2147483648, %v704_v30  ;;  %v715_v41 = vand.u32 2147483647, %v704_v30  ;;  %vm711_vm9 = vweird.f32 %v704_v30 }
 0x336   : > { %v718_v44 = vor.u32 1.1754944e-38, %v717_v39  ;;  %vm716_vm11 = vcmp.eq.f32.partialorder %v715_v41, 8.507059e+37 }
 0x337   : > { %v741_v32 = vpop.xlane.xlu2 %740 }
 0x338   : > { %v746_v33 = vsub.f32 %v741_v32, %v737_v31 }
 0x33a   : > { %v3473_v35 = vpop.eup %3472  ;;  %v748_v36 = vadd.f32 1e-12, %v746_v33 }
 0x33b   : > { %v707_v37 = vmul.f32 %v3473_v35, %v704_v30  ;;  %vm712_vm8 = vweird.f32 %v3473_v35 }
 0x33c   : > { %3474 = vrcp.f32 %v748_v36  ;;  %vm713_vm10 = vmor %vm711_vm9, %vm712_vm8  ;;  %v761_v52 = vand.u32 2147483648, %v748_v36  ;;  %v759_v55 = vand.u32 2147483647, %v748_v36  ;;  %vm755_vm13 = vweird.f32 %v748_v36 }
 0x33d   : > { %v708_v38 = vsub.f32 1.0, %v707_v37 }
 0x33e   : > { %v762_v59 = vor.u32 1.1754944e-38, %v761_v52  ;;  %vm760_vm15 = vcmp.eq.f32.partialorder %v759_v55, 8.507059e+37  ;;  %v4107_v52 = vld [vmem:[%s3886_s18 + $0x30] sm:$0xff] }
 0x33f   : > { %v709_v40 = vmul.f32 %v3473_v35, %v708_v38 }
 0x341   : > { %v710_v42 = vadd.f32 %v3473_v35, %v709_v40 }
 0x342   : > { %v3475_v43 = vpop.eup %3474 }
 0x343   : > { %v714_v46 = vsel %vm713_vm10, %v3473_v35, %v710_v42  ;;  %v751_v47 = vmul.f32 %v3475_v43, %v748_v36  ;;  %vm756_vm12 = vweird.f32 %v3475_v43 }
 0x344   : > { %v719_v48 = vsel %vm716_vm11, %v718_v44, %v714_v46  ;;  %vm757_vm14 = vmor %vm755_vm13, %vm756_vm12 }
 0x345   : > { %v734_v50 = vmul.f32 %v719_v48, %v700_v45  ;;  %v752_v51 = vsub.f32 1.0, %v751_v47 }
 0x346   : > { %v963_v20 = vpop.permute.xlu1 %962 }
 0x347   : > { %v784_v53 = vsub.f32 %v734_v50, %v3958_v62  ;;  %v753_v54 = vmul.f32 %v3475_v43, %v752_v51 }
 0x349   : > { %v788_v57 = vmul.f32 0.5, %v784_v53  ;;  %v754_v58 = vadd.f32 %v3475_v43, %v753_v54 }
 0x34b   : > { %v792_v61 = vadd.f32 %v788_v57, %v3958_v62  ;;  %v758_v63 = vsel %vm757_vm14, %v3475_v43, %v754_v58 }
 0x34c   : > { %v763_v0 = vsel %vm760_vm15, %v762_v59, %v758_v63 }
 0x34d   : > { %v778_v1 = vmul.f32 %v763_v0, %v744_v60  ;;  %vm796_vm7 = vcmp.ge.f32.partialorder %v792_v61, 0.5 }
 0x34e   : > { %v3114_v2 = vsel %vm796_vm7, 1.0, %v3751_v49 }
 0x34f   : > { %v785_v4 = vsub.f32 %v778_v1, %v3953_v56  ;;  %v808_v5 = vsub.f32 1.0, %v3114_v2 }
 0x351   : > { %v789_v7 = vmul.f32 0.5, %v785_v4  ;;  %v4025_v9 = vmul.f32 %v808_v5, %v792_v61 }
 0x353   : > { %v793_v10 = vadd.f32 %v789_v7, %v3953_v56  ;;  %v4039_v56 = vld [vmem:[#allocation7 + $0x8] sm:$0xff] }
 0x354   : > { %3085 = vmatmul.msk.f32.gmra.mxu0 %vm5348_vm6, %v4039_v56  ;;  %3089 = vmatmul.msk.f32.gmra.mxu1 %vm5348_vm6, %v4039_v56 }
 0x355   : > { %vm797_vm8 = vcmp.ge.f32.partialorder %v793_v10, 0.5  ;;  %3109 = vmatmul.msk.f32.gmra.mxu2 %vm5348_vm6, %v4039_v56  ;;  %3113 = vmatmul.msk.f32.gmra.mxu3 %vm5348_vm6, %v4039_v56 }
 0x356   : > { %v3115_v62 = vsel %vm797_vm8, 1.0, %v3751_v49 }
 0x357   : > { %v3403_v12 = vpack.i.bf16 %v3115_v62, %v3114_v2  ;;  %v809_v15 = vsub.f32 1.0, %v3115_v62 }
 0x359   : > { %3404 = vrot.lane.b32.xlu0 %v3403_v12, %s3749_s1  ;;  %v4031_v16 = vmul.f32 %v809_v15, %v793_v10  ;;  %3399 = vrot.lane.b32.xlu2 %v3403_v12, %s3750_s27 }
 0x361   : > { %954 = vrot.lane.b32.xlu0 %v4016_v34, %s3749_s1  ;;  %964 = vrot.lane.b32.xlu2 %v3131_v17, %s3750_s27 }
 0x369   : > { %956 = vrot.lane.b32.xlu2 %v3131_v17, %s3749_s1 }
 0x3b3   : > { %v3400_v18 = vpop.permute.xlu2 %3399 }
 0x3b4   : > { %v3402_v21 = vunpack.i.h.bf16 %v3400_v18  ;;  %v3401_v22 = vunpack.i.l.bf16 %v3400_v18 }
 0x3b6   : > { %v833_v23 = vsel %vm301_vm0, %v3401_v22, %v3402_v21  ;;  %v834_v24 = vsel %vm301_vm0, %v3402_v21, %v3401_v22 }
 0x3b7   : > { %3118 = vmatpush.msk.msrb.mxu0 %vm284_vm1, %v833_v23  ;;  %3122 = vmatpush.msk.msrb.mxu1 %vm3907_vm2, %v834_v24 }
 0x3b9   : > { %3119 = vmatpush.msk.msrb.mxu0 %vm796_vm7, %v5346_v6  ;;  %3123 = vmatpush.msk.msrb.mxu1 %vm797_vm8, %v5346_v6 }
 0x3bb   : > { %v965_v19 = vpop.permute.xlu2 %964 }
 0x3bc   : > { %v966_v30 = vsel %vm301_vm0, %v963_v20, %v965_v19  ;;  %v967_v31 = vsel %vm301_vm0, %v965_v19, %v963_v20 }
 0x3c3   : > { %v957_v35 = vpop.permute.xlu2 %956 }
 0x3cb   : > { %v3405_v27 = vpop.permute.xlu0 %3404 }
 0x3cc   : > { %v3407_v28 = vunpack.i.h.bf16 %v3405_v27  ;;  %v3406_v29 = vunpack.i.l.bf16 %v3405_v27 }
 0x3ce   : > { %v826_v32 = vsel %vm292_vm3, %v3407_v28, %v3406_v29  ;;  %v825_v33 = vsel %vm292_vm3, %v3406_v29, %v3407_v28 }
 0x3cf   : > { %3120 = vmatpush.msk.msrb.mxu0 %vm282_vm4, %v826_v32  ;;  %3124 = vmatpush.msk.msrb.mxu1 %vm3921_vm5, %v825_v33 }
 0x3d0   : > { %3121 = vmatmul.msk.f32.vlgmr.msrb.gmra.mxu0 %vm5348_vm6, %v3975_v11  ;;  %3125 = vmatmul.msk.f32.vlgmr.msrb.gmra.mxu1 %vm5348_vm6, %v3975_v11 }
 0x3d1   : > { %3132 = vmatpush.msk.msra.mxu0 %vm284_vm1, %v966_v30  ;;  %3136 = vmatpush.msk.msra.mxu1 %vm3907_vm2, %v967_v31  ;;  %v4100_v39 = vpop.f32.mrf.mxu1 }
 0x3d3   : > { %v955_v36 = vpop.permute.xlu0 %954  ;;  %992 = vmatpush.msra.mxu0 %v4016_v34  ;;  %1015 = vmatpush.msra.mxu1 %v3131_v17  ;;  %v4098_v34 = vpop.f32.mrf.mxu0 }
 0x3d4   : > { %v958_v37 = vsel %vm292_vm3, %v955_v36, %v957_v35  ;;  %v959_v38 = vsel %vm292_vm3, %v957_v35, %v955_v36 }
 0x3d5   : > { %3133 = vmatpush.msk.msra.mxu0 %vm282_vm4, %v959_v38  ;;  %3137 = vmatpush.msk.msra.mxu1 %vm3921_vm5, %v958_v37  ;;  %v3157_v38 = vld [vmem:[%s3886_s18 + $0x38] sm:$0xff] }
 0x3d8   : > { %3134 = vmatmul.msk.f32.vlgmr.msra.gmra.mxu0 %vm5348_vm6, %v3925_v14  ;;  %3138 = vmatmul.msk.f32.vlgmr.msra.gmra.mxu1 %vm5348_vm6, %v3925_v14 }
 0x3e0   : > { %3135 = vmatmul.msk.f32.gmra.mxu0 %vm5348_vm6, %v4039_v56  ;;  %3139 = vmatmul.msk.f32.gmra.mxu1 %vm5348_vm6, %v4039_v56 }
 0x44d   : > { %v4102_v40 = vpop.f32.mrf.mxu0  ;;  %v4104_v41 = vpop.f32.mrf.mxu1 }
 0x455   : > { %v995_v42 = vpop.f32.mrf.mxu0  ;;  %v1018_v43 = vpop.f32.mrf.mxu1 }
 0x456   : > { %1068 = vmin.xlane.f32.xlu2 %v1018_v43  ;;  %1028 = vmax.xlane.f32.xlu1 %v995_v42 }
 0x457   : > { %1024 = vmin.xlane.f32.xlu0 %v995_v42 }
 0x45f   : > { %1072 = vmax.xlane.f32.xlu0 %v1018_v43 }
 0x473   : > { %1294 = vrot.lane.b32.xlu0 %v4107_v52, %s3750_s27 }
 0x47b   : > { %1286 = vrot.lane.b32.xlu0 %v4107_v52, %s3749_s1 }
 0x4c9   : > { %v1029_v44 = vpop.xlane.xlu1 %1028  ;;  %v1069_v48 = vpop.xlane.xlu2 %1068 }
 0x4ca   : > { %v1025_v45 = vpop.xlane.xlu0 %1024  ;;  %v1076_v23 = vsub.f32 %v1018_v43, %v1069_v48 }
 0x4cb   : > { %v1034_v46 = vsub.f32 %v1029_v44, %v1025_v45  ;;  %v1032_v1 = vsub.f32 %v995_v42, %v1025_v45 }
 0x4cd   : > { %v1036_v47 = vadd.f32 1e-12, %v1034_v46 }
 0x4cf   : > { %3476 = vrcp.f32 %v1036_v47  ;;  %v1049_v58 = vand.u32 2147483648, %v1036_v47  ;;  %v1047_v60 = vand.u32 2147483647, %v1036_v47  ;;  %vm1043_vm10 = vweird.f32 %v1036_v47 }
 0x4d1   : > { %v1050_v0 = vor.u32 1.1754944e-38, %v1049_v58  ;;  %vm1048_vm12 = vcmp.eq.f32.partialorder %v1047_v60, 8.507059e+37 }
 0x4d2   : > { %v1073_v50 = vpop.xlane.xlu0 %1072 }
 0x4d3   : > { %v1078_v51 = vsub.f32 %v1073_v50, %v1069_v48 }
 0x4d5   : > { %v3477_v53 = vpop.eup %3476  ;;  %v1080_v54 = vadd.f32 1e-12, %v1078_v51 }
 0x4d6   : > { %v1039_v55 = vmul.f32 %v3477_v53, %v1036_v47  ;;  %vm1044_vm9 = vweird.f32 %v3477_v53 }
 0x4d7   : > { %3478 = vrcp.f32 %v1080_v54  ;;  %vm1045_vm11 = vmor %vm1043_vm10, %vm1044_vm9  ;;  %v1093_v62 = vand.u32 2147483648, %v1080_v54  ;;  %v1091_v17 = vand.u32 2147483647, %v1080_v54  ;;  %vm1087_vm14 = vweird.f32 %v1080_v54 }
 0x4d8   : > { %v1040_v57 = vsub.f32 1.0, %v1039_v55 }
 0x4d9   : > { %v1094_v22 = vor.u32 1.1754944e-38, %v1093_v62  ;;  %vm1092_vm7 = vcmp.eq.f32.partialorder %v1091_v17, 8.507059e+37 }
 0x4da   : > { %v1041_v59 = vmul.f32 %v3477_v53, %v1040_v57 }
 0x4dc   : > { %v1042_v61 = vadd.f32 %v3477_v53, %v1041_v59 }
 0x4dd   : > { %v3479_v63 = vpop.eup %3478 }
 0x4de   : > { %v1046_v2 = vsel %vm1045_vm11, %v3477_v53, %v1042_v61  ;;  %v1083_v4 = vmul.f32 %v3479_v63, %v1080_v54  ;;  %vm1088_vm13 = vweird.f32 %v3479_v63 }
 0x4df   : > { %v1051_v5 = vsel %vm1048_vm12, %v1050_v0, %v1046_v2  ;;  %vm1089_vm15 = vmor %vm1087_vm14, %vm1088_vm13 }
 0x4e0   : > { %v1066_v7 = vmul.f32 %v1051_v5, %v1032_v1  ;;  %v1084_v10 = vsub.f32 1.0, %v1083_v4  ;;  %v4188_v5 = vld [vmem:[%s3886_s18 + $0x48] sm:$0xff] }
 0x4e2   : > { %v1116_v12 = vsub.f32 %v1066_v7, %v4025_v9  ;;  %v1085_v15 = vmul.f32 %v3479_v63, %v1084_v10  ;;  %v4191_v7 = vld [vmem:[%s3886_s18 + $0x40] sm:$0xff] }
 0x4e4   : > { %v1120_v18 = vmul.f32 0.5, %v1116_v12  ;;  %v1086_v21 = vadd.f32 %v3479_v63, %v1085_v15 }
 0x4e5   : > { %v1295_v42 = vpop.permute.xlu0 %1294 }
 0x4e6   : > { %v1124_v24 = vadd.f32 %v1120_v18, %v4025_v9  ;;  %v1090_v19 = vsel %vm1089_vm15, %v3479_v63, %v1086_v21  ;;  %v4181_v63 = vpop.f32.mrf.mxu3 }
 0x4e7   : > { %v1095_v27 = vsel %vm1092_vm7, %v1094_v22, %v1090_v19 }
 0x4e8   : > { %v1110_v20 = vmul.f32 %v1095_v27, %v1076_v23  ;;  %vm1128_vm8 = vcmp.ge.f32.partialorder %v1124_v24, 0.5 }
 0x4e9   : > { %v3140_v28 = vsel %vm1128_vm8, 1.0, %v3751_v49 }
 0x4ea   : > { %v1117_v29 = vsub.f32 %v1110_v20, %v4031_v16  ;;  %v1140_v30 = vsub.f32 1.0, %v3140_v28 }
 0x4ec   : > { %v1121_v31 = vmul.f32 0.5, %v1117_v29  ;;  %v4118_v32 = vmul.f32 %v1140_v30, %v1124_v24 }
 0x4ed   : > { %v1287_v54 = vpop.permute.xlu0 %1286 }
 0x4ee   : > { %v1125_v33 = vadd.f32 %v1121_v31, %v4031_v16 }
 0x4f0   : > { %vm1129_vm9 = vcmp.ge.f32.partialorder %v1125_v33, 0.5 }
 0x4f1   : > { %v3141_v9 = vsel %vm1129_vm9, 1.0, %v3751_v49 }
 0x4f2   : > { %v3413_v35 = vpack.i.bf16 %v3141_v9, %v3140_v28  ;;  %v1141_v36 = vsub.f32 1.0, %v3141_v9 }
 0x4f4   : > { %3414 = vrot.lane.b32.xlu2 %v3413_v35, %s3749_s1  ;;  %v4124_v37 = vmul.f32 %v1141_v36, %v1125_v33  ;;  %3409 = vrot.lane.b32.xlu1 %v3413_v35, %s3750_s27 }
 0x4fc   : > { %1296 = vrot.lane.b32.xlu1 %v3157_v38, %s3750_s27  ;;  %1288 = vrot.lane.b32.xlu2 %v3157_v38, %s3749_s1 }
 0x54e   : > { %v3415_v43 = vpop.permute.xlu2 %3414 }
 0x54f   : > { %v3417_v46 = vunpack.i.h.bf16 %v3415_v43  ;;  %v3416_v47 = vunpack.i.l.bf16 %v3415_v43 }
 0x551   : > { %v1158_v51 = vsel %vm292_vm3, %v3417_v46, %v3416_v47  ;;  %v1157_v53 = vsel %vm292_vm3, %v3416_v47, %v3417_v46 }
 0x556   : > { %v1289_v57 = vpop.permute.xlu2 %1288 }
 0x557   : > { %v1290_v60 = vsel %vm292_vm3, %v1287_v54, %v1289_v57  ;;  %v1291_v61 = vsel %vm292_vm3, %v1289_v57, %v1287_v54 }
 0x566   : > { %v3410_v16 = vpop.permute.xlu1 %3409 }
 0x567   : > { %v3412_v44 = vunpack.i.h.bf16 %v3410_v16  ;;  %v3411_v45 = vunpack.i.l.bf16 %v3410_v16 }
 0x569   : > { %v1165_v48 = vsel %vm301_vm0, %v3411_v45, %v3412_v44  ;;  %v1166_v50 = vsel %vm301_vm0, %v3412_v44, %v3411_v45 }
 0x56a   : > { %3144 = vmatpush.msk.msra.mxu2 %vm284_vm1, %v1165_v48  ;;  %3148 = vmatpush.msk.msra.mxu3 %vm3907_vm2, %v1166_v50 }
 0x56c   : > { %3145 = vmatpush.msk.msra.mxu2 %vm1128_vm8, %v5346_v6  ;;  %3149 = vmatpush.msk.msra.mxu3 %vm1129_vm9, %v5346_v6 }
 0x56e   : > { %v1297_v55 = vpop.permute.xlu1 %1296  ;;  %3146 = vmatpush.msk.msra.mxu2 %vm282_vm4, %v1158_v51  ;;  %3150 = vmatpush.msk.msra.mxu3 %vm3921_vm5, %v1157_v53 }
 0x56f   : > { %v1298_v58 = vsel %vm301_vm0, %v1295_v42, %v1297_v55  ;;  %v1299_v59 = vsel %vm301_vm0, %v1297_v55, %v1295_v42  ;;  %3147 = vmatmul.msk.f32.vlgmr.msra.gmra.mxu2 %vm5348_vm6, %v3975_v11  ;;  %3151 = vmatmul.msk.f32.vlgmr.msra.gmra.mxu3 %vm5348_vm6, %v3975_v11 }
 0x570   : > { %3158 = vmatpush.msk.msrb.mxu2 %vm284_vm1, %v1298_v58  ;;  %3162 = vmatpush.msk.msrb.mxu3 %vm3907_vm2, %v1299_v59 }
 0x572   : > { %1324 = vmatpush.msrb.mxu2 %v4107_v52  ;;  %1347 = vmatpush.msrb.mxu3 %v3157_v38  ;;  %v4179_v52 = vpop.f32.mrf.mxu2 }
 0x574   : > { %3159 = vmatpush.msk.msrb.mxu2 %vm282_vm4, %v1291_v61  ;;  %3163 = vmatpush.msk.msrb.mxu3 %vm3921_vm5, %v1290_v60 }
 0x577   : > { %3160 = vmatmul.msk.f32.vlgmr.msrb.gmra.mxu2 %vm5348_vm6, %v3925_v14  ;;  %3164 = vmatmul.msk.f32.vlgmr.msrb.gmra.mxu3 %vm5348_vm6, %v3925_v14 }
 0x57f   : > { %3161 = vmatmul.msk.f32.gmra.mxu2 %vm5348_vm6, %v4039_v56  ;;  %3165 = vmatmul.msk.f32.gmra.mxu3 %vm5348_vm6, %v4039_v56 }
 0x5f2   : > { %v4183_v0 = vpop.f32.mrf.mxu2  ;;  %v4185_v1 = vpop.f32.mrf.mxu3 }
 0x5fa   : > { %v1327_v2 = vpop.f32.mrf.mxu2  ;;  %v1350_v4 = vpop.f32.mrf.mxu3 }
 0x5fb   : > { %1360 = vmax.xlane.f32.xlu0 %v1327_v2  ;;  %1356 = vmin.xlane.f32.xlu1 %v1327_v2 }
 0x5fc   : > { %1400 = vmin.xlane.f32.xlu2 %v1350_v4 }
 0x603   : > { %1404 = vmax.xlane.f32.xlu1 %v1350_v4 }
 0x60f   : > { %1628 = vrot.lane.b32.xlu0 %v4188_v5, %s3750_s27 }
 0x61c   : > { %1626 = vrot.lane.b32.xlu1 %v4191_v7, %s3750_s27 }
 0x66e   : > { %v1361_v10 = vpop.xlane.xlu0 %1360  ;;  %v1357_v62 = vpop.xlane.xlu1 %1356 }
 0x66f   : > { %v1366_v12 = vsub.f32 %v1361_v10, %v1357_v62  ;;  %v1401_v17 = vpop.xlane.xlu2 %1400  ;;  %v1364_v33 = vsub.f32 %v1327_v2, %v1357_v62 }
 0x670   : > { %v1408_v51 = vsub.f32 %v1350_v4, %v1401_v17 }
 0x671   : > { %v1368_v15 = vadd.f32 1e-12, %v1366_v12 }
 0x673   : > { %3480 = vrcp.f32 %v1368_v15  ;;  %v1381_v27 = vand.u32 2147483648, %v1368_v15  ;;  %v1379_v28 = vand.u32 2147483647, %v1368_v15  ;;  %vm1375_vm11 = vweird.f32 %v1368_v15 }
 0x675   : > { %v1382_v31 = vor.u32 1.1754944e-38, %v1381_v27  ;;  %vm1380_vm13 = vcmp.eq.f32.partialorder %v1379_v28, 8.507059e+37 }
 0x676   : > { %v1405_v18 = vpop.xlane.xlu1 %1404 }
 0x677   : > { %v1410_v21 = vsub.f32 %v1405_v18, %v1401_v17 }
 0x679   : > { %v3481_v22 = vpop.eup %3480  ;;  %v1412_v23 = vadd.f32 1e-12, %v1410_v21 }
 0x67a   : > { %v1371_v24 = vmul.f32 %v3481_v22, %v1368_v15  ;;  %vm1376_vm10 = vweird.f32 %v3481_v22 }
 0x67b   : > { %3482 = vrcp.f32 %v1412_v23  ;;  %vm1377_vm12 = vmor %vm1375_vm11, %vm1376_vm10  ;;  %v1425_v43 = vand.u32 2147483648, %v1412_v23  ;;  %v1423_v45 = vand.u32 2147483647, %v1412_v23  ;;  %vm1419_vm15 = vweird.f32 %v1412_v23 }
 0x67c   : > { %v1372_v19 = vsub.f32 1.0, %v1371_v24 }
 0x67d   : > { %v1426_v48 = vor.u32 1.1754944e-38, %v1425_v43  ;;  %vm1424_vm8 = vcmp.eq.f32.partialorder %v1423_v45, 8.507059e+37 }
 0x67e   : > { %v1373_v20 = vmul.f32 %v3481_v22, %v1372_v19 }
 0x680   : > { %v1374_v29 = vadd.f32 %v3481_v22, %v1373_v20 }
 0x681   : > { %v3483_v30 = vpop.eup %3482  ;;  %v1629_v21 = vpop.permute.xlu0 %1628 }
 0x682   : > { %v1378_v9 = vsel %vm1377_vm12, %v3481_v22, %v1374_v29  ;;  %v1415_v35 = vmul.f32 %v3483_v30, %v1412_v23  ;;  %vm1420_vm14 = vweird.f32 %v3483_v30 }
 0x683   : > { %v1383_v36 = vsel %vm1380_vm13, %v1382_v31, %v1378_v9  ;;  %vm1421_vm7 = vmor %vm1419_vm15, %vm1420_vm14 }
 0x684   : > { %v1398_v38 = vmul.f32 %v1383_v36, %v1364_v33  ;;  %v1416_v42 = vsub.f32 1.0, %v1415_v35 }
 0x686   : > { %v1448_v16 = vsub.f32 %v1398_v38, %v4118_v32  ;;  %v1417_v44 = vmul.f32 %v3483_v30, %v1416_v42 }
 0x688   : > { %v1452_v46 = vmul.f32 0.5, %v1448_v16  ;;  %v1418_v47 = vadd.f32 %v3483_v30, %v1417_v44 }
 0x68a   : > { %v1456_v50 = vadd.f32 %v1452_v46, %v4118_v32  ;;  %v1422_v53 = vsel %vm1421_vm7, %v3483_v30, %v1418_v47 }
 0x68b   : > { %v1427_v54 = vsel %vm1424_vm8, %v1426_v48, %v1422_v53 }
 0x68c   : > { %v1442_v55 = vmul.f32 %v1427_v54, %v1408_v51  ;;  %vm1460_vm9 = vcmp.ge.f32.partialorder %v1456_v50, 0.5 }
 0x68d   : > { %v3166_v57 = vsel %vm1460_vm9, 1.0, %v3751_v49 }
 0x68e   : > { %v1449_v58 = vsub.f32 %v1442_v55, %v4124_v37  ;;  %v1472_v59 = vsub.f32 1.0, %v3166_v57  ;;  %v1627_v19 = vpop.permute.xlu1 %1626 }
 0x68f   : > { %v1630_v28 = vsel %vm301_vm0, %v1627_v19, %v1629_v21  ;;  %v1631_v29 = vsel %vm301_vm0, %v1629_v21, %v1627_v19 }
 0x690   : > { %v1453_v60 = vmul.f32 0.5, %v1449_v58  ;;  %v4202_v61 = vmul.f32 %v1472_v59, %v1456_v50  ;;  %v4274_v58 = vld [vmem:[%s3886_s18 + $0x50] sm:$0xff] }
 0x692   : > { %v1457_v2 = vadd.f32 %v1453_v60, %v4124_v37 }
 0x694   : > { %vm1461_vm10 = vcmp.ge.f32.partialorder %v1457_v2, 0.5 }
 0x695   : > { %v3167_v32 = vsel %vm1461_vm10, 1.0, %v3751_v49 }
 0x696   : > { %v3423_v4 = vpack.i.bf16 %v3167_v32, %v3166_v57  ;;  %v1473_v10 = vsub.f32 1.0, %v3167_v32 }
 0x698   : > { %3424 = vrot.lane.b32.xlu0 %v3423_v4, %s3749_s1  ;;  %v4208_v62 = vmul.f32 %v1473_v10, %v1457_v2  ;;  %3419 = vrot.lane.b32.xlu2 %v3423_v4, %s3750_s27 }
 0x6a0   : > { %1620 = vrot.lane.b32.xlu0 %v4188_v5, %s3749_s1  ;;  %1618 = vrot.lane.b32.xlu2 %v4191_v7, %s3749_s1 }
 0x6f2   : > { %v3420_v12 = vpop.permute.xlu2 %3419 }
 0x6f3   : > { %v3422_v37 = vunpack.i.h.bf16 %v3420_v12  ;;  %v3421_v15 = vunpack.i.l.bf16 %v3420_v12 }
 0x6f5   : > { %v1497_v17 = vsel %vm301_vm0, %v3421_v15, %v3422_v37  ;;  %v1498_v18 = vsel %vm301_vm0, %v3422_v37, %v3421_v15 }
 0x6f6   : > { %3170 = vmatpush.msk.msrb.mxu0 %vm284_vm1, %v1497_v17  ;;  %3174 = vmatpush.msk.msrb.mxu1 %vm3907_vm2, %v1498_v18 }
 0x6f8   : > { %3171 = vmatpush.msk.msrb.mxu0 %vm1460_vm9, %v5346_v6  ;;  %3175 = vmatpush.msk.msrb.mxu1 %vm1461_vm10, %v5346_v6 }
 0x6fa   : > { %v1619_v30 = vpop.permute.xlu2 %1618 }
 0x70a   : > { %v3425_v22 = vpop.permute.xlu0 %3424 }
 0x70b   : > { %v3427_v23 = vunpack.i.h.bf16 %v3425_v22  ;;  %v3426_v24 = vunpack.i.l.bf16 %v3425_v22 }
 0x70d   : > { %v1490_v27 = vsel %vm292_vm3, %v3427_v23, %v3426_v24  ;;  %v1489_v20 = vsel %vm292_vm3, %v3426_v24, %v3427_v23  ;;  %v3209_v24 = vld [vmem:[%s3886_s18 + $0x58] sm:$0xff] }
 0x70e   : > { %3172 = vmatpush.msk.msrb.mxu0 %vm282_vm4, %v1490_v27  ;;  %3176 = vmatpush.msk.msrb.mxu1 %vm3921_vm5, %v1489_v20 }
 0x70f   : > { %3173 = vmatmul.msk.f32.vlgmr.msrb.gmra.mxu0 %vm5348_vm6, %v3975_v11  ;;  %3177 = vmatmul.msk.f32.vlgmr.msrb.gmra.mxu1 %vm5348_vm6, %v3975_v11 }
 0x710   : > { %3184 = vmatpush.msk.msra.mxu0 %vm284_vm1, %v1630_v28  ;;  %3188 = vmatpush.msk.msra.mxu1 %vm3907_vm2, %v1631_v29 }
 0x712   : > { %v1621_v31 = vpop.permute.xlu0 %1620  ;;  %1656 = vmatpush.msra.mxu0 %v4191_v7  ;;  %1679 = vmatpush.msra.mxu1 %v4188_v5  ;;  %v4265_v5 = vpop.f32.mrf.mxu0 }
 0x713   : > { %v1622_v33 = vsel %vm292_vm3, %v1619_v30, %v1621_v31  ;;  %v1623_v9 = vsel %vm292_vm3, %v1621_v31, %v1619_v30  ;;  %v4267_v7 = vpop.f32.mrf.mxu1 }
 0x714   : > { %3185 = vmatpush.msk.msra.mxu0 %vm282_vm4, %v1623_v9  ;;  %3189 = vmatpush.msk.msra.mxu1 %vm3921_vm5, %v1622_v33 }
 0x717   : > { %3186 = vmatmul.msk.f32.vlgmr.msra.gmra.mxu0 %vm5348_vm6, %v3925_v14  ;;  %3190 = vmatmul.msk.f32.vlgmr.msra.gmra.mxu1 %vm5348_vm6, %v3925_v14 }
 0x71f   : > { %3187 = vmatmul.msk.f32.gmra.mxu0 %vm5348_vm6, %v4039_v56  ;;  %3191 = vmatmul.msk.f32.gmra.mxu1 %vm5348_vm6, %v4039_v56 }
 0x78c   : > { %v4269_v35 = vpop.f32.mrf.mxu0  ;;  %v4271_v36 = vpop.f32.mrf.mxu1 }
 0x794   : > { %v1659_v38 = vpop.f32.mrf.mxu0  ;;  %v1682_v42 = vpop.f32.mrf.mxu1 }
 0x795   : > { %1732 = vmin.xlane.f32.xlu0 %v1682_v42  ;;  %1692 = vmax.xlane.f32.xlu1 %v1659_v38 }
 0x796   : > { %1688 = vmin.xlane.f32.xlu2 %v1659_v38 }
 0x79e   : > { %1736 = vmax.xlane.f32.xlu2 %v1682_v42 }
 0x7b6   : > { %1958 = vrot.lane.b32.xlu2 %v4274_v58, %s3750_s27 }
 0x7be   : > { %1952 = vrot.lane.b32.xlu2 %v3209_v24, %s3749_s1 }
 0x808   : > { %v1693_v14 = vpop.xlane.xlu1 %1692  ;;  %v1733_v56 = vpop.xlane.xlu0 %1732 }
 0x809   : > { %v1689_v43 = vpop.xlane.xlu2 %1688  ;;  %v1740_v27 = vsub.f32 %v1682_v42, %v1733_v56 }
 0x80a   : > { %v1698_v16 = vsub.f32 %v1693_v14, %v1689_v43  ;;  %v1696_v2 = vsub.f32 %v1659_v38, %v1689_v43 }
 0x80c   : > { %v1700_v44 = vadd.f32 1e-12, %v1698_v16 }
 0x80e   : > { %3484 = vrcp.f32 %v1700_v44  ;;  %v1713_v53 = vand.u32 2147483648, %v1700_v44  ;;  %v1711_v55 = vand.u32 2147483647, %v1700_v44  ;;  %vm1707_vm12 = vweird.f32 %v1700_v44 }
 0x810   : > { %v1714_v60 = vor.u32 1.1754944e-38, %v1713_v53  ;;  %vm1712_vm14 = vcmp.eq.f32.partialorder %v1711_v55, 8.507059e+37 }
 0x811   : > { %v1737_v45 = vpop.xlane.xlu2 %1736 }
 0x812   : > { %v1742_v46 = vsub.f32 %v1737_v45, %v1733_v56 }
 0x814   : > { %v3485_v47 = vpop.eup %3484  ;;  %v1744_v48 = vadd.f32 1e-12, %v1742_v46 }
 0x815   : > { %v1703_v50 = vmul.f32 %v3485_v47, %v1700_v44  ;;  %vm1708_vm11 = vweird.f32 %v3485_v47 }
 0x816   : > { %3486 = vrcp.f32 %v1744_v48  ;;  %vm1709_vm13 = vmor %vm1707_vm12, %vm1708_vm11  ;;  %v1757_v15 = vand.u32 2147483648, %v1744_v48  ;;  %v1755_v21 = vand.u32 2147483647, %v1744_v48  ;;  %vm1751_vm7 = vweird.f32 %v1744_v48 }
 0x817   : > { %v1704_v51 = vsub.f32 1.0, %v1703_v50 }
 0x818   : > { %v1758_v19 = vor.u32 1.1754944e-38, %v1757_v15  ;;  %vm1756_vm9 = vcmp.eq.f32.partialorder %v1755_v21, 8.507059e+37 }
 0x819   : > { %v1705_v54 = vmul.f32 %v3485_v47, %v1704_v51  ;;  %v1959_v56 = vpop.permute.xlu2 %1958 }
 0x81b   : > { %v1706_v57 = vadd.f32 %v3485_v47, %v1705_v54 }
 0x81c   : > { %v3487_v59 = vpop.eup %3486 }
 0x81d   : > { %v1710_v32 = vsel %vm1709_vm13, %v3485_v47, %v1706_v57  ;;  %v1747_v4 = vmul.f32 %v3487_v59, %v1744_v48  ;;  %vm1752_vm15 = vweird.f32 %v3487_v59 }
 0x81e   : > { %v1715_v10 = vsel %vm1712_vm14, %v1714_v60, %v1710_v32  ;;  %vm1753_vm8 = vmor %vm1751_vm7, %vm1752_vm15 }
 0x81f   : > { %v1730_v12 = vmul.f32 %v1715_v10, %v1696_v2  ;;  %v1748_v37 = vsub.f32 1.0, %v1747_v4 }
 0x821   : > { %v1780_v17 = vsub.f32 %v1730_v12, %v4202_v61  ;;  %v1749_v18 = vmul.f32 %v3487_v59, %v1748_v37  ;;  %v1953_v57 = vpop.permute.xlu2 %1952  ;;  %v4344_v12 = vpop.f32.mrf.mxu2 }
 0x822   : > { %v4346_v37 = vpop.f32.mrf.mxu3 }
 0x823   : > { %v1784_v22 = vmul.f32 0.5, %v1780_v17  ;;  %v1750_v23 = vadd.f32 %v3487_v59, %v1749_v18 }
 0x825   : > { %v1788_v20 = vadd.f32 %v1784_v22, %v4202_v61  ;;  %v1754_v28 = vsel %vm1753_vm8, %v3487_v59, %v1750_v23 }
 0x826   : > { %v1759_v29 = vsel %vm1756_vm9, %v1758_v19, %v1754_v28  ;;  %v4353_v28 = vld [vmem:[%s3886_s18 + $0x60] sm:$0xff] }
 0x827   : > { %v1774_v30 = vmul.f32 %v1759_v29, %v1740_v27  ;;  %vm1792_vm10 = vcmp.ge.f32.partialorder %v1788_v20, 0.5 }
 0x828   : > { %v3192_v31 = vsel %vm1792_vm10, 1.0, %v3751_v49 }
 0x829   : > { %v1781_v33 = vsub.f32 %v1774_v30, %v4208_v62  ;;  %v1804_v9 = vsub.f32 1.0, %v3192_v31 }
 0x82b   : > { %v1785_v38 = vmul.f32 0.5, %v1781_v33  ;;  %v4285_v14 = vmul.f32 %v1804_v9, %v1788_v20 }
 0x82d   : > { %v1789_v43 = vadd.f32 %v1785_v38, %v4208_v62 }
 0x82f   : > { %vm1793_vm11 = vcmp.ge.f32.partialorder %v1789_v43, 0.5 }
 0x830   : > { %v3193_v61 = vsel %vm1793_vm11, 1.0, %v3751_v49 }
 0x831   : > { %v3433_v42 = vpack.i.bf16 %v3193_v61, %v3192_v31  ;;  %v1805_v16 = vsub.f32 1.0, %v3193_v61 }
 0x833   : > { %3434 = vrot.lane.b32.xlu0 %v3433_v42, %s3749_s1  ;;  %v4291_v44 = vmul.f32 %v1805_v16, %v1789_v43  ;;  %3429 = vrot.lane.b32.xlu1 %v3433_v42, %s3750_s27 }
 0x83b   : > { %1960 = vrot.lane.b32.xlu0 %v3209_v24, %s3750_s27  ;;  %1950 = vrot.lane.b32.xlu1 %v4274_v58, %s3749_s1 }
 0x8a5   : > { %v3435_v45 = vpop.permute.xlu0 %3434  ;;  %v3430_v62 = vpop.permute.xlu1 %3429 }
 0x8a6   : > { %v3432_v46 = vunpack.i.h.bf16 %v3430_v62  ;;  %v3431_v47 = vunpack.i.l.bf16 %v3430_v62  ;;  %v3437_v48 = vunpack.i.h.bf16 %v3435_v45  ;;  %v3436_v50 = vunpack.i.l.bf16 %v3435_v45 }
 0x8a8   : > { %v1829_v51 = vsel %vm301_vm0, %v3431_v47, %v3432_v46  ;;  %v1830_v53 = vsel %vm301_vm0, %v3432_v46, %v3431_v47  ;;  %v1822_v54 = vsel %vm292_vm3, %v3437_v48, %v3436_v50  ;;  %v1821_v55 = vsel %vm292_vm3, %v3436_v50, %v3437_v48 }
 0x8a9   : > { %3196 = vmatpush.msk.msra.mxu2 %vm284_vm1, %v1829_v51  ;;  %3200 = vmatpush.msk.msra.mxu3 %vm3907_vm2, %v1830_v53 }
 0x8ab   : > { %3197 = vmatpush.msk.msra.mxu2 %vm1792_vm10, %v5346_v6  ;;  %3201 = vmatpush.msk.msra.mxu3 %vm1793_vm11, %v5346_v6 }
 0x8ad   : > { %v1961_v59 = vpop.permute.xlu0 %1960  ;;  %3198 = vmatpush.msk.msra.mxu2 %vm282_vm4, %v1822_v54  ;;  %3202 = vmatpush.msk.msra.mxu3 %vm3921_vm5, %v1821_v55  ;;  %v1951_v60 = vpop.permute.xlu1 %1950 }
 0x8ae   : > { %v1962_v2 = vsel %vm301_vm0, %v1959_v56, %v1961_v59  ;;  %v1963_v32 = vsel %vm301_vm0, %v1961_v59, %v1959_v56  ;;  %3199 = vmatmul.msk.f32.vlgmr.msra.gmra.mxu2 %vm5348_vm6, %v3975_v11  ;;  %3203 = vmatmul.msk.f32.vlgmr.msra.gmra.mxu3 %vm5348_vm6, %v3975_v11  ;;  %v1954_v4 = vsel %vm292_vm3, %v1951_v60, %v1953_v57  ;;  %v4338_v11 = vld [vmem:[#allocation7] sm:$0xff] }
 0x8af   : > { %3210 = vmatpush.msk.msrb.mxu2 %vm284_vm1, %v1962_v2  ;;  %3214 = vmatpush.msk.msrb.mxu3 %vm3907_vm2, %v1963_v32  ;;  %v1955_v10 = vsel %vm292_vm3, %v1953_v57, %v1951_v60 }
 0x8b1   : > { %1988 = vmatpush.msrb.mxu2 %v4274_v58  ;;  %2011 = vmatpush.msrb.mxu3 %v3209_v24 }
 0x8b3   : > { %3211 = vmatpush.msk.msrb.mxu2 %vm282_vm4, %v1955_v10  ;;  %3215 = vmatpush.msk.msrb.mxu3 %vm3921_vm5, %v1954_v4 }
 0x8b6   : > { %3212 = vmatmul.msk.f32.vlgmr.msrb.gmra.mxu2 %vm5348_vm6, %v4338_v11  ;;  %3216 = vmatmul.msk.f32.vlgmr.msrb.gmra.mxu3 %vm5348_vm6, %v4338_v11 }
 0x931   : > { %v4348_v58 = vpop.f32.mrf.mxu2  ;;  %v4350_v15 = vpop.f32.mrf.mxu3 }
 0x939   : > { %v1991_v17 = vpop.f32.mrf.mxu2  ;;  %v2014_v18 = vpop.f32.mrf.mxu3 }
 0x93a   : > { %2024 = vmax.xlane.f32.xlu1 %v1991_v17  ;;  %2020 = vmin.xlane.f32.xlu0 %v1991_v17 }
 0x93b   : > { %2064 = vmin.xlane.f32.xlu2 %v2014_v18 }
 0x942   : > { %2068 = vmax.xlane.f32.xlu0 %v2014_v18 }
 0x956   : > { %2290 = vrot.lane.b32.xlu0 %v4353_v28, %s3750_s27 }
 0x95e   : > { %2282 = vrot.lane.b32.xlu0 %v4353_v28, %s3749_s1 }
 0x9ad   : > { %v2025_v21 = vpop.xlane.xlu1 %2024  ;;  %v2021_v22 = vpop.xlane.xlu0 %2020 }
 0x9ae   : > { %v2030_v23 = vsub.f32 %v2025_v21, %v2021_v22  ;;  %v2065_v19 = vpop.xlane.xlu2 %2064  ;;  %v2028_v56 = vsub.f32 %v1991_v17, %v2021_v22 }
 0x9af   : > { %v2072_v2 = vsub.f32 %v2014_v18, %v2065_v19 }
 0x9b0   : > { %v2032_v24 = vadd.f32 1e-12, %v2030_v23 }
 0x9b2   : > { %3488 = vrcp.f32 %v2032_v24  ;;  %v2045_v9 = vand.u32 2147483648, %v2032_v24  ;;  %v2043_v43 = vand.u32 2147483647, %v2032_v24  ;;  %vm2039_vm13 = vweird.f32 %v2032_v24 }
 0x9b4   : > { %v2046_v16 = vor.u32 1.1754944e-38, %v2045_v9  ;;  %vm2044_vm15 = vcmp.eq.f32.partialorder %v2043_v43, 8.507059e+37 }
 0x9b5   : > { %v2069_v27 = vpop.xlane.xlu0 %2068 }
 0x9b6   : > { %v2074_v20 = vsub.f32 %v2069_v27, %v2065_v19 }
 0x9b8   : > { %v3489_v29 = vpop.eup %3488  ;;  %v2076_v30 = vadd.f32 1e-12, %v2074_v20 }
 0x9b9   : > { %v2035_v31 = vmul.f32 %v3489_v29, %v2032_v24  ;;  %vm2040_vm12 = vweird.f32 %v3489_v29 }
 0x9ba   : > { %3490 = vrcp.f32 %v2076_v30  ;;  %vm2041_vm14 = vmor %vm2039_vm13, %vm2040_vm12  ;;  %v2089_v50 = vand.u32 2147483648, %v2076_v30  ;;  %v2087_v54 = vand.u32 2147483647, %v2076_v30  ;;  %vm2083_vm8 = vweird.f32 %v2076_v30 }
 0x9bb   : > { %v2036_v33 = vsub.f32 1.0, %v2035_v31 }
 0x9bc   : > { %v2090_v59 = vor.u32 1.1754944e-38, %v2089_v50  ;;  %vm2088_vm10 = vcmp.eq.f32.partialorder %v2087_v54, 8.507059e+37  ;;  %v4423_v54 = vpop.f32.mrf.mxu0 }
 0x9bd   : > { %v2037_v38 = vmul.f32 %v3489_v29, %v2036_v33 }
 0x9bf   : > { %v2038_v61 = vadd.f32 %v3489_v29, %v2037_v38 }
 0x9c0   : > { %v3491_v42 = vpop.eup %3490 }
 0x9c1   : > { %v2042_v45 = vsel %vm2041_vm14, %v3489_v29, %v2038_v61  ;;  %v2079_v62 = vmul.f32 %v3491_v42, %v2076_v30  ;;  %vm2084_vm7 = vweird.f32 %v3491_v42  ;;  %v3235_v29 = vld [vmem:[%s3886_s18 + $0x68] sm:$0xff] }
 0x9c2   : > { %v2047_v46 = vsel %vm2044_vm15, %v2046_v16, %v2042_v45  ;;  %vm2085_vm9 = vmor %vm2083_vm8, %vm2084_vm7  ;;  %v4388_v16 = vld [vmem:[#allocation9] sm:$0xff] }
 0x9c3   : > { %v2062_v47 = vmul.f32 %v2047_v46, %v2028_v56  ;;  %v2080_v48 = vsub.f32 1.0, %v2079_v62 }
 0x9c5   : > { %v2112_v51 = vsub.f32 %v2062_v47, %v4285_v14  ;;  %v2081_v53 = vmul.f32 %v3491_v42, %v2080_v48 }
 0x9c7   : > { %v2116_v55 = vmul.f32 0.5, %v2112_v51  ;;  %v2082_v57 = vadd.f32 %v3491_v42, %v2081_v53 }
 0x9c8   : > { %v2291_v30 = vpop.permute.xlu0 %2290 }
 0x9c9   : > { %v2120_v60 = vadd.f32 %v2116_v55, %v4285_v14  ;;  %v2086_v32 = vsel %vm2085_vm9, %v3491_v42, %v2082_v57  ;;  %v4425_v55 = vpop.f32.mrf.mxu1 }
 0x9ca   : > { %v2091_v4 = vsel %vm2088_vm10, %v2090_v59, %v2086_v32 }
 0x9cb   : > { %v2106_v10 = vmul.f32 %v2091_v4, %v2072_v2  ;;  %vm2124_vm11 = vcmp.ge.f32.partialorder %v2120_v60, 0.5  ;;  %v4432_v2 = vld [vmem:[%s3886_s18 + $0x70] sm:$0xff] }
 0x9cc   : > { %v3218_v17 = vsel %vm2124_vm11, 1.0, %v3751_v49 }
 0x9cd   : > { %v2113_v21 = vsub.f32 %v2106_v10, %v4291_v44  ;;  %v2136_v22 = vsub.f32 1.0, %v3218_v17 }
 0x9cf   : > { %v2117_v23 = vmul.f32 0.5, %v2113_v21  ;;  %v4364_v24 = vmul.f32 %v2136_v22, %v2120_v60 }
 0x9d0   : > { %v2283_v62 = vpop.permute.xlu0 %2282 }
 0x9d1   : > { %v2121_v27 = vadd.f32 %v2117_v23, %v4291_v44 }
 0x9d3   : > { %vm2125_vm12 = vcmp.ge.f32.partialorder %v2121_v27, 0.5 }
 0x9d4   : > { %v3219_v14 = vsel %vm2125_vm12, 1.0, %v3751_v49 }
 0x9d5   : > { %v3443_v18 = vpack.i.bf16 %v3219_v14, %v3218_v17  ;;  %v2137_v19 = vsub.f32 1.0, %v3219_v14 }
 0x9d7   : > { %3444 = vrot.lane.b32.xlu2 %v3443_v18, %s3749_s1  ;;  %v4370_v20 = vmul.f32 %v2137_v19, %v2121_v27  ;;  %3439 = vrot.lane.b32.xlu1 %v3443_v18, %s3750_s27 }
 0x9df   : > { %2292 = vrot.lane.b32.xlu1 %v3235_v29, %s3750_s27  ;;  %2284 = vrot.lane.b32.xlu2 %v3235_v29, %s3749_s1 }
 0xa31   : > { %v3445_v31 = vpop.permute.xlu2 %3444 }
 0xa32   : > { %v3447_v38 = vunpack.i.h.bf16 %v3445_v31  ;;  %v3446_v43 = vunpack.i.l.bf16 %v3445_v31 }
 0xa34   : > { %v2154_v56 = vsel %vm292_vm3, %v3447_v38, %v3446_v43  ;;  %v2153_v45 = vsel %vm292_vm3, %v3446_v43, %v3447_v38 }
 0xa39   : > { %v2285_v47 = vpop.permute.xlu2 %2284 }
 0xa3a   : > { %v2286_v51 = vsel %vm292_vm3, %v2283_v62, %v2285_v47  ;;  %v2287_v53 = vsel %vm292_vm3, %v2285_v47, %v2283_v62 }
 0xa49   : > { %v3440_v44 = vpop.permute.xlu1 %3439 }
 0xa4a   : > { %v3442_v33 = vunpack.i.h.bf16 %v3440_v44  ;;  %v3441_v9 = vunpack.i.l.bf16 %v3440_v44 }
 0xa4c   : > { %v2161_v61 = vsel %vm301_vm0, %v3441_v9, %v3442_v33  ;;  %v2162_v42 = vsel %vm301_vm0, %v3442_v33, %v3441_v9 }
 0xa4d   : > { %3222 = vmatpush.msk.msrb.mxu0 %vm284_vm1, %v2161_v61  ;;  %3226 = vmatpush.msk.msrb.mxu1 %vm3907_vm2, %v2162_v42 }
 0xa4f   : > { %3223 = vmatpush.msk.msrb.mxu0 %vm2124_vm11, %v5346_v6  ;;  %3227 = vmatpush.msk.msrb.mxu1 %vm2125_vm12, %v5346_v6 }
 0xa51   : > { %v2293_v46 = vpop.permute.xlu1 %2292  ;;  %3224 = vmatpush.msk.msrb.mxu0 %vm282_vm4, %v2154_v56  ;;  %3228 = vmatpush.msk.msrb.mxu1 %vm3921_vm5, %v2153_v45 }
 0xa52   : > { %v2294_v48 = vsel %vm301_vm0, %v2291_v30, %v2293_v46  ;;  %v2295_v50 = vsel %vm301_vm0, %v2293_v46, %v2291_v30  ;;  %3225 = vmatmul.msk.f32.vlgmr.msrb.gmra.mxu0 %vm5348_vm6, %v4388_v16  ;;  %3229 = vmatmul.msk.f32.vlgmr.msrb.gmra.mxu1 %vm5348_vm6, %v4388_v16 }
 0xa53   : > { %3236 = vmatpush.msk.msra.mxu0 %vm284_vm1, %v2294_v48  ;;  %3240 = vmatpush.msk.msra.mxu1 %vm3907_vm2, %v2295_v50 }
 0xa55   : > { %2320 = vmatpush.msra.mxu0 %v4353_v28  ;;  %2343 = vmatpush.msra.mxu1 %v3235_v29 }
 0xa57   : > { %3237 = vmatpush.msk.msra.mxu0 %vm282_vm4, %v2287_v53  ;;  %3241 = vmatpush.msk.msra.mxu1 %vm3921_vm5, %v2286_v51 }
 0xa5a   : > { %3238 = vmatmul.msk.f32.vlgmr.msra.gmra.mxu0 %vm5348_vm6, %v4338_v11  ;;  %3242 = vmatmul.msk.f32.vlgmr.msra.gmra.mxu1 %vm5348_vm6, %v4338_v11 }
 0xacf   : > { %v4427_v57 = vpop.f32.mrf.mxu0  ;;  %v4429_v28 = vpop.f32.mrf.mxu1 }
 0xad7   : > { %v2323_v59 = vpop.f32.mrf.mxu0  ;;  %v2346_v60 = vpop.f32.mrf.mxu1 }
 0xad8   : > { %2396 = vmin.xlane.f32.xlu2 %v2346_v60  ;;  %2356 = vmax.xlane.f32.xlu0 %v2323_v59 }
 0xad9   : > { %2352 = vmin.xlane.f32.xlu1 %v2323_v59 }
 0xae1   : > { %2400 = vmax.xlane.f32.xlu1 %v2346_v60 }
 0xafa   : > { %2622 = vrot.lane.b32.xlu1 %v4432_v2, %s3750_s27 }
 0xb24   : > { %363 = vmin.xlane.f32.xlu1 %v4098_v34 }
 0xb2c   : > { %411 = vmax.xlane.f32.xlu1 %v4100_v39 }
 0xb4b   : > { %v2357_v32 = vpop.xlane.xlu0 %2356  ;;  %v2397_v21 = vpop.xlane.xlu2 %2396 }
 0xb4c   : > { %v2353_v4 = vpop.xlane.xlu1 %2352 }
 0xb4d   : > { %v2362_v10 = vsub.f32 %v2357_v32, %v2353_v4  ;;  %v2360_v38 = vsub.f32 %v2323_v59, %v2353_v4  ;;  %v2404_v32 = vsub.f32 %v2346_v60, %v2397_v21 }
 0xb4f   : > { %v2364_v17 = vadd.f32 1e-12, %v2362_v10 }
 0xb51   : > { %3492 = vrcp.f32 %v2364_v17  ;;  %v2377_v29 = vand.u32 2147483648, %v2364_v17  ;;  %v2375_v31 = vand.u32 2147483647, %v2364_v17  ;;  %vm2371_vm14 = vweird.f32 %v2364_v17 }
 0xb53   : > { %v2378_v9 = vor.u32 1.1754944e-38, %v2377_v29  ;;  %vm2376_vm7 = vcmp.eq.f32.partialorder %v2375_v31, 8.507059e+37 }
 0xb54   : > { %v2401_v22 = vpop.xlane.xlu1 %2400 }
 0xb55   : > { %v2406_v23 = vsub.f32 %v2401_v22, %v2397_v21 }
 0xb57   : > { %v3493_v27 = vpop.eup %3492  ;;  %v2408_v14 = vadd.f32 1e-12, %v2406_v23 }
 0xb58   : > { %v2367_v18 = vmul.f32 %v3493_v27, %v2364_v17  ;;  %vm2372_vm13 = vweird.f32 %v3493_v27 }
 0xb59   : > { %3494 = vrcp.f32 %v2408_v14  ;;  %vm2373_vm15 = vmor %vm2371_vm14, %vm2372_vm13  ;;  %v2421_v62 = vand.u32 2147483648, %v2408_v14  ;;  %v2419_v48 = vand.u32 2147483647, %v2408_v14  ;;  %vm2415_vm9 = vweird.f32 %v2408_v14 }
 0xb5a   : > { %v2368_v19 = vsub.f32 1.0, %v2367_v18 }
 0xb5b   : > { %v2422_v53 = vor.u32 1.1754944e-38, %v2421_v62  ;;  %vm2420_vm11 = vcmp.eq.f32.partialorder %v2419_v48, 8.507059e+37 }
 0xb5c   : > { %v2369_v30 = vmul.f32 %v3493_v27, %v2368_v19 }
 0xb5e   : > { %v2370_v44 = vadd.f32 %v3493_v27, %v2369_v30  ;;  %v3261_v30 = vld [vmem:[%s3886_s18 + $0x78] sm:$0xff] }
 0xb5f   : > { %v3495_v33 = vpop.eup %3494 }
 0xb60   : > { %v2374_v43 = vsel %vm2373_vm15, %v3493_v27, %v2370_v44  ;;  %v2411_v61 = vmul.f32 %v3495_v33, %v2408_v14  ;;  %vm2416_vm8 = vweird.f32 %v3495_v33 }
 0xb61   : > { %v2379_v42 = vsel %vm2376_vm7, %v2378_v9, %v2374_v43  ;;  %vm2417_vm10 = vmor %vm2415_vm9, %vm2416_vm8 }
 0xb62   : > { %v2394_v56 = vmul.f32 %v2379_v42, %v2360_v38  ;;  %v2412_v45 = vsub.f32 1.0, %v2411_v61 }
 0xb64   : > { %v2444_v46 = vsub.f32 %v2394_v56, %v4364_v24  ;;  %v2413_v47 = vmul.f32 %v3495_v33, %v2412_v45 }
 0xb66   : > { %v2448_v50 = vmul.f32 0.5, %v2444_v46  ;;  %v2414_v51 = vadd.f32 %v3495_v33, %v2413_v47 }
 0xb68   : > { %v2452_v59 = vadd.f32 %v2448_v50, %v4364_v24  ;;  %v2418_v4 = vsel %vm2417_vm10, %v3495_v33, %v2414_v51 }
 0xb69   : > { %v2423_v10 = vsel %vm2420_vm11, %v2422_v53, %v2418_v4 }
 0xb6a   : > { %v2438_v17 = vmul.f32 %v2423_v10, %v2404_v32  ;;  %vm2456_vm12 = vcmp.ge.f32.partialorder %v2452_v59, 0.5 }
 0xb6b   : > { %v3244_v22 = vsel %vm2456_vm12, 1.0, %v3751_v49 }
 0xb6c   : > { %v2445_v23 = vsub.f32 %v2438_v17, %v4370_v20  ;;  %v2468_v27 = vsub.f32 1.0, %v3244_v22  ;;  %v2623_v62 = vpop.permute.xlu1 %2622 }
 0xb6e   : > { %v2449_v18 = vmul.f32 0.5, %v2445_v23  ;;  %v4443_v19 = vmul.f32 %v2468_v27, %v2452_v59 }
 0xb70   : > { %v2453_v14 = vadd.f32 %v2449_v18, %v4370_v20  ;;  %v1967_v20 = vld [vmem:[#allocation7 + $0x8] sm:$0xff] }
 0xb71   : > { %3213 = vmatmul.msk.f32.gmra.mxu2 %vm5348_vm6, %v1967_v20  ;;  %3217 = vmatmul.msk.f32.gmra.mxu3 %vm5348_vm6, %v1967_v20 }
 0xb72   : > { %vm2457_vm13 = vcmp.ge.f32.partialorder %v2453_v14, 0.5  ;;  %3243 = vmatmul.msk.f32.gmra.mxu1 %vm5348_vm6, %v1967_v20  ;;  %3239 = vmatmul.msk.f32.gmra.mxu0 %vm5348_vm6, %v1967_v20 }
 0xb73   : > { %v3245_v24 = vsel %vm2457_vm13, 1.0, %v3751_v49 }
 0xb74   : > { %v3453_v60 = vpack.i.bf16 %v3245_v24, %v3244_v22  ;;  %v2469_v21 = vsub.f32 1.0, %v3245_v24 }
 0xb76   : > { %3454 = vrot.lane.b32.xlu2 %v3453_v60, %s3749_s1  ;;  %3449 = vrot.lane.b32.xlu0 %v3453_v60, %s3750_s27  ;;  %v4450_v29 = vmul.f32 %v2469_v21, %v2453_v14 }
 0xb7e   : > { %2614 = vrot.lane.b32.xlu2 %v4432_v2, %s3749_s1  ;;  %2624 = vrot.lane.b32.xlu0 %v3261_v30, %s3750_s27 }
 0xb86   : > { %2616 = vrot.lane.b32.xlu0 %v3261_v30, %s3749_s1 }
 0xba7   : > { %367 = vmax.xlane.f32.xlu2 %v4098_v34 }
 0xbaf   : > { %549 = vmin.xlane.f32.xlu2 %v4011_v25 }
 0xbb0   : > { %407 = vmin.xlane.f32.xlu0 %v4100_v39 }
 0xbb8   : > { %551 = vmax.xlane.f32.xlu0 %v4011_v25 }
 0xbd0   : > { %v3455_v31 = vpop.permute.xlu2 %3454 }
 0xbd1   : > { %v3457_v38 = vunpack.i.h.bf16 %v3455_v31  ;;  %v3456_v43 = vunpack.i.l.bf16 %v3455_v31 }
 0xbd3   : > { %v2486_v56 = vsel %vm292_vm3, %v3457_v38, %v3456_v43  ;;  %v2485_v45 = vsel %vm292_vm3, %v3456_v43, %v3457_v38 }
 0xbd8   : > { %v2615_v50 = vpop.permute.xlu2 %2614 }
 0xbe8   : > { %v3450_v44 = vpop.permute.xlu0 %3449 }
 0xbe9   : > { %v3452_v33 = vunpack.i.h.bf16 %v3450_v44  ;;  %v3451_v9 = vunpack.i.l.bf16 %v3450_v44 }
 0xbeb   : > { %v2493_v61 = vsel %vm301_vm0, %v3451_v9, %v3452_v33  ;;  %v2494_v42 = vsel %vm301_vm0, %v3452_v33, %v3451_v9 }
 0xbec   : > { %3248 = vmatpush.msk.msra.mxu2 %vm284_vm1, %v2493_v61  ;;  %3252 = vmatpush.msk.msra.mxu3 %vm3907_vm2, %v2494_v42 }
 0xbee   : > { %3249 = vmatpush.msk.msra.mxu2 %vm2456_vm12, %v5346_v6  ;;  %3253 = vmatpush.msk.msra.mxu3 %vm2457_vm13, %v5346_v6 }
 0xbf0   : > { %v2625_v46 = vpop.permute.xlu0 %2624  ;;  %3250 = vmatpush.msk.msra.mxu2 %vm282_vm4, %v2486_v56  ;;  %3254 = vmatpush.msk.msra.mxu3 %vm3921_vm5, %v2485_v45 }
 0xbf1   : > { %v2626_v47 = vsel %vm301_vm0, %v2623_v62, %v2625_v46  ;;  %v2627_v48 = vsel %vm301_vm0, %v2625_v46, %v2623_v62  ;;  %3251 = vmatmul.msk.f32.vlgmr.msra.gmra.mxu2 %vm5348_vm6, %v4388_v16  ;;  %3255 = vmatmul.msk.f32.vlgmr.msra.gmra.mxu3 %vm5348_vm6, %v4388_v16  ;;  %v364_v16 = vpop.xlane.xlu1 %363 }
 0xbf2   : > { %3262 = vmatpush.msk.msrb.mxu2 %vm284_vm1, %v2626_v47  ;;  %3266 = vmatpush.msk.msrb.mxu3 %vm3907_vm2, %v2627_v48  ;;  %v370_v44 = vsub.f32 %v4098_v34, %v364_v16 }
 0xbf4   : > { %2652 = vmatpush.msrb.mxu2 %v4432_v2  ;;  %2675 = vmatpush.msrb.mxu3 %v3261_v30 }
 0xbf8   : > { %v2617_v51 = vpop.permute.xlu0 %2616 }
 0xbf9   : > { %v2618_v53 = vsel %vm292_vm3, %v2615_v50, %v2617_v51  ;;  %v2619_v32 = vsel %vm292_vm3, %v2617_v51, %v2615_v50 }
 0xbfa   : > { %3263 = vmatpush.msk.msrb.mxu2 %vm282_vm4, %v2619_v32  ;;  %3267 = vmatpush.msk.msrb.mxu3 %vm3921_vm5, %v2618_v53 }
 0xbfb   : > { %3264 = vmatmul.msk.f32.vlgmr.msrb.gmra.mxu2 %vm5348_vm6, %v4338_v11  ;;  %3268 = vmatmul.msk.f32.vlgmr.msrb.gmra.mxu3 %vm5348_vm6, %v4338_v11 }
 0xc03   : > { %3265 = vmatmul.msk.f32.gmra.mxu2 %vm5348_vm6, %v1967_v20  ;;  %3269 = vmatmul.msk.f32.gmra.mxu3 %vm5348_vm6, %v1967_v20 }
 0xc1a   : > { %v368_v2 = vpop.xlane.xlu2 %367 }
 0xc1b   : > { %v372_v59 = vsub.f32 %v368_v2, %v364_v16 }
 0xc1d   : > { %v374_v4 = vadd.f32 1e-12, %v372_v59 }
 0xc1f   : > { %3496 = vrcp.f32 %v374_v4  ;;  %v400_v27 = vand.u32 2147483648, %v374_v4  ;;  %v398_v14 = vand.u32 2147483647, %v374_v4  ;;  %vm394_vm15 = vweird.f32 %v374_v4 }
 0xc21   : > { %v401_v30 = vor.u32 1.1754944e-38, %v400_v27  ;;  %vm399_vm8 = vcmp.eq.f32.partialorder %v398_v14, 8.507059e+37  ;;  %v4527_v27 = vpop.f32.mrf.mxu2 }
 0xc22   : > { %v550_v24 = vpop.xlane.xlu2 %549 }
 0xc23   : > { %v4512_v10 = vpop.xlane.xlu0 %407  ;;  %v553_v51 = vsub.f32 %v4011_v25, %v550_v24  ;;  %v4529_v25 = vpop.f32.mrf.mxu3 }
 0xc25   : > { %v3497_v17 = vpop.eup %3496 }
 0xc26   : > { %v390_v22 = vmul.f32 %v3497_v17, %v374_v4  ;;  %vm395_vm14 = vweird.f32 %v3497_v17 }
 0xc27   : > { %vm396_vm7 = vmor %vm394_vm15, %vm395_vm14 }
 0xc28   : > { %v391_v23 = vsub.f32 1.0, %v390_v22 }
 0xc2a   : > { %v392_v18 = vmul.f32 %v3497_v17, %v391_v23 }
 0xc2b   : > { %v552_v11 = vpop.xlane.xlu0 %551 }
 0xc2c   : > { %v393_v60 = vadd.f32 %v3497_v17, %v392_v18  ;;  %v554_v21 = vsub.f32 %v552_v11, %v550_v24 }
 0xc2e   : > { %v397_v20 = vsel %vm396_vm7, %v3497_v17, %v393_v60  ;;  %v555_v31 = vadd.f32 1e-12, %v554_v21  ;;  %v412_v60 = vpop.xlane.xlu1 %411 }
 0xc2f   : > { %v402_v33 = vsel %vm399_vm8, %v401_v30, %v397_v20  ;;  %v416_v21 = vsub.f32 %v412_v60, %v4512_v10 }
 0xc30   : > { %3498 = vrcp.f32 %v555_v31  ;;  %v404_v9 = vmul.f32 %v402_v33, %v370_v44  ;;  %v567_v46 = vand.u32 2147483648, %v555_v31  ;;  %v565_v48 = vand.u32 2147483647, %v555_v31 }
 0xc31   : > { %vm561_vm11 = vweird.f32 %v555_v31  ;;  %v418_v30 = vadd.f32 1e-12, %v416_v21 }
 0xc32   : > { %v459_v38 = vmul.f32 0.5, %v404_v9  ;;  %v568_v50 = vor.u32 1.1754944e-38, %v567_v46  ;;  %vm566_vm13 = vcmp.eq.f32.partialorder %v565_v48, 8.507059e+37 }
 0xc33   : > { %3500 = vrcp.f32 %v418_v30  ;;  %vm438_vm7 = vweird.f32 %v418_v30 }
 0xc34   : > { %vm467_vm9 = vcmp.ge.f32.partialorder %v459_v38, 0.5 }
 0xc35   : > { %v3092_v61 = vsel %vm467_vm9, 1.0, %v3751_v49 }
 0xc36   : > { %v3499_v43 = vpop.eup %3498  ;;  %v479_v56 = vsub.f32 1.0, %v3092_v61 }
 0xc37   : > { %v557_v42 = vmul.f32 %v3499_v43, %v555_v31  ;;  %vm562_vm10 = vweird.f32 %v3499_v43 }
 0xc38   : > { %v4516_v62 = vmul.f32 %v479_v56, %v459_v38  ;;  %vm563_vm12 = vmor %vm561_vm11, %vm562_vm10  ;;  %v444_v38 = vand.u32 2147483648, %v418_v30 }
 0xc39   : > { %v558_v45 = vsub.f32 1.0, %v557_v42  ;;  %v3501_v20 = vpop.eup %3500 }
 0xc3a   : > { %v434_v31 = vmul.f32 %v3501_v20, %v418_v30  ;;  %vm439_vm15 = vweird.f32 %v3501_v20 }
 0xc3b   : > { %v559_v47 = vmul.f32 %v3499_v43, %v558_v45  ;;  %vm440_vm8 = vmor %vm438_vm7, %vm439_vm15 }
 0xc3c   : > { %v435_v44 = vsub.f32 1.0, %v434_v31 }
 0xc3d   : > { %v560_v34 = vadd.f32 %v3499_v43, %v559_v47  ;;  %v445_v47 = vor.u32 1.1754944e-38, %v444_v38 }
 0xc3e   : > { %v436_v33 = vmul.f32 %v3501_v20, %v435_v44 }
 0xc3f   : > { %v564_v53 = vsel %vm563_vm12, %v3499_v43, %v560_v34  ;;  %v442_v43 = vand.u32 2147483647, %v418_v30 }
 0xc40   : > { %v569_v32 = vsel %vm566_vm13, %v568_v50, %v564_v53  ;;  %v437_v9 = vadd.f32 %v3501_v20, %v436_v33  ;;  %v414_v50 = vsub.f32 %v4100_v39, %v4512_v10 }
 0xc41   : > { %v570_v16 = vmul.f32 %v569_v32, %v553_v51  ;;  %vm443_vm9 = vcmp.eq.f32.partialorder %v442_v43, 8.507059e+37 }
 0xc42   : > { %v441_v45 = vsel %vm440_vm8, %v3501_v20, %v437_v9 }
 0xc43   : > { %v597_v2 = vmul.f32 0.5, %v570_v16  ;;  %v446_v34 = vsel %vm443_vm9, %v445_v47, %v441_v45 }
 0xc44   : > { %v448_v51 = vmul.f32 %v446_v34, %v414_v50 }
 0xc45   : > { %vm601_vm14 = vcmp.ge.f32.partialorder %v597_v2, 0.5 }
 0xc46   : > { %v3102_v59 = vsel %vm601_vm14, 1.0, %v3751_v49 }
 0xc47   : > { %v607_v4 = vsub.f32 1.0, %v3102_v59  ;;  %v613_v17 = vadd.f32 %v3102_v59, %v3092_v61 }
 0xc49   : > { %v4520_v22 = vmul.f32 %v607_v4, %v597_v2  ;;  %v615_v23 = vmul.f32 0.5, %v613_v17  ;;  %v460_v17 = vmul.f32 0.5, %v448_v51 }
 0xc4b   : > { %617 = vst [vmem:[%s4524_s20] sm:$0xff] %v615_v23  ;;  %vm468_vm10 = vcmp.ge.f32.partialorder %v460_v17, 0.5 }
 0xc4c   : > { %v4587_v38 = vsel %vm468_vm10, 1.0, %v3751_v49 }
 0xc4d   : > { %v480_v51 = vsub.f32 1.0, %v4587_v38 }
 0xc74   : > { %v4531_v18 = vpop.f32.mrf.mxu2  ;;  %v4533_v14 = vpop.f32.mrf.mxu3 }
 0xc7e   : > { %v4535_v24 = vpop.f32.mrf.mxu2  ;;  %v4537_v11 = vpop.f32.mrf.mxu3 }
 0xc7f   : > { %2728 = vmin.xlane.f32.xlu0 %v4537_v11  ;;  %2688 = vmax.xlane.f32.xlu2 %v4535_v24 }
 0xc80   : > { %2684 = vmin.xlane.f32.xlu1 %v4535_v24 }
 0xc87   : > { %573 = vmax.xlane.f32.xlu0 %v4013_v26  ;;  %571 = vmin.xlane.f32.xlu2 %v4013_v26 }
 0xc88   : > { %694 = vmin.xlane.f32.xlu1 %v4179_v52 }
 0xc8f   : > { %738 = vmin.xlane.f32.xlu0 %v4181_v63  ;;  %698 = vmax.xlane.f32.xlu2 %v4179_v52 }
 0xc90   : > { %742 = vmax.xlane.f32.xlu1 %v4181_v63 }
 0xc97   : > { %882 = vmax.xlane.f32.xlu0 %v4102_v40  ;;  %880 = vmin.xlane.f32.xlu2 %v4102_v40 }
 0xc98   : > { %2732 = vmax.xlane.f32.xlu1 %v4537_v11 }
 0xc9f   : > { %1026 = vmin.xlane.f32.xlu0 %v4265_v5  ;;  %904 = vmax.xlane.f32.xlu2 %v4104_v41 }
 0xca0   : > { %902 = vmin.xlane.f32.xlu1 %v4104_v41 }
 0xca7   : > { %1074 = vmax.xlane.f32.xlu0 %v4267_v7  ;;  %1070 = vmin.xlane.f32.xlu2 %v4267_v7 }
 0xca8   : > { %1030 = vmax.xlane.f32.xlu1 %v4265_v5 }
 0xcaf   : > { %1234 = vmin.xlane.f32.xlu0 %v4185_v1  ;;  %1214 = vmax.xlane.f32.xlu2 %v4183_v0 }
 0xcb0   : > { %1212 = vmin.xlane.f32.xlu1 %v4183_v0 }
 0xcb7   : > { %1362 = vmax.xlane.f32.xlu0 %v4344_v12  ;;  %1358 = vmin.xlane.f32.xlu2 %v4344_v12 }
 0xcb8   : > { %1236 = vmax.xlane.f32.xlu1 %v4185_v1 }
 0xcbf   : > { %1402 = vmin.xlane.f32.xlu0 %v4346_v37 }
 0xcc7   : > { %1406 = vmax.xlane.f32.xlu0 %v4346_v37 }
 0xccf   : > { %1544 = vmin.xlane.f32.xlu0 %v4269_v35 }
 0xcd7   : > { %1568 = vmax.xlane.f32.xlu0 %v4271_v36 }
 0xcdf   : > { %1690 = vmin.xlane.f32.xlu0 %v4423_v54 }
 0xce7   : > { %1694 = vmax.xlane.f32.xlu0 %v4423_v54 }
 0xcef   : > { %1734 = vmin.xlane.f32.xlu0 %v4425_v55 }
 0xcf2   : > { %v4571_v61 = vpop.xlane.xlu0 %2728  ;;  %v2689_v42 = vpop.xlane.xlu2 %2688 }
 0xcf3   : > { %v2685_v56 = vpop.xlane.xlu1 %2684 }
 0xcf4   : > { %v2694_v46 = vsub.f32 %v2689_v42, %v2685_v56  ;;  %v2692_v34 = vsub.f32 %v4535_v24, %v2685_v56 }
 0xcf6   : > { %v2696_v48 = vadd.f32 1e-12, %v2694_v46 }
 0xcf7   : > { %1738 = vmax.xlane.f32.xlu0 %v4425_v55 }
 0xcf8   : > { %3502 = vrcp.f32 %v2696_v48  ;;  %v2709_v21 = vand.u32 2147483648, %v2696_v48  ;;  %v2707_v20 = vand.u32 2147483647, %v2696_v48  ;;  %vm2703_vm12 = vweird.f32 %v2696_v48 }
 0xcfa   : > { %v574_v53 = vpop.xlane.xlu0 %573  ;;  %v4576_v32 = vpop.xlane.xlu2 %571  ;;  %v2710_v45 = vor.u32 1.1754944e-38, %v2709_v21  ;;  %vm2708_vm14 = vcmp.eq.f32.partialorder %v2707_v20, 8.507059e+37  ;;  %v4605_v20 = vmul.f32 %v480_v51, %v460_v17 }
 0xcfb   : > { %v576_v16 = vsub.f32 %v574_v53, %v4576_v32  ;;  %v4579_v2 = vpop.xlane.xlu1 %694 }
 0xcfd   : > { %v577_v59 = vadd.f32 1e-12, %v576_v16 }
 0xcfe   : > { %v3503_v4 = vpop.eup %3502 }
 0xcff   : > { %v2699_v23 = vmul.f32 %v3503_v4, %v2696_v48  ;;  %3504 = vrcp.f32 %v577_v59  ;;  %1898 = vmin.xlane.f32.xlu0 %v4350_v15  ;;  %vm2704_vm11 = vweird.f32 %v3503_v4  ;;  %vm583_vm7 = vweird.f32 %v577_v59 }
 0xd00   : > { %vm2705_vm13 = vmor %vm2703_vm12, %vm2704_vm11 }
 0xd01   : > { %v2700_v60 = vsub.f32 1.0, %v2699_v23  ;;  %v587_v23 = vand.u32 2147483647, %v577_v59 }
 0xd02   : > { %v4582_v39 = vpop.xlane.xlu0 %738  ;;  %v699_v10 = vpop.xlane.xlu2 %698 }
 0xd03   : > { %v2701_v30 = vmul.f32 %v3503_v4, %v2700_v60  ;;  %v703_v31 = vsub.f32 %v699_v10, %v4579_v2  ;;  %v743_v44 = vpop.xlane.xlu1 %742  ;;  %v589_v60 = vand.u32 2147483648, %v577_v59  ;;  %vm588_vm9 = vcmp.eq.f32.partialorder %v587_v23, 8.507059e+37 }
 0xd04   : > { %v747_v33 = vsub.f32 %v743_v44, %v4582_v39  ;;  %v701_v23 = vsub.f32 %v4179_v52, %v4579_v2 }
 0xd05   : > { %v3505_v9 = vpop.eup %3504  ;;  %v2702_v43 = vadd.f32 %v3503_v4, %v2701_v30  ;;  %v4589_v42 = vadd.f32 1e-12, %v703_v31 }
 0xd06   : > { %v579_v46 = vmul.f32 %v3505_v9, %v577_v59  ;;  %v4591_v47 = vadd.f32 1e-12, %v747_v33  ;;  %vm584_vm15 = vweird.f32 %v3505_v9 }
 0xd07   : > { %v2706_v50 = vsel %vm2705_vm13, %v3503_v4, %v2702_v43  ;;  %3506 = vrcp.f32 %v4589_v42  ;;  %2026 = vmax.xlane.f32.xlu0 %v4527_v27  ;;  %v575_v43 = vsub.f32 %v4013_v26, %v4576_v32  ;;  %vm585_vm8 = vmor %vm583_vm7, %vm584_vm15  ;;  %v729_v17 = vand.u32 2147483647, %v4589_v42 }
 0xd08   : > { %v2711_v53 = vsel %vm2708_vm14, %v2710_v45, %v2706_v50  ;;  %v580_v16 = vsub.f32 1.0, %v579_v46  ;;  %3508 = vrcp.f32 %v4591_v47  ;;  %v590_v45 = vor.u32 1.1754944e-38, %v589_v60 }
 0xd09   : > { %v4598_v48 = vmul.f32 %v2711_v53, %v2692_v34  ;;  %vm725_vm10 = vweird.f32 %v4589_v42  ;;  %vm4636_vm12 = vcmp.eq.f32.partialorder %v729_v17, 8.507059e+37  ;;  %vm769_vm13 = vweird.f32 %v4591_v47 }
 0xd0a   : > { %v581_v21 = vmul.f32 %v3505_v9, %v580_v16  ;;  %v883_v10 = vpop.xlane.xlu0 %882  ;;  %v4600_v24 = vpop.xlane.xlu2 %880  ;;  %v731_v16 = vand.u32 2147483648, %v4589_v42 }
 0xd0b   : > { %v2776_v56 = vsub.f32 %v4598_v48, %v4443_v19  ;;  %v885_v4 = vsub.f32 %v883_v10, %v4600_v24  ;;  %v2733_v30 = vpop.xlane.xlu1 %2732 }
 0xd0c   : > { %v582_v31 = vadd.f32 %v3505_v9, %v581_v21  ;;  %v2738_v44 = vsub.f32 %v2733_v30, %v4571_v61  ;;  %v745_v21 = vsub.f32 %v4181_v63, %v4582_v39  ;;  %v732_v2 = vor.u32 1.1754944e-38, %v731_v16 }
 0xd0d   : > { %v3507_v33 = vpop.eup %3506  ;;  %v4610_v46 = vadd.f32 1e-12, %v885_v4  ;;  %v773_v4 = vand.u32 2147483647, %v4591_v47 }
 0xd0e   : > { %v4612_v34 = vpop.eup %3508  ;;  %v586_v50 = vsel %vm585_vm8, %v3505_v9, %v582_v31  ;;  %v721_v53 = vmul.f32 %v3507_v33, %v4589_v42  ;;  %v4616_v51 = vadd.f32 1e-12, %v2738_v44  ;;  %vm726_vm11 = vweird.f32 %v3507_v33 }
 0xd0f   : > { %v591_v59 = vsel %vm588_vm9, %v590_v45, %v586_v50  ;;  %v765_v26 = vmul.f32 %v4612_v34, %v4591_v47  ;;  %3510 = vrcp.f32 %v4610_v46  ;;  %2208 = vmin.xlane.f32.xlu0 %v4427_v57  ;;  %vm770_vm15 = vweird.f32 %v4612_v34  ;;  %vm727_vm7 = vmor %vm725_vm10, %vm726_vm11 }
 0xd10   : > { %v592_v9 = vmul.f32 %v591_v59, %v575_v43  ;;  %v722_v60 = vsub.f32 1.0, %v721_v53  ;;  %3512 = vrcp.f32 %v4616_v51  ;;  %v775_v50 = vand.u32 2147483648, %v4591_v47  ;;  %vm4668_vm9 = vmor %vm769_vm13, %vm770_vm15 }
 0xd11   : > { %v766_v10 = vsub.f32 1.0, %v765_v26  ;;  %vm4653_vm8 = vcmp.eq.f32.partialorder %v773_v4, 8.507059e+37  ;;  %vm892_vm10 = vweird.f32 %v4610_v46  ;;  %v2751_v4 = vand.u32 2147483647, %v4616_v51 }
 0xd12   : > { %v4631_v30 = vmul.f32 0.5, %v592_v9  ;;  %v723_v31 = vmul.f32 %v3507_v33, %v722_v60  ;;  %v4634_v44 = vpop.xlane.xlu0 %1026  ;;  %v905_v43 = vpop.xlane.xlu2 %904 }
 0xd13   : > { %v767_v63 = vmul.f32 %v4612_v34, %v766_v10  ;;  %v4642_v39 = vpop.xlane.xlu1 %902 }
 0xd14   : > { %vm602_vm14 = vcmp.ge.f32.partialorder %v4631_v30, 0.5  ;;  %v724_v45 = vadd.f32 %v3507_v33, %v723_v31  ;;  %v907_v26 = vsub.f32 %v905_v43, %v4642_v39  ;;  %v896_v31 = vand.u32 2147483647, %v4610_v46 }
 0xd15   : > { %v3511_v53 = vpop.eup %3510  ;;  %v4648_v17 = vsel %vm602_vm14, 1.0, %v3751_v49  ;;  %v768_v59 = vadd.f32 %v4612_v34, %v767_v63  ;;  %vm2747_vm14 = vweird.f32 %v4616_v51 }
 0xd16   : > { %v614_v9 = vadd.f32 %v4648_v17, %v4587_v38  ;;  %v728_v60 = vsel %vm727_vm7, %v3507_v33, %v724_v45  ;;  %v888_v10 = vmul.f32 %v3511_v53, %v4610_v46  ;;  %v4662_v6 = vpop.eup %3512  ;;  %v884_v38 = vsub.f32 %v4102_v40, %v4600_v24 }
 0xd17   : > { %v733_v42 = vsel %vm4636_vm12, %v732_v2, %v728_v60  ;;  %v898_v33 = vand.u32 2147483648, %v4610_v46  ;;  %v4675_v43 = vadd.f32 1e-12, %v907_v26  ;;  %2232 = vmax.xlane.f32.xlu0 %v4429_v28  ;;  %v772_v52 = vsel %vm4668_vm9, %v4612_v34, %v768_v59 }
 0xd18   : > { %v616_v63 = vmul.f32 0.5, %v614_v9  ;;  %v735_v45 = vmul.f32 %v733_v42, %v701_v23  ;;  %v889_v47 = vsub.f32 1.0, %v888_v10  ;;  %v2780_v2 = vmul.f32 0.5, %v2776_v56 }
 0xd19   : > { %v776_v60 = vor.u32 1.1754944e-38, %v775_v50  ;;  %v2743_v40 = vmul.f32 %v4662_v6, %v4616_v51  ;;  %3514 = vrcp.f32 %v4675_v43  ;;  %vm893_vm11 = vweird.f32 %v3511_v53 }
 0xd1a   : > { %618 = vst [vmem:[%s4524_s20 + $0x8] sm:$0xff] %v616_v63  ;;  %v890_v24 = vmul.f32 %v3511_v53, %v889_v47  ;;  %vm4689_vm12 = vcmp.eq.f32.partialorder %v896_v31, 8.507059e+37  ;;  %v1075_v34 = vpop.xlane.xlu0 %1074  ;;  %v4693_v59 = vpop.xlane.xlu2 %1070  ;;  %v786_v48 = vsub.f32 %v735_v45, %v4516_v62  ;;  %v899_v42 = vor.u32 1.1754944e-38, %v898_v33  ;;  %vm894_vm13 = vmor %vm892_vm10, %vm893_vm11 }
 0xd1b   : > { %v2744_v56 = vsub.f32 1.0, %v2743_v40  ;;  %v777_v50 = vsel %vm4653_vm8, %v776_v60, %v772_v52  ;;  %v1079_v26 = vsub.f32 %v1075_v34, %v4693_v59  ;;  %v1031_v9 = vpop.xlane.xlu1 %1030  ;;  %v4700_v63 = vpop.f32.mrf.mxu1  ;;  %v2753_v45 = vand.u32 2147483648, %v4616_v51 }
 0xd1c   : > { %v891_v10 = vadd.f32 %v3511_v53, %v890_v24  ;;  %v779_v31 = vmul.f32 %v777_v50, %v745_v21  ;;  %v1035_v47 = vsub.f32 %v1031_v9, %v4634_v44  ;;  %v608_v33 = vsub.f32 1.0, %v4648_v17 }
 0xd1d   : > { %v4708_v52 = vadd.f32 1e-12, %v1079_v26  ;;  %v4714_v40 = vadd.f32 %v2780_v2, %v4443_v19  ;;  %v2745_v34 = vmul.f32 %v4662_v6, %v2744_v56  ;;  %v790_v50 = vmul.f32 0.5, %v786_v48 }
 0xd1e   : > { %v895_v60 = vsel %vm894_vm13, %v3511_v53, %v891_v10  ;;  %v787_v21 = vsub.f32 %v779_v31, %v4605_v20  ;;  %v906_v53 = vsub.f32 %v4104_v41, %v4642_v39  ;;  %v4724_v19 = vor.u32 1.1754944e-38, %v2753_v45 }
 0xd1f   : > { %v3515_v46 = vpop.eup %3514  ;;  %v900_v24 = vsel %vm4689_vm12, %v899_v42, %v895_v60  ;;  %3516 = vrcp.f32 %v4708_v52  ;;  %2398 = vmin.xlane.f32.xlu0 %v4700_v63  ;;  %v918_v2 = vand.u32 2147483647, %v4675_v43  ;;  %v920_v23 = vand.u32 2147483648, %v4675_v43 }
 0xd20   : > { %v901_v26 = vmul.f32 %v900_v24, %v884_v38  ;;  %v910_v17 = vmul.f32 %v3515_v46, %v4675_v43  ;;  %v791_v9 = vmul.f32 0.5, %v787_v21  ;;  %v4728_v10 = vadd.f32 1e-12, %v1035_v47 }
 0xd21   : > { %v4731_v56 = vmul.f32 %v608_v33, %v4631_v30  ;;  %v4740_v31 = vadd.f32 %v4662_v6, %v2745_v34  ;;  %vm2748_vm15 = vweird.f32 %v4662_v6  ;;  %v4745_v45 = vadd.f32 %v790_v50, %v4516_v62 }
 0xd22   : > { %v926_v48 = vsub.f32 %v901_v26, %v4520_v22  ;;  %v911_v38 = vsub.f32 1.0, %v910_v17  ;;  %v4735_v42 = vadd.f32 %v791_v9, %v4605_v20  ;;  %v4737_v41 = vpop.xlane.xlu0 %1234  ;;  %v1215_v39 = vpop.xlane.xlu2 %1214  ;;  %3518 = vrcp.f32 %v4728_v10  ;;  %vm4760_vm11 = vmor %vm2747_vm14, %vm2748_vm15 }
 0xd23   : > { %vm914_vm7 = vweird.f32 %v4675_v43  ;;  %vm915_vm8 = vweird.f32 %v3515_v46  ;;  %vm4748_vm9 = vcmp.eq.f32.partialorder %v918_v2, 8.507059e+37  ;;  %v921_v60 = vor.u32 1.1754944e-38, %v920_v23  ;;  %v4766_v50 = vpop.xlane.xlu1 %1212 }
 0xd24   : > { %v928_v30 = vmul.f32 0.5, %v926_v48  ;;  %v912_v47 = vmul.f32 %v3515_v46, %v911_v38  ;;  %vm799_vm10 = vcmp.ge.f32.partialorder %v4735_v42, 0.5  ;;  %v1077_v21 = vsub.f32 %v4267_v7, %v4693_v59  ;;  %vm916_vm13 = vmor %vm914_vm7, %vm915_vm8 }
 0xd25   : > { %v3517_v20 = vpop.eup %3516  ;;  %vm1101_vm12 = vweird.f32 %v4708_v52  ;;  %v1105_v26 = vand.u32 2147483647, %v4708_v52  ;;  %v1107_v7 = vand.u32 2147483648, %v4708_v52  ;;  %vm798_vm6 = vcmp.ge.f32.partialorder %v4745_v45, 0.5 }
 0xd26   : > { %v4756_v24 = vadd.f32 %v928_v30, %v4520_v22  ;;  %v913_v43 = vadd.f32 %v3515_v46, %v912_v47  ;;  %v1097_v34 = vmul.f32 %v3517_v20, %v4708_v52  ;;  %v2750_v22 = vsel %vm4760_vm11, %v4662_v6, %v4740_v31 }
 0xd27   : > { %2542 = vmax.xlane.f32.xlu0 %v4531_v18  ;;  %vm4777_vm15 = vcmp.eq.f32.partialorder %v2751_v4, 8.507059e+37  ;;  %v3117_v17 = vsel %vm799_vm10, 1.0, %v3751_v49  ;;  %vm1102_vm7 = vweird.f32 %v3517_v20  ;;  %v1217_v6 = vsub.f32 %v1215_v39, %v4766_v50 }
 0xd28   : > { %vm932_vm14 = vcmp.ge.f32.partialorder %v4756_v24, 0.5  ;;  %v917_v59 = vsel %vm916_vm13, %v3515_v46, %v913_v43  ;;  %v1098_v9 = vsub.f32 1.0, %v1097_v34  ;;  %v3519_v2 = vpop.eup %3518  ;;  %v3116_v46 = vsel %vm798_vm6, 1.0, %v3751_v49  ;;  %vm1103_vm6 = vmor %vm1101_vm12, %vm1102_vm7 }
 0xd29   : > { %v922_v23 = vsel %vm4748_vm9, %v921_v60, %v917_v59  ;;  %v4787_v48 = vsel %vm932_vm14, 1.0, %v3751_v49  ;;  %v1053_v31 = vmul.f32 %v3519_v2, %v4728_v10  ;;  %vm4794_vm8 = vcmp.eq.f32.partialorder %v1105_v26, 8.507059e+37 }
 0xd2a   : > { %v923_v4 = vmul.f32 %v922_v23, %v906_v53  ;;  %v1099_v38 = vmul.f32 %v3517_v20, %v1098_v9  ;;  %v1363_v30 = vpop.xlane.xlu0 %1362  ;;  %v1061_v33 = vand.u32 2147483647, %v4728_v10  ;;  %v944_v60 = vadd.f32 %v4787_v48, %v3116_v46  ;;  %v4803_v59 = vpop.xlane.xlu2 %1358 }
 0xd2b   : > { %v4800_v62 = vadd.f32 1e-12, %v1217_v6  ;;  %v811_v39 = vsub.f32 1.0, %v3117_v17  ;;  %v1054_v34 = vsub.f32 1.0, %v1053_v31  ;;  %v1108_v26 = vor.u32 1.1754944e-38, %v1107_v7 }
 0xd2c   : > { %v927_v53 = vsub.f32 %v923_v4, %v4731_v56  ;;  %v1100_v43 = vadd.f32 %v3517_v20, %v1099_v38  ;;  %v1063_v9 = vand.u32 2147483648, %v4728_v10  ;;  %v946_v23 = vmul.f32 0.5, %v944_v60 }
 0xd2d   : > { %3520 = vrcp.f32 %v4800_v62  ;;  %v1055_v32 = vmul.f32 %v3519_v2, %v1054_v34  ;;  %vm1058_vm9 = vweird.f32 %v3519_v2  ;;  %vm1057_vm10 = vweird.f32 %v4728_v10 }
 0xd2e   : > { %v929_v6 = vmul.f32 0.5, %v927_v53  ;;  %v1104_v16 = vsel %vm1103_vm6, %v3517_v20, %v1100_v43  ;;  %vm4813_vm11 = vcmp.eq.f32.partialorder %v1061_v33, 8.507059e+37  ;;  %3128 = vst [vmem:[%s4524_s20 + $0x10] sm:$0xff] %v946_v23  ;;  %v1367_v52 = vsub.f32 %v1363_v30, %v4803_v59  ;;  %v1237_v53 = vpop.xlane.xlu1 %1236  ;;  %vm1059_vm12 = vmor %vm1057_vm10, %vm1058_vm9 }
 0xd2f   : > { %v1109_v4 = vsel %vm4794_vm8, %v1108_v26, %v1104_v16  ;;  %v815_v31 = vmul.f32 %v811_v39, %v4735_v42  ;;  %v1056_v60 = vadd.f32 %v3519_v2, %v1055_v32  ;;  %v1064_v47 = vor.u32 1.1754944e-38, %v1063_v9 }
 0xd30   : > { %v4820_v7 = vadd.f32 %v929_v6, %v4731_v56  ;;  %v1111_v20 = vmul.f32 %v1109_v4, %v1077_v21  ;;  %v810_v16 = vsub.f32 1.0, %v3116_v46  ;;  %v4823_v43 = vadd.f32 1e-12, %v1367_v52 }
 0xd31   : > { %v2755_v10 = vsel %vm4777_vm15, %v4724_v19, %v2750_v22  ;;  %v1060_v33 = vsel %vm1059_vm12, %v3519_v2, %v1056_v60  ;;  %v938_v56 = vsub.f32 1.0, %v4787_v48  ;;  %v1239_v51 = vsub.f32 %v1237_v53, %v4737_v41 }
 0xd32   : > { %vm933_vm13 = vcmp.ge.f32.partialorder %v4820_v7, 0.5  ;;  %v1119_v30 = vsub.f32 %v1111_v20, %v815_v31  ;;  %v4830_v34 = vpop.xlane.xlu0 %1402  ;;  %v1065_v21 = vsel %vm4813_vm11, %v1064_v47, %v1060_v33  ;;  %3522 = vrcp.f32 %v4823_v43 }
 0xd33   : > { %v3521_v42 = vpop.eup %3520  ;;  %v4833_v32 = vsel %vm933_vm13, 1.0, %v3751_v49  ;;  %v5380_v48 = vsub.f32 %v4537_v11, %v4571_v61  ;;  %v1216_v39 = vsub.f32 %v4183_v0, %v4766_v50  ;;  %v814_v26 = vmul.f32 %v810_v16, %v4745_v45 }
 0xd34   : > { %v945_v19 = vadd.f32 %v4833_v32, %v3117_v17  ;;  %v1123_v22 = vmul.f32 0.5, %v1119_v30  ;;  %v1220_v2 = vmul.f32 %v3521_v42, %v4800_v62  ;;  %v5381_v9 = vsub.f32 %v4265_v5, %v4634_v44 }
 0xd35   : > { %v2770_v46 = vmul.f32 %v2755_v10, %v5380_v48  ;;  %v1365_v17 = vsub.f32 %v4344_v12, %v4803_v59  ;;  %v1228_v52 = vand.u32 2147483647, %v4800_v62  ;;  %v940_v11 = vmul.f32 %v938_v56, %v4756_v24 }
 0xd36   : > { %v1067_v23 = vmul.f32 %v1065_v21, %v5381_v9  ;;  %v947_v6 = vmul.f32 0.5, %v945_v19  ;;  %v1127_v4 = vadd.f32 %v1123_v22, %v815_v31  ;;  %v1221_v38 = vsub.f32 1.0, %v1220_v2 }
 0xd37   : > { %v1230_v61 = vand.u32 2147483648, %v4800_v62  ;;  %v4855_v0 = vadd.f32 1e-12, %v1239_v51  ;;  %vm1225_vm15 = vweird.f32 %v3521_v42  ;;  %v2777_v5 = vsub.f32 %v2770_v46, %v4450_v29 }
 0xd38   : > { %v1118_v20 = vsub.f32 %v1067_v23, %v814_v26  ;;  %3129 = vst [vmem:[%s4524_s20 + $0x18] sm:$0xff] %v947_v6  ;;  %vm1131_vm14 = vcmp.ge.f32.partialorder %v1127_v4, 0.5  ;;  %v1222_v45 = vmul.f32 %v3521_v42, %v1221_v38  ;;  %v3523_v44 = vpop.eup %3522  ;;  %vm1224_vm7 = vweird.f32 %v4800_v62 }
 0xd39   : > { %v4860_v50 = vsel %vm1131_vm14, 1.0, %v3751_v49  ;;  %3524 = vrcp.f32 %v4855_v0  ;;  %vm1229_vm8 = vcmp.eq.f32.partialorder %v1228_v52, 8.507059e+37  ;;  %v1385_v53 = vmul.f32 %v3523_v44, %v4823_v43  ;;  %vm1226_vm6 = vmor %vm1224_vm7, %vm1225_vm15 }
 0xd3a   : > { %v1122_v31 = vmul.f32 0.5, %v1118_v20  ;;  %v1143_v24 = vsub.f32 1.0, %v4860_v50  ;;  %v1223_v60 = vadd.f32 %v3521_v42, %v1222_v45  ;;  %v1231_v47 = vor.u32 1.1754944e-38, %v1230_v61  ;;  %v1407_v51 = vpop.xlane.xlu0 %1406 }
 0xd3b   : > { %v1393_v10 = vand.u32 2147483647, %v4823_v43  ;;  %v2781_v30 = vmul.f32 0.5, %v2777_v5  ;;  %v1386_v21 = vsub.f32 1.0, %v1385_v53  ;;  %v1395_v62 = vand.u32 2147483648, %v4823_v43 }
 0xd3c   : > { %v1126_v16 = vadd.f32 %v1122_v31, %v814_v26  ;;  %v4867_v33 = vmul.f32 %v1143_v24, %v1127_v4  ;;  %v1227_v56 = vsel %vm1226_vm6, %v3521_v42, %v1223_v60  ;;  %vm1390_vm10 = vweird.f32 %v3523_v44 }
 0xd3d   : > { %v1232_v19 = vsel %vm1229_vm8, %v1231_v47, %v1227_v56  ;;  %vm2788_vm11 = vcmp.ge.f32.partialorder %v4714_v40, 0.5  ;;  %v1387_v48 = vmul.f32 %v3523_v44, %v1386_v21  ;;  %v4873_v46 = vadd.f32 %v2781_v30, %v4450_v29 }
 0xd3e   : > { %vm1130_vm9 = vcmp.ge.f32.partialorder %v1126_v16, 0.5  ;;  %v1233_v22 = vmul.f32 %v1232_v19, %v1216_v39  ;;  %vm1389_vm12 = vweird.f32 %v4823_v43  ;;  %vm1394_vm13 = vcmp.eq.f32.partialorder %v1393_v10, 8.507059e+37 }
 0xd3f   : > { %v3142_v2 = vsel %vm1130_vm9, 1.0, %v3751_v49  ;;  %v3525_v26 = vpop.eup %3524  ;;  %v1411_v42 = vsub.f32 %v1407_v51, %v4830_v34  ;;  %v1388_v6 = vadd.f32 %v3523_v44, %v1387_v48  ;;  %v1396_v4 = vor.u32 1.1754944e-38, %v1395_v62  ;;  %vm1391_vm14 = vmor %vm1389_vm12, %vm1390_vm10 }
 0xd40   : > { %v1142_v9 = vsub.f32 1.0, %v3142_v2  ;;  %v1258_v23 = vsub.f32 %v1233_v22, %v940_v11  ;;  %v1242_v38 = vmul.f32 %v3525_v26, %v4855_v0  ;;  %vm2789_vm15 = vcmp.ge.f32.partialorder %v4873_v46, 0.5 }
 0xd41   : > { %v3270_v29 = vsel %vm2788_vm11, 1.0, %v3751_v49  ;;  %v1413_v39 = vadd.f32 1e-12, %v1411_v42  ;;  %v1392_v43 = vsel %vm1391_vm14, %v3523_v44, %v1388_v6  ;;  %v3271_v45 = vsel %vm2789_vm15, 1.0, %v3751_v49 }
 0xd42   : > { %v1146_v52 = vmul.f32 %v1142_v9, %v1126_v16  ;;  %v1260_v61 = vmul.f32 0.5, %v1258_v23  ;;  %v1243_v20 = vsub.f32 1.0, %v1242_v38  ;;  %v1397_v5 = vsel %vm1394_vm13, %v1396_v4, %v1392_v43 }
 0xd43   : > { %v3463_v31 = vpack.i.bf16 %v3271_v45, %v3270_v29  ;;  %3526 = vrcp.f32 %v1413_v39  ;;  %v1399_v60 = vmul.f32 %v1397_v5, %v1365_v17  ;;  %vm1247_vm7 = vweird.f32 %v3525_v26 }
 0xd44   : > { %v1262_v24 = vadd.f32 %v1260_v61, %v940_v11  ;;  %v1244_v53 = vmul.f32 %v3525_v26, %v1243_v20  ;;  %v1250_v47 = vand.u32 2147483647, %v4855_v0  ;;  %v1252_v16 = vand.u32 2147483648, %v4855_v0 }
 0xd45   : > { %3464 = vrot.lane.b32.xlu2 %v3463_v31, %s3749_s1  ;;  %3459 = vrot.lane.b32.xlu1 %v3463_v31, %s3750_s27  ;;  %v1450_v44 = vsub.f32 %v1399_v60, %v1146_v52  ;;  %vm1246_vm6 = vweird.f32 %v4855_v0  ;;  %v939_v11 = vsub.f32 1.0, %v4833_v32  ;;  %v1238_v62 = vsub.f32 %v4185_v1, %v4737_v41 }
 0xd46   : > { %vm1264_vm8 = vcmp.ge.f32.partialorder %v1262_v24, 0.5  ;;  %v1245_v10 = vadd.f32 %v3525_v26, %v1244_v53  ;;  %vm1248_vm9 = vmor %vm1246_vm6, %vm1247_vm7  ;;  %vm1251_vm10 = vcmp.eq.f32.partialorder %v1250_v47, 8.507059e+37  ;;  %v1253_v51 = vor.u32 1.1754944e-38, %v1252_v16  ;;  %v4935_v47 = vpop.f32.mrf.mxu0 }
 0xd47   : > { %v3152_v12 = vsel %vm1264_vm8, 1.0, %v3751_v49  ;;  %v1454_v30 = vmul.f32 0.5, %v1450_v44  ;;  %v941_v9 = vmul.f32 %v939_v11, %v4820_v7  ;;  %v1439_v4 = vand.u32 2147483648, %v1413_v39 }
 0xd48   : > { %v1270_v59 = vsub.f32 1.0, %v3152_v12  ;;  %v1276_v17 = vadd.f32 %v3152_v12, %v3142_v2  ;;  %v1249_v56 = vsel %vm1248_vm9, %v3525_v26, %v1245_v10  ;;  %vm1433_vm13 = vweird.f32 %v1413_v39 }
 0xd49   : > { %v3527_v21 = vpop.eup %3526  ;;  %v4900_v0 = vadd.f32 %v1454_v30, %v1146_v52  ;;  %v1254_v48 = vsel %vm1251_vm10, %v1253_v51, %v1249_v56  ;;  %v1437_v41 = vand.u32 2147483647, %v1413_v39  ;;  %v1440_v29 = vor.u32 1.1754944e-38, %v1439_v4 }
 0xd4a   : > { %v4898_v19 = vmul.f32 %v1270_v59, %v1262_v24  ;;  %v1278_v22 = vmul.f32 0.5, %v1276_v17  ;;  %v1429_v32 = vmul.f32 %v3527_v21, %v1413_v39  ;;  %v1255_v2 = vmul.f32 %v1254_v48, %v1238_v62 }
 0xd4b   : > { %vm1434_vm12 = vweird.f32 %v3527_v21  ;;  %vm1438_vm8 = vcmp.eq.f32.partialorder %v1437_v41, 8.507059e+37  ;;  %v1409_v45 = vsub.f32 %v4346_v37, %v4830_v34  ;;  %v4921_v37 = vpop.f32.mrf.mxu2  ;;  %v4926_v34 = vpop.f32.mrf.mxu3 }
 0xd4c   : > { %3154 = vst [vmem:[%s4524_s20 + $0x20] sm:$0xff] %v1278_v22  ;;  %v1430_v42 = vsub.f32 1.0, %v1429_v32  ;;  %v1259_v26 = vsub.f32 %v1255_v2, %v941_v9  ;;  %vm1435_vm14 = vmor %vm1433_vm13, %vm1434_vm12  ;;  %2686 = vmin.xlane.f32.xlu0 %v4921_v37 }
 0xd4e   : > { %v1431_v23 = vmul.f32 %v3527_v21, %v1430_v42  ;;  %v1261_v1 = vmul.f32 0.5, %v1259_v26  ;;  %v2812_v42 = vld [vmem:[#allocation9] sm:$0xff] }
 0xd50   : > { %v1432_v6 = vadd.f32 %v3527_v21, %v1431_v23  ;;  %v1263_v38 = vadd.f32 %v1261_v1, %v941_v9  ;;  %v5382_v9 = vmov 1.0  }
 0xd52   : > { %v1436_v52 = vsel %vm1435_vm14, %v3527_v21, %v1432_v6  ;;  %vm1265_vm7 = vcmp.ge.f32.partialorder %v1263_v38, 0.5 }
 0xd53   : > { %v3153_v7 = vsel %vm1265_vm7, 1.0, %v3751_v49  ;;  %v1441_v61 = vsel %vm1438_vm8, %v1440_v29, %v1436_v52 }
 0xd54   : > { %v1271_v43 = vsub.f32 1.0, %v3153_v7  ;;  %v1277_v20 = vadd.f32 %v3153_v7, %v4860_v50  ;;  %v1443_v24 = vmul.f32 %v1441_v61, %v1409_v45  ;;  %v4928_v50 = vpop.xlane.xlu0 %1544  ;;  %2734 = vmax.xlane.f32.xlu0 %v4926_v34 }
 0xd56   : > { %v4908_v5 = vmul.f32 %v1271_v43, %v1263_v38  ;;  %v1279_v31 = vmul.f32 0.5, %v1277_v20  ;;  %v1451_v39 = vsub.f32 %v1443_v24, %v4867_v33 }
 0xd58   : > { %3155 = vst [vmem:[%s4524_s20 + $0x28] sm:$0xff] %v1279_v31  ;;  %v1455_v60 = vmul.f32 0.5, %v1451_v39 }
 0xd5a   : > { %v4913_v53 = vadd.f32 %v1455_v60, %v4867_v33 }
 0xd5c   : > { %v4933_v33 = vpop.xlane.xlu0 %1568  ;;  %vm1463_vm9 = vcmp.ge.f32.partialorder %v4913_v53, 0.5 }
 0xd64   : > { %v4939_v16 = vpop.xlane.xlu0 %1690 }
 0xd65   : > { %v1697_v39 = vsub.f32 %v4423_v54, %v4939_v16 }
 0xd6c   : > { %v1695_v44 = vpop.xlane.xlu0 %1694 }
 0xd6d   : > { %v1699_v30 = vsub.f32 %v1695_v44, %v4939_v16 }
 0xd6e   : > { %1546 = vmax.xlane.f32.xlu2 %v4269_v35 }
 0xd6f   : > { %1566 = vmin.xlane.f32.xlu1 %v4271_v36  ;;  %v1701_v32 = vadd.f32 1e-12, %v1699_v30 }
 0xd71   : > { %3528 = vrcp.f32 %v1701_v32  ;;  %v1727_v52 = vand.u32 2147483648, %v1701_v32  ;;  %v1725_v13 = vand.u32 2147483647, %v1701_v32 }
 0xd73   : > { %v1728_v43 = vor.u32 1.1754944e-38, %v1727_v52 }
 0xd74   : > { %v4947_v10 = vpop.xlane.xlu0 %1734 }
 0xd76   : > { %1876 = vmin.xlane.f32.xlu2 %v4348_v58 }
 0xd77   : > { %1878 = vmax.xlane.f32.xlu1 %v4348_v58  ;;  %v3529_v40 = vpop.eup %3528 }
 0xd78   : > { %v1717_v46 = vmul.f32 %v3529_v40, %v1701_v32 }
 0xd7a   : > { %v1718_v6 = vsub.f32 1.0, %v1717_v46 }
 0xd7c   : > { %v1739_v56 = vpop.xlane.xlu0 %1738  ;;  %v1719_v1 = vmul.f32 %v3529_v40, %v1718_v6 }
 0xd7d   : > { %v1743_v48 = vsub.f32 %v1739_v56, %v4947_v10  ;;  %v1741_v56 = vsub.f32 %v4425_v55, %v4947_v10 }
 0xd7e   : > { %1900 = vmax.xlane.f32.xlu2 %v4350_v15  ;;  %v1720_v38 = vadd.f32 %v3529_v40, %v1719_v1 }
 0xd7f   : > { %2022 = vmin.xlane.f32.xlu1 %v4527_v27  ;;  %v1745_v8 = vadd.f32 1e-12, %v1743_v48 }
 0xd81   : > { %3530 = vrcp.f32 %v1745_v8  ;;  %v1771_v20 = vand.u32 2147483648, %v1745_v8  ;;  %vm1765_vm6 = vweird.f32 %v1745_v8  ;;  %v1769_v45 = vand.u32 2147483647, %v1745_v8 }
 0xd83   : > { %v1772_v44 = vor.u32 1.1754944e-38, %v1771_v20  ;;  %vm1770_vm12 = vcmp.eq.f32.partialorder %v1769_v45, 8.507059e+37 }
 0xd86   : > { %2066 = vmin.xlane.f32.xlu2 %v4529_v25 }
 0xd87   : > { %2070 = vmax.xlane.f32.xlu1 %v4529_v25  ;;  %v3531_v26 = vpop.eup %3530 }
 0xd88   : > { %v1761_v4 = vmul.f32 %v3531_v26, %v1745_v8 }
 0xd8a   : > { %v1762_v41 = vsub.f32 1.0, %v1761_v4 }
 0xd8c   : > { %v1763_v3 = vmul.f32 %v3531_v26, %v1762_v41 }
 0xd8e   : > { %2210 = vmax.xlane.f32.xlu2 %v4427_v57  ;;  %v1764_v7 = vadd.f32 %v3531_v26, %v1763_v3 }
 0xd8f   : > { %2230 = vmin.xlane.f32.xlu1 %v4429_v28 }
 0xd96   : > { %2354 = vmin.xlane.f32.xlu2 %v4935_v47 }
 0xd97   : > { %2358 = vmax.xlane.f32.xlu1 %v4935_v47 }
 0xd9e   : > { %2402 = vmax.xlane.f32.xlu2 %v4700_v63 }
 0xd9f   : > { %2540 = vmin.xlane.f32.xlu1 %v4531_v18  ;;  %v3465_v11 = vpop.permute.xlu2 %3464 }
 0xda0   : > { %v3467_v21 = vunpack.i.h.bf16 %v3465_v11  ;;  %v3466_v62 = vunpack.i.l.bf16 %v3465_v11  ;;  %v4984_v11 = vsel %vm1463_vm9, 1.0, %v3751_v49 }
 0xda2   : > { %v2818_v2 = vsel %vm292_vm3, %v3467_v21, %v3466_v62  ;;  %v2817_v23 = vsel %vm292_vm3, %v3466_v62, %v3467_v21  ;;  %vm1462_vm3 = vcmp.ge.f32.partialorder %v4900_v0, 0.5  ;;  %v1475_v62 = vsub.f32 1.0, %v4984_v11 }
 0xda3   : > { %v4977_v61 = vsel %vm1462_vm3, 1.0, %v3751_v49 }
 0xda4   : > { %v1474_v24 = vsub.f32 1.0, %v4977_v61 }
 0xda6   : > { %2562 = vmin.xlane.f32.xlu2 %v4533_v14  ;;  %v1478_v30 = vmul.f32 %v1474_v24, %v4900_v0  ;;  %v4996_v0 = vpop.xlane.xlu0 %1898 }
 0xda7   : > { %2564 = vmax.xlane.f32.xlu1 %v4533_v14 }
 0xdae   : > { %2690 = vmax.xlane.f32.xlu2 %v4921_v37  ;;  %v2027_v52 = vpop.xlane.xlu0 %2026 }
 0xdaf   : > { %2730 = vmin.xlane.f32.xlu1 %v4926_v34 }
 0xdb7   : > { %v3460_v12 = vpop.permute.xlu1 %3459 }
 0xdb8   : > { %v3462_v59 = vunpack.i.h.bf16 %v3460_v12  ;;  %v3461_v17 = vunpack.i.l.bf16 %v3460_v12 }
 0xdba   : > { %v2825_v51 = vsel %vm301_vm0, %v3461_v17, %v3462_v59  ;;  %v2826_v22 = vsel %vm301_vm0, %v3462_v59, %v3461_v17  ;;  %vm5383_vm0 = vcmask 195584  }
 0xdbb   : > { %3274 = vmatpush.msk.msrb.mxu0 %vm284_vm1, %v2825_v51  ;;  %3278 = vmatpush.msk.msrb.mxu1 %vm3907_vm2, %v2826_v22  ;;  %vm5384_vm1 = vmmov %vm5383_vm0  ;;  %vm1722_vm2 = vweird.f32 %v3529_v40 }
 0xdbd   : > { %3275 = vmatpush.msk.msrb.mxu0 %vm2788_vm11, %v5382_v9  ;;  %3279 = vmatpush.msk.msrb.mxu1 %vm2789_vm15, %v5382_v9  ;;  %vm1766_vm11 = vweird.f32 %v3531_v26  ;;  %vm1726_vm15 = vcmp.eq.f32.partialorder %v1725_v13, 8.507059e+37  ;;  %v1479_v9 = vmul.f32 %v1475_v62, %v4913_v53  ;;  %v1548_v53 = vsub.f32 %v4269_v35, %v4928_v50 }
 0xdbe   : > { %vm1767_vm10 = vmor %vm1765_vm6, %vm1766_vm11 }
 0xdbf   : > { %3276 = vmatpush.msk.msrb.mxu0 %vm282_vm4, %v2818_v2  ;;  %3280 = vmatpush.msk.msrb.mxu1 %vm3921_vm5, %v2817_v23  ;;  %vm1721_vm4 = vweird.f32 %v1701_v32  ;;  %v1768_v60 = vsel %vm1767_vm10, %v3531_v26, %v1764_v7 }
 0xdc0   : > { %3277 = vmatmul.msk.f32.vlgmr.msrb.gmra.mxu0 %vm5383_vm0, %v2812_v42  ;;  %3281 = vmatmul.msk.f32.vlgmr.msrb.gmra.mxu1 %vm5384_vm1, %v2812_v42  ;;  %vm1723_vm5 = vmor %vm1721_vm4, %vm1722_vm2  ;;  %v1773_v59 = vsel %vm1770_vm12, %v1772_v44, %v1768_v60 }
 0xdc1   : > { %v1724_v29 = vsel %vm1723_vm5, %v3529_v40, %v1720_v38  ;;  %v1775_v16 = vmul.f32 %v1773_v59, %v1741_v56 }
 0xdc2   : > { %v1729_v31 = vsel %vm1726_vm15, %v1728_v43, %v1724_v29 }
 0xdc3   : > { %v1731_v12 = vmul.f32 %v1729_v31, %v1697_v39  ;;  %v1783_v10 = vsub.f32 %v1775_v16, %v1479_v9 }
 0xdc5   : > { %v1782_v32 = vsub.f32 %v1731_v12, %v1478_v30 }
 0xdc7   : > { %v1786_v55 = vmul.f32 0.5, %v1782_v32 }
 0xdc9   : > { %v5001_v40 = vadd.f32 %v1786_v55, %v1478_v30 }
 0xdcb   : > { %vm1794_vm13 = vcmp.ge.f32.partialorder %v5001_v40, 0.5 }
 0xdcc   : > { %v5027_v32 = vsel %vm1794_vm13, 1.0, %v3751_v49 }
 0xde1   : > { %v1547_v17 = vpop.xlane.xlu2 %1546 }
 0xde2   : > { %v1549_v21 = vsub.f32 %v1547_v17, %v4928_v50  ;;  %v4991_v51 = vpop.xlane.xlu1 %1566 }
 0xde3   : > { %v1571_v54 = vsub.f32 %v4933_v33, %v4991_v51  ;;  %v1787_v33 = vmul.f32 0.5, %v1783_v10  ;;  %v1570_v24 = vsub.f32 %v4271_v36, %v4991_v51 }
 0xde4   : > { %v1550_v22 = vadd.f32 1e-12, %v1549_v21 }
 0xde5   : > { %v1572_v48 = vadd.f32 1e-12, %v1571_v54  ;;  %v5009_v3 = vadd.f32 %v1787_v33, %v1479_v9 }
 0xde6   : > { %3532 = vrcp.f32 %v1550_v22  ;;  %v1562_v41 = vand.u32 2147483648, %v1550_v22  ;;  %v1560_v29 = vand.u32 2147483647, %v1550_v22  ;;  %vm1556_vm8 = vweird.f32 %v1550_v22 }
 0xde7   : > { %3534 = vrcp.f32 %v1572_v48  ;;  %v1584_v7 = vand.u32 2147483648, %v1572_v48  ;;  %v1582_v45 = vand.u32 2147483647, %v1572_v48  ;;  %vm1578_vm1 = vweird.f32 %v1572_v48 }
 0xde8   : > { %v1563_v60 = vor.u32 1.1754944e-38, %v1562_v41  ;;  %vm1561_vm2 = vcmp.eq.f32.partialorder %v1560_v29, 8.507059e+37  ;;  %vm1795_vm5 = vcmp.ge.f32.partialorder %v5009_v3, 0.5 }
 0xde9   : > { %v4998_v42 = vpop.xlane.xlu2 %1876  ;;  %v1585_v30 = vor.u32 1.1754944e-38, %v1584_v7  ;;  %vm1583_vm4 = vcmp.eq.f32.partialorder %v1582_v45, 8.507059e+37 }
 0xdea   : > { %v1879_v2 = vpop.xlane.xlu1 %1878 }
 0xdeb   : > { %v1881_v23 = vsub.f32 %v1879_v2, %v4998_v42  ;;  %v1902_v2 = vsub.f32 %v4350_v15, %v4996_v0 }
 0xdec   : > { %v3533_v8 = vpop.eup %3532 }
 0xded   : > { %v3535_v46 = vpop.eup %3534  ;;  %v1552_v26 = vmul.f32 %v3533_v8, %v1550_v22  ;;  %v5003_v6 = vadd.f32 1e-12, %v1881_v23  ;;  %vm1557_vm14 = vweird.f32 %v3533_v8 }
 0xdee   : > { %v1574_v4 = vmul.f32 %v3535_v46, %v1572_v48  ;;  %vm1579_vm7 = vweird.f32 %v3535_v46  ;;  %vm1558_vm0 = vmor %vm1556_vm8, %vm1557_vm14 }
 0xdef   : > { %v1553_v1 = vsub.f32 1.0, %v1552_v26  ;;  %3536 = vrcp.f32 %v5003_v6  ;;  %vm1580_vm3 = vmor %vm1578_vm1, %vm1579_vm7  ;;  %v1892_v9 = vand.u32 2147483647, %v5003_v6  ;;  %v1894_v55 = vand.u32 2147483648, %v5003_v6 }
 0xdf0   : > { %v1575_v38 = vsub.f32 1.0, %v1574_v4  ;;  %v1880_v4 = vsub.f32 %v4348_v58, %v4998_v42  ;;  %vm1888_vm15 = vweird.f32 %v5003_v6 }
 0xdf1   : > { %v1554_v13 = vmul.f32 %v3533_v8, %v1553_v1  ;;  %v1901_v43 = vpop.xlane.xlu2 %1900  ;;  %v5045_v1 = vsel %vm1795_vm5, 1.0, %v3751_v49  ;;  %vm1893_vm9 = vcmp.eq.f32.partialorder %v1892_v9, 8.507059e+37  ;;  %v1895_v29 = vor.u32 1.1754944e-38, %v1894_v55 }
 0xdf2   : > { %v1576_v20 = vmul.f32 %v3535_v46, %v1575_v38  ;;  %v1903_v35 = vsub.f32 %v1901_v43, %v4996_v0  ;;  %v5012_v50 = vpop.xlane.xlu1 %2022  ;;  %v1807_v0 = vsub.f32 1.0, %v5045_v1 }
 0xdf3   : > { %v1555_v31 = vadd.f32 %v3533_v8, %v1554_v13  ;;  %v2031_v39 = vsub.f32 %v2027_v52, %v5012_v50  ;;  %v2029_v58 = vsub.f32 %v4527_v27, %v5012_v50 }
 0xdf4   : > { %v1577_v44 = vadd.f32 %v3535_v46, %v1576_v20  ;;  %v5017_v12 = vadd.f32 1e-12, %v1903_v35 }
 0xdf5   : > { %v3537_v59 = vpop.eup %3536  ;;  %v1559_v17 = vsel %vm1558_vm0, %v3533_v8, %v1555_v31  ;;  %v5020_v56 = vadd.f32 1e-12, %v2031_v39 }
 0xdf6   : > { %v1564_v21 = vsel %vm1561_vm2, %v1563_v60, %v1559_v17  ;;  %v1581_v62 = vsel %vm1580_vm3, %v3535_v46, %v1577_v44  ;;  %v1884_v36 = vmul.f32 %v3537_v59, %v5003_v6  ;;  %3538 = vrcp.f32 %v5017_v12  ;;  %v5039_v46 = vpop.xlane.xlu0 %2208 }
 0xdf7   : > { %v1565_v51 = vmul.f32 %v1564_v21, %v1548_v53  ;;  %v1586_v54 = vsel %vm1583_vm4, %v1585_v30, %v1581_v62  ;;  %3540 = vrcp.f32 %v5020_v56  ;;  %vm1889_vm11 = vweird.f32 %v3537_v59 }
 0xdf8   : > { %v1587_v16 = vmul.f32 %v1586_v54, %v1570_v24  ;;  %v1885_v22 = vsub.f32 1.0, %v1884_v36  ;;  %v1806_v53 = vsub.f32 1.0, %v5027_v32  ;;  %vm1890_vm6 = vmor %vm1888_vm15, %vm1889_vm11  ;;  %vm1910_vm10 = vweird.f32 %v5017_v12 }
 0xdf9   : > { %v1590_v48 = vsub.f32 %v1565_v51, %v4898_v19  ;;  %v5034_v10 = vpop.xlane.xlu2 %2066  ;;  %v1914_v35 = vand.u32 2147483647, %v5017_v12  ;;  %v2059_v9 = vand.u32 2147483648, %v5020_v56  ;;  %vm2053_vm1 = vweird.f32 %v5020_v56 }
 0xdfa   : > { %v1591_v23 = vsub.f32 %v1587_v16, %v4908_v5  ;;  %v1886_v8 = vmul.f32 %v3537_v59, %v1885_v22  ;;  %v2071_v33 = vpop.xlane.xlu1 %2070 }
 0xdfb   : > { %v1592_v26 = vmul.f32 0.5, %v1590_v48  ;;  %v2075_v52 = vsub.f32 %v2071_v33, %v5034_v10  ;;  %vm1915_vm0 = vcmp.eq.f32.partialorder %v1914_v35, 8.507059e+37 }
 0xdfc   : > { %v1593_v41 = vmul.f32 0.5, %v1591_v23  ;;  %v1887_v38 = vadd.f32 %v3537_v59, %v1886_v8  ;;  %v3539_v13 = vpop.eup %3538 }
 0xdfd   : > { %v1594_v7 = vadd.f32 %v1592_v26, %v4898_v19  ;;  %v1906_v20 = vmul.f32 %v3539_v13, %v5017_v12  ;;  %v3541_v45 = vpop.eup %3540  ;;  %v5056_v31 = vadd.f32 1e-12, %v2075_v52  ;;  %v1916_v19 = vand.u32 2147483648, %v5017_v12 }
 0xdfe   : > { %v1595_v42 = vadd.f32 %v1593_v41, %v4908_v5  ;;  %v1891_v43 = vsel %vm1890_vm6, %v3537_v59, %v1887_v38  ;;  %v2049_v59 = vmul.f32 %v3541_v45, %v5020_v56  ;;  %vm1911_vm14 = vweird.f32 %v3539_v13  ;;  %v2233_v55 = vpop.xlane.xlu0 %2232 }
 0xdff   : > { %v1896_v6 = vsel %vm1893_vm9, %v1895_v29, %v1891_v43  ;;  %vm1596_vm12 = vcmp.ge.f32.partialorder %v1594_v7, 0.5  ;;  %v1907_v24 = vsub.f32 1.0, %v1906_v20  ;;  %3542 = vrcp.f32 %v5056_v31  ;;  %vm5071_vm7 = vmor %vm1910_vm10, %vm1911_vm14 }
 0xe00   : > { %vm1597_vm13 = vcmp.ge.f32.partialorder %v1595_v42, 0.5  ;;  %v3178_v39 = vsel %vm1596_vm12, 1.0, %v3751_v49  ;;  %v1897_v21 = vmul.f32 %v1896_v6, %v1880_v4  ;;  %v2050_v16 = vsub.f32 1.0, %v2049_v59 }
 0xe01   : > { %v3179_v5 = vsel %vm1597_vm13, 1.0, %v3751_v49  ;;  %v1602_v60 = vsub.f32 1.0, %v3178_v39  ;;  %v1608_v44 = vadd.f32 %v3178_v39, %v4977_v61  ;;  %v2211_v17 = vpop.xlane.xlu2 %2210  ;;  %v1908_v62 = vmul.f32 %v3539_v13, %v1907_v24 }
 0xe02   : > { %v1609_v30 = vadd.f32 %v3179_v5, %v4984_v11  ;;  %v5064_v36 = vpop.xlane.xlu1 %2230  ;;  %v2057_v61 = vand.u32 2147483647, %v5020_v56  ;;  %v1917_v23 = vor.u32 1.1754944e-38, %v1916_v19  ;;  %v2051_v33 = vmul.f32 %v3541_v45, %v2050_v16 }
 0xe03   : > { %v1604_v51 = vmul.f32 %v1602_v60, %v1594_v7  ;;  %v1610_v54 = vmul.f32 0.5, %v1608_v44  ;;  %v1909_v48 = vadd.f32 %v3539_v13, %v1908_v62  ;;  %vm2054_vm8 = vweird.f32 %v3541_v45 }
 0xe04   : > { %v1611_v22 = vmul.f32 0.5, %v1609_v30  ;;  %v1603_v26 = vsub.f32 1.0, %v3179_v5  ;;  %v2213_v41 = vsub.f32 %v2211_v17, %v5039_v46  ;;  %v2235_v38 = vsub.f32 %v2233_v55, %v5064_v36  ;;  %vm2055_vm2 = vmor %vm2053_vm1, %vm2054_vm8 }
 0xe05   : > { %3180 = vst [vmem:[%s4524_s20 + $0x30] sm:$0xff] %v1610_v54  ;;  %v1922_v8 = vsub.f32 %v1897_v21, %v1604_v51  ;;  %v1913_v4 = vsel %vm5071_vm7, %v3539_v13, %v1909_v48  ;;  %v2052_v52 = vadd.f32 %v3541_v45, %v2051_v33  ;;  %vm2058_vm3 = vcmp.eq.f32.partialorder %v2057_v61, 8.507059e+37  ;;  %v3543_v20 = vpop.eup %3542 }
 0xe06   : > { %3181 = vst [vmem:[%s4524_s20 + $0x38] sm:$0xff] %v1611_v22  ;;  %v2060_v29 = vor.u32 1.1754944e-38, %v2059_v9  ;;  %v5082_v7 = vadd.f32 1e-12, %v2213_v41  ;;  %v1918_v43 = vsel %vm1915_vm0, %v1917_v23, %v1913_v4  ;;  %v5089_v19 = vadd.f32 1e-12, %v2235_v38 }
 0xe07   : > { %v1924_v12 = vmul.f32 0.5, %v1922_v8  ;;  %v2056_v24 = vsel %vm2055_vm2, %v3541_v45, %v2052_v52  ;;  %v1919_v13 = vmul.f32 %v1918_v43, %v1902_v2  ;;  %v1605_v39 = vmul.f32 %v1603_v26, %v1595_v42 }
 0xe08   : > { %v2061_v56 = vsel %vm2058_vm3, %v2060_v29, %v2056_v24  ;;  %v2093_v5 = vmul.f32 %v3543_v20, %v5056_v31  ;;  %3544 = vrcp.f32 %v5082_v7  ;;  %v1810_v44 = vmul.f32 %v1806_v53, %v5001_v40 }
 0xe09   : > { %v5084_v6 = vadd.f32 %v1924_v12, %v1604_v51  ;;  %v5091_v35 = vpop.xlane.xlu2 %2354  ;;  %v2063_v15 = vmul.f32 %v2061_v56, %v2029_v58  ;;  %v1923_v45 = vsub.f32 %v1919_v13, %v1605_v39  ;;  %v2103_v30 = vand.u32 2147483648, %v5056_v31  ;;  %v5118_v51 = vpop.xlane.xlu0 %2398 }
 0xe0a   : > { %v2359_v60 = vpop.xlane.xlu1 %2358  ;;  %v2094_v42 = vsub.f32 1.0, %v2093_v5  ;;  %3546 = vrcp.f32 %v5089_v19  ;;  %vm2098_vm5 = vweird.f32 %v3543_v20  ;;  %v2101_v27 = vand.u32 2147483647, %v5056_v31 }
 0xe0b   : > { %vm1928_vm4 = vcmp.ge.f32.partialorder %v5084_v6, 0.5  ;;  %v2114_v17 = vsub.f32 %v2063_v15, %v1810_v44  ;;  %v1925_v50 = vmul.f32 0.5, %v1923_v45  ;;  %v2212_v53 = vsub.f32 %v4427_v57, %v5039_v46 }
 0xe0c   : > { %v5104_v2 = vsel %vm1928_vm4, 1.0, %v3751_v49  ;;  %v2095_v40 = vmul.f32 %v3543_v20, %v2094_v42  ;;  %v2073_v21 = vsub.f32 %v4529_v25, %v5034_v10  ;;  %vm2097_vm11 = vweird.f32 %v5056_v31 }
 0xe0d   : > { %v1940_v59 = vadd.f32 %v5104_v2, %v5027_v32  ;;  %v5116_v32 = vmul.f32 %v1807_v0, %v5009_v3  ;;  %v1927_v16 = vadd.f32 %v1925_v50, %v1605_v39  ;;  %v2363_v22 = vsub.f32 %v2359_v60, %v5091_v35  ;;  %vm2099_vm15 = vmor %vm2097_vm11, %vm2098_vm5 }
 0xe0e   : > { %v3545_v62 = vpop.eup %3544  ;;  %v2096_v54 = vadd.f32 %v3543_v20, %v2095_v40  ;;  %v2118_v48 = vmul.f32 0.5, %v2114_v17  ;;  %v2104_v61 = vor.u32 1.1754944e-38, %v2103_v30  ;;  %v2234_v25 = vsub.f32 %v4429_v28, %v5064_v36 }
 0xe0f   : > { %v1942_v58 = vmul.f32 0.5, %v1940_v59  ;;  %v2216_v9 = vmul.f32 %v3545_v62, %v5082_v7  ;;  %vm2102_vm6 = vcmp.eq.f32.partialorder %v2101_v27, 8.507059e+37  ;;  %vm1929_vm9 = vcmp.ge.f32.partialorder %v1927_v16, 0.5 }
 0xe10   : > { %v2100_v3 = vsel %vm2099_vm15, %v3543_v20, %v2096_v54  ;;  %v5127_v10 = vadd.f32 1e-12, %v2363_v22  ;;  %v3547_v55 = vpop.eup %3546  ;;  %v2224_v23 = vand.u32 2147483647, %v5082_v7  ;;  %v3205_v8 = vsel %vm1929_vm9, 1.0, %v3751_v49 }
 0xe11   : > { %3206 = vst [vmem:[%s4524_s20 + $0x40] sm:$0xff] %v1942_v58  ;;  %v2105_v31 = vsel %vm2102_vm6, %v2104_v61, %v2100_v3  ;;  %v2217_v11 = vsub.f32 1.0, %v2216_v9  ;;  %v2403_v33 = vpop.xlane.xlu2 %2402  ;;  %vm2220_vm10 = vweird.f32 %v5082_v7  ;;  %v2226_v41 = vand.u32 2147483648, %v5082_v7  ;;  %v2543_v45 = vpop.xlane.xlu0 %2542 }
 0xe12   : > { %v5131_v26 = vpop.xlane.xlu1 %2540  ;;  %v2107_v4 = vmul.f32 %v2105_v31, %v2073_v21  ;;  %v1941_v38 = vadd.f32 %v3205_v8, %v5045_v1  ;;  %v5136_v12 = vadd.f32 %v2118_v48, %v1810_v44  ;;  %vm2221_vm12 = vweird.f32 %v3545_v62 }
 0xe13   : > { %v2218_v52 = vmul.f32 %v3545_v62, %v2217_v11  ;;  %v2238_v29 = vmul.f32 %v3547_v55, %v5089_v19  ;;  %v2246_v24 = vand.u32 2147483647, %v5089_v19  ;;  %3548 = vrcp.f32 %v5127_v10  ;;  %vm5149_vm14 = vmor %vm2220_vm10, %vm2221_vm12 }
 0xe14   : > { %v1943_v43 = vmul.f32 0.5, %v1941_v38  ;;  %v2115_v20 = vsub.f32 %v2107_v4, %v5116_v32  ;;  %vm5142_vm13 = vcmp.eq.f32.partialorder %v2224_v23, 8.507059e+37  ;;  %v2248_v56 = vand.u32 2147483648, %v5089_v19 }
 0xe15   : > { %v2219_v13 = vadd.f32 %v3545_v62, %v2218_v52  ;;  %v2239_v1 = vsub.f32 1.0, %v2238_v29  ;;  %v2227_v60 = vor.u32 1.1754944e-38, %v2226_v41  ;;  %v1935_v44 = vsub.f32 1.0, %v3205_v8 }
 0xe16   : > { %3207 = vst [vmem:[%s4524_s20 + $0x48] sm:$0xff] %v1943_v43  ;;  %vm2242_vm7 = vweird.f32 %v5089_v19  ;;  %v2407_v15 = vsub.f32 %v2403_v33, %v5118_v51  ;;  %vm2126_vm8 = vcmp.ge.f32.partialorder %v5136_v12, 0.5  ;;  %vm2243_vm0 = vweird.f32 %v3547_v55 }
 0xe17   : > { %v2223_v0 = vsel %vm5149_vm14, %v3545_v62, %v2219_v13  ;;  %v2240_v42 = vmul.f32 %v3547_v55, %v2239_v1  ;;  %v2119_v7 = vmul.f32 0.5, %v2115_v20  ;;  %vm5159_vm1 = vcmp.eq.f32.partialorder %v2246_v24, 8.507059e+37  ;;  %vm2244_vm2 = vmor %vm2242_vm7, %vm2243_vm0 }
 0xe18   : > { %v5163_v17 = vadd.f32 1e-12, %v2407_v15  ;;  %v1934_v30 = vsub.f32 1.0, %v5104_v2  ;;  %v2249_v27 = vor.u32 1.1754944e-38, %v2248_v56  ;;  %v2228_v50 = vsel %vm5142_vm13, %v2227_v60, %v2223_v0 }
 0xe19   : > { %v2241_v40 = vadd.f32 %v3547_v55, %v2240_v42  ;;  %v2545_v58 = vsub.f32 %v2543_v45, %v5131_v26  ;;  %v3549_v21 = vpop.eup %3548  ;;  %v3220_v62 = vsel %vm2126_vm8, 1.0, %v3751_v49  ;;  %v1937_v54 = vmul.f32 %v1935_v44, %v1927_v16  ;;  %v5177_v9 = vpop.xlane.xlu2 %2562 }
 0xe1a   : > { %vm2385_vm3 = vweird.f32 %v5127_v10  ;;  %3550 = vrcp.f32 %v5163_v17  ;;  %v2381_v2 = vmul.f32 %v3549_v21, %v5127_v10  ;;  %v2389_v48 = vand.u32 2147483647, %v5127_v10  ;;  %v2565_v3 = vpop.xlane.xlu1 %2564 }
 0xe1b   : > { %v2245_v22 = vsel %vm2244_vm2, %v3547_v55, %v2241_v40  ;;  %v2391_v61 = vand.u32 2147483648, %v5127_v10  ;;  %v5180_v31 = vadd.f32 %v2119_v7, %v5116_v32  ;;  %v1936_v16 = vmul.f32 %v1934_v30, %v5084_v6 }
 0xe1c   : > { %v2250_v19 = vsel %vm5159_vm1, %v2249_v27, %v2245_v22  ;;  %v2229_v55 = vmul.f32 %v2228_v50, %v2212_v53  ;;  %v2382_v23 = vsub.f32 1.0, %v2381_v2  ;;  %vm2386_vm4 = vweird.f32 %v3549_v21 }
 0xe1d   : > { %v2251_v11 = vmul.f32 %v2250_v19, %v2234_v25  ;;  %v5191_v8 = vadd.f32 1e-12, %v2545_v58  ;;  %v2405_v32 = vsub.f32 %v4700_v63, %v5118_v51  ;;  %v2567_v4 = vsub.f32 %v2565_v3, %v5177_v9  ;;  %vm5199_vm5 = vmor %vm2385_vm3, %vm2386_vm4 }
 0xe1e   : > { %v2254_v33 = vsub.f32 %v2229_v55, %v1936_v16  ;;  %v2138_v41 = vsub.f32 1.0, %v3220_v62  ;;  %v2383_v38 = vmul.f32 %v3549_v21, %v2382_v23  ;;  %vm5203_vm11 = vcmp.eq.f32.partialorder %v2389_v48, 8.507059e+37 }
 0xe1f   : > { %v2255_v6 = vsub.f32 %v2251_v11, %v1937_v54  ;;  %3552 = vrcp.f32 %v5191_v8  ;;  %v2392_v36 = vor.u32 1.1754944e-38, %v2391_v61  ;;  %v5207_v25 = vadd.f32 1e-12, %v2567_v4 }
 0xe20   : > { %v3551_v57 = vpop.eup %3550  ;;  %v2256_v53 = vmul.f32 0.5, %v2254_v33  ;;  %vm2127_vm15 = vcmp.ge.f32.partialorder %v5180_v31, 0.5  ;;  %v2384_v29 = vadd.f32 %v3549_v21, %v2383_v38  ;;  %vm2429_vm6 = vweird.f32 %v5163_v17 }
 0xe21   : > { %v2257_v52 = vmul.f32 0.5, %v2255_v6  ;;  %v2425_v43 = vmul.f32 %v3551_v57, %v5163_v17  ;;  %v2435_v10 = vand.u32 2147483648, %v5163_v17  ;;  %3554 = vrcp.f32 %v5207_v25 }
 0xe22   : > { %v2258_v20 = vadd.f32 %v2256_v53, %v1936_v16  ;;  %v2388_v13 = vsel %vm5199_vm5, %v3549_v21, %v2384_v29  ;;  %vm2430_vm9 = vweird.f32 %v3551_v57  ;;  %v3221_v1 = vsel %vm2127_vm15, 1.0, %v3751_v49 }
 0xe23   : > { %v5214_v24 = vadd.f32 %v2257_v52, %v1937_v54  ;;  %v2426_v39 = vsub.f32 1.0, %v2425_v43  ;;  %v2361_v56 = vsub.f32 %v4935_v47, %v5091_v35  ;;  %v2433_v5 = vand.u32 2147483647, %v5163_v17  ;;  %vm5230_vm13 = vmor %vm2429_vm6, %vm2430_vm9 }
 0xe24   : > { %vm2260_vm10 = vcmp.ge.f32.partialorder %v2258_v20, 0.5  ;;  %v2558_v0 = vand.u32 2147483648, %v5191_v8  ;;  %v2393_v45 = vsel %vm5203_vm11, %v2392_v36, %v2388_v13  ;;  %v2142_v59 = vmul.f32 %v2138_v41, %v5136_v12 }
 0xe25   : > { %v3553_v60 = vpop.eup %3552  ;;  %vm2261_vm12 = vcmp.ge.f32.partialorder %v5214_v24, 0.5  ;;  %v2427_v44 = vmul.f32 %v3551_v57, %v2426_v39  ;;  %v3230_v15 = vsel %vm2260_vm10, 1.0, %v3751_v49  ;;  %v2436_v27 = vor.u32 1.1754944e-38, %v2435_v10 }
 0xe26   : > { %v3231_v42 = vsel %vm2261_vm12, 1.0, %v3751_v49  ;;  %v2272_v35 = vadd.f32 %v3230_v15, %v3220_v62  ;;  %v2548_v7 = vmul.f32 %v3553_v60, %v5191_v8  ;;  %vm5236_vm14 = vcmp.eq.f32.partialorder %v2433_v5, 8.507059e+37 }
 0xe27   : > { %v2273_v30 = vadd.f32 %v3231_v42, %v3221_v1  ;;  %v2428_v40 = vadd.f32 %v3551_v57, %v2427_v44  ;;  %v3555_v50 = vpop.eup %3554  ;;  %vm2552_vm7 = vweird.f32 %v5191_v8  ;;  %v2395_v22 = vmul.f32 %v2393_v45, %v2361_v56 }
 0xe28   : > { %v2274_v17 = vmul.f32 0.5, %v2272_v35  ;;  %v2549_v21 = vsub.f32 1.0, %v2548_v7  ;;  %v2570_v12 = vmul.f32 %v3555_v50, %v5207_v25  ;;  %vm2553_vm8 = vweird.f32 %v3553_v60 }
 0xe29   : > { %v2275_v54 = vmul.f32 0.5, %v2273_v30  ;;  %v2432_v62 = vsel %vm5230_vm13, %v3551_v57, %v2428_v40  ;;  %v2556_v48 = vand.u32 2147483647, %v5191_v8  ;;  %v2559_v61 = vor.u32 1.1754944e-38, %v2558_v0  ;;  %vm2554_vm0 = vmor %vm2552_vm7, %vm2553_vm8 }
 0xe2a   : > { %3232 = vst [vmem:[%s4524_s20 + $0x50] sm:$0xff] %v2274_v17  ;;  %v2550_v2 = vmul.f32 %v3553_v60, %v2549_v21  ;;  %v2571_v3 = vsub.f32 1.0, %v2570_v12  ;;  %v2578_v19 = vand.u32 2147483647, %v5207_v25  ;;  %v2139_v16 = vsub.f32 1.0, %v3221_v1  ;;  %v2687_v21 = vpop.xlane.xlu0 %2686 }
 0xe2b   : > { %3233 = vst [vmem:[%s4524_s20 + $0x58] sm:$0xff] %v2275_v54  ;;  %v2437_v55 = vsel %vm5236_vm14, %v2436_v27, %v2432_v62  ;;  %v2266_v11 = vsub.f32 1.0, %v3230_v15  ;;  %v2580_v33 = vand.u32 2147483648, %v5207_v25  ;;  %vm2575_vm1 = vweird.f32 %v3555_v50  ;;  %v2691_v54 = vpop.xlane.xlu2 %2690 }
 0xe2c   : > { %v2551_v23 = vadd.f32 %v3553_v60, %v2550_v2  ;;  %v2439_v4 = vmul.f32 %v2437_v55, %v2405_v32  ;;  %v2572_v41 = vmul.f32 %v3555_v50, %v2571_v3  ;;  %v2143_v6 = vmul.f32 %v2139_v16, %v5180_v31  ;;  %v2731_v2 = vpop.xlane.xlu1 %2730 }
 0xe2d   : > { %v2446_v38 = vsub.f32 %v2395_v22, %v2142_v59  ;;  %v2544_v57 = vsub.f32 %v4531_v18, %v5131_v26  ;;  %vm2557_vm2 = vcmp.eq.f32.partialorder %v2556_v48, 8.507059e+37  ;;  %vm2574_vm3 = vweird.f32 %v5207_v25 }
 0xe2e   : > { %v2555_v28 = vsel %vm2554_vm0, %v3553_v60, %v2551_v23  ;;  %v2267_v46 = vsub.f32 1.0, %v3231_v42  ;;  %v2573_v53 = vadd.f32 %v3555_v50, %v2572_v41  ;;  %v2447_v63 = vsub.f32 %v2439_v4, %v2143_v6  ;;  %vm2576_vm4 = vmor %vm2574_vm3, %vm2575_vm1 }
 0xe2f   : > { %v2560_v36 = vsel %vm2557_vm2, %v2559_v61, %v2555_v28  ;;  %v2268_v51 = vmul.f32 %v2266_v11, %v2258_v20  ;;  %v2581_v8 = vor.u32 1.1754944e-38, %v2580_v33  ;;  %v2450_v52 = vmul.f32 0.5, %v2446_v38 }
 0xe30   : > { %v2561_v32 = vmul.f32 %v2560_v36, %v2544_v57  ;;  %v2566_v31 = vsub.f32 %v4533_v14, %v5177_v9  ;;  %v2577_v29 = vsel %vm2576_vm4, %v3555_v50, %v2573_v53  ;;  %vm2579_vm5 = vcmp.eq.f32.partialorder %v2578_v19, 8.507059e+37 }
 0xe31   : > { %v2451_v43 = vmul.f32 0.5, %v2447_v63  ;;  %v2582_v26 = vsel %vm2579_vm5, %v2581_v8, %v2577_v29  ;;  %v2269_v10 = vmul.f32 %v2267_v46, %v5214_v24  ;;  %v2454_v1 = vadd.f32 %v2450_v52, %v2142_v59 }
 0xe32   : > { %v2586_v18 = vsub.f32 %v2561_v32, %v2268_v51  ;;  %v2583_v25 = vmul.f32 %v2582_v26, %v2566_v31  ;;  %v2695_v22 = vsub.f32 %v2691_v54, %v2687_v21  ;;  %v2735_v12 = vpop.xlane.xlu0 %2734 }
 0xe33   : > { %v2455_v13 = vadd.f32 %v2451_v43, %v2143_v6  ;;  %vm2458_vm15 = vcmp.ge.f32.partialorder %v2454_v1, 0.5  ;;  %v2739_v48 = vsub.f32 %v2735_v12, %v2731_v2 }
 0xe34   : > { %v2588_v39 = vmul.f32 0.5, %v2586_v18  ;;  %v2587_v20 = vsub.f32 %v2583_v25, %v2269_v10  ;;  %v3246_v14 = vsel %vm2458_vm15, 1.0, %v3751_v49  ;;  %v2697_v62 = vadd.f32 1e-12, %v2695_v22 }
 0xe35   : > { %vm2459_vm11 = vcmp.ge.f32.partialorder %v2455_v13, 0.5  ;;  %v2470_v0 = vsub.f32 1.0, %v3246_v14  ;;  %v2741_v61 = vadd.f32 1e-12, %v2739_v48 }
 0xe36   : > { %v2590_v56 = vadd.f32 %v2588_v39, %v2268_v51  ;;  %v3247_v5 = vsel %vm2459_vm11, 1.0, %v3751_v49  ;;  %v2589_v44 = vmul.f32 0.5, %v2587_v20  ;;  %3556 = vrcp.f32 %v2697_v62 }
 0xe37   : > { %v2471_v60 = vsub.f32 1.0, %v3247_v5  ;;  %v5275_v7 = vmul.f32 %v2470_v0, %v2454_v1  ;;  %3558 = vrcp.f32 %v2741_v61  ;;  %vm2717_vm10 = vweird.f32 %v2697_v62 }
 0xe38   : > { %vm2592_vm6 = vcmp.ge.f32.partialorder %v2590_v56, 0.5  ;;  %v2591_v15 = vadd.f32 %v2589_v44, %v2269_v10  ;;  %v2723_v4 = vand.u32 2147483648, %v2697_v62  ;;  %v2721_v38 = vand.u32 2147483647, %v2697_v62 }
 0xe39   : > { %v5265_v9 = vmul.f32 %v2471_v60, %v2455_v13  ;;  %v3256_v24 = vsel %vm2592_vm6, 1.0, %v3751_v49  ;;  %v2693_v51 = vsub.f32 %v4921_v37, %v2687_v21  ;;  %vm2761_vm7 = vweird.f32 %v2741_v61 }
 0xe3a   : > { %vm2593_vm9 = vcmp.ge.f32.partialorder %v2591_v15, 0.5  ;;  %v2598_v47 = vsub.f32 1.0, %v3256_v24  ;;  %v2604_v59 = vadd.f32 %v3256_v24, %v3246_v14  ;;  %v2724_v36 = vor.u32 1.1754944e-38, %v2723_v4 }
 0xe3b   : > { %v3257_v35 = vsel %vm2593_vm9, 1.0, %v3751_v49  ;;  %vm2722_vm14 = vcmp.eq.f32.partialorder %v2721_v38, 8.507059e+37  ;;  %v2767_v8 = vand.u32 2147483648, %v2741_v61  ;;  %v2765_v43 = vand.u32 2147483647, %v2741_v61 }
 0xe3c   : > { %v2599_v30 = vsub.f32 1.0, %v3257_v35  ;;  %v2605_v40 = vadd.f32 %v3257_v35, %v3247_v5  ;;  %v5278_v27 = vmul.f32 %v2598_v47, %v2590_v56  ;;  %v2606_v50 = vmul.f32 0.5, %v2604_v59  ;;  %v3557_v3 = vpop.eup %3556 }
 0xe3d   : > { %v5268_v42 = vpop.f32.mrf.mxu0  ;;  %v5270_v45 = vpop.f32.mrf.mxu1  ;;  %v2713_v19 = vmul.f32 %v3557_v3, %v2697_v62  ;;  %vm2718_vm12 = vweird.f32 %v3557_v3  ;;  %v2768_v13 = vor.u32 1.1754944e-38, %v2767_v8  ;;  %vm2766_vm1 = vcmp.eq.f32.partialorder %v2765_v43, 8.507059e+37 }
 0xe3e   : > { %2894 = vmin.xlane.f32.xlu0 %v5270_v45  ;;  %2874 = vmax.xlane.f32.xlu1 %v5268_v42  ;;  %v5280_v58 = vmul.f32 %v2599_v30, %v2591_v15  ;;  %v2607_v17 = vmul.f32 0.5, %v2605_v40  ;;  %3258 = vst [vmem:[%s4524_s20 + $0x60] sm:$0xff] %v2606_v50  ;;  %v3559_v55 = vpop.eup %3558  ;;  %vm2719_vm13 = vmor %vm2717_vm10, %vm2718_vm12  ;;  %v2737_v37 = vsub.f32 %v4926_v34, %v2731_v2 }
 0xe3f   : > { %2872 = vmin.xlane.f32.xlu2 %v5268_v42  ;;  %v2714_v16 = vsub.f32 1.0, %v2713_v19  ;;  %v2757_v23 = vmul.f32 %v3559_v55, %v2741_v61  ;;  %vm2762_vm8 = vweird.f32 %v3559_v55 }
 0xe40   : > { %3259 = vst [vmem:[%s4524_s20 + $0x68] sm:$0xff] %v2607_v17  ;;  %vm2763_vm0 = vmor %vm2761_vm7, %vm2762_vm8 }
 0xe41   : > { %v2715_v11 = vmul.f32 %v3557_v3, %v2714_v16  ;;  %v2758_v57 = vsub.f32 1.0, %v2757_v23 }
 0xe43   : > { %v2716_v6 = vadd.f32 %v3557_v3, %v2715_v11  ;;  %v2759_v63 = vmul.f32 %v3559_v55, %v2758_v57 }
 0xe45   : > { %v2720_v53 = vsel %vm2719_vm13, %v3557_v3, %v2716_v6  ;;  %v2760_v29 = vadd.f32 %v3559_v55, %v2759_v63 }
 0xe46   : > { %v2725_v32 = vsel %vm2722_vm14, %v2724_v36, %v2720_v53 }
 0xe47   : > { %2896 = vmax.xlane.f32.xlu2 %v5270_v45  ;;  %v2727_v10 = vmul.f32 %v2725_v32, %v2693_v51  ;;  %v2764_v1 = vsel %vm2763_vm0, %v3559_v55, %v2760_v29 }
 0xe48   : > { %v2769_v60 = vsel %vm2766_vm1, %v2768_v13, %v2764_v1 }
 0xe49   : > { %v2778_v56 = vsub.f32 %v2727_v10, %v5275_v7  ;;  %v2771_v24 = vmul.f32 %v2769_v60, %v2737_v37 }
 0xe4b   : > { %v2782_v47 = vmul.f32 0.5, %v2778_v56  ;;  %v2779_v21 = vsub.f32 %v2771_v24, %v5265_v9 }
 0xe4d   : > { %v2786_v54 = vadd.f32 %v2782_v47, %v5275_v7 }
 0xe4f   : > { %vm2790_vm6 = vcmp.ge.f32.partialorder %v2786_v54, 0.5 }
 0xe50   : > { %v3272_v23 = vsel %vm2790_vm6, 1.0, %v3751_v49 }
 0xeb1   : > { %v2875_v33 = vpop.xlane.xlu1 %2874  ;;  %v2895_v52 = vpop.xlane.xlu0 %2894 }
 0xeb2   : > { %v2873_v41 = vpop.xlane.xlu2 %2872  ;;  %v2898_v19 = vsub.f32 %v5270_v45, %v2895_v52 }
 0xeb3   : > { %v2877_v28 = vsub.f32 %v2875_v33, %v2873_v41  ;;  %v2876_v59 = vsub.f32 %v5268_v42, %v2873_v41  ;;  %v2783_v42 = vmul.f32 0.5, %v2779_v21 }
 0xeb5   : > { %v2878_v46 = vadd.f32 1e-12, %v2877_v28  ;;  %v2787_v4 = vadd.f32 %v2783_v42, %v5265_v9 }
 0xeb7   : > { %3560 = vrcp.f32 %v2878_v46  ;;  %v2890_v5 = vand.u32 2147483648, %v2878_v46  ;;  %v2888_v14 = vand.u32 2147483647, %v2878_v46  ;;  %vm2884_vm3 = vweird.f32 %v2878_v46 }
 0xeb8   : > { %vm2791_vm13 = vcmp.ge.f32.partialorder %v2787_v4, 0.5 }
 0xeb9   : > { %v2891_v35 = vor.u32 1.1754944e-38, %v2890_v5  ;;  %vm2889_vm5 = vcmp.eq.f32.partialorder %v2888_v14, 8.507059e+37  ;;  %v3273_v9 = vsel %vm2791_vm13, 1.0, %v3751_v49 }
 0xeba   : > { %v2897_v31 = vpop.xlane.xlu2 %2896 }
 0xebb   : > { %v2899_v18 = vsub.f32 %v2897_v31, %v2895_v52 }
 0xebd   : > { %v3561_v26 = vpop.eup %3560  ;;  %v2900_v25 = vadd.f32 1e-12, %v2899_v18 }
 0xebe   : > { %v2880_v39 = vmul.f32 %v3561_v26, %v2878_v46  ;;  %vm2885_vm2 = vweird.f32 %v3561_v26 }
 0xebf   : > { %3562 = vrcp.f32 %v2900_v25  ;;  %vm2886_vm4 = vmor %vm2884_vm3, %vm2885_vm2  ;;  %v2912_v22 = vand.u32 2147483648, %v2900_v25  ;;  %v2910_v2 = vand.u32 2147483647, %v2900_v25  ;;  %vm2906_vm15 = vweird.f32 %v2900_v25 }
 0xec0   : > { %v2881_v20 = vsub.f32 1.0, %v2880_v39 }
 0xec1   : > { %v2913_v3 = vor.u32 1.1754944e-38, %v2912_v22  ;;  %vm2911_vm10 = vcmp.eq.f32.partialorder %v2910_v2, 8.507059e+37 }
 0xec2   : > { %v2882_v44 = vmul.f32 %v3561_v26, %v2881_v20 }
 0xec4   : > { %v2883_v15 = vadd.f32 %v3561_v26, %v2882_v44 }
 0xec5   : > { %v3563_v0 = vpop.eup %3562 }
 0xec6   : > { %v2887_v30 = vsel %vm2886_vm4, %v3561_v26, %v2883_v15  ;;  %v2902_v40 = vmul.f32 %v3563_v0, %v2900_v25  ;;  %vm2907_vm11 = vweird.f32 %v3563_v0 }
 0xec7   : > { %v2892_v34 = vsel %vm2889_vm5, %v2891_v35, %v2887_v30  ;;  %vm2908_vm9 = vmor %vm2906_vm15, %vm2907_vm11 }
 0xec8   : > { %v2893_v50 = vmul.f32 %v2892_v34, %v2876_v59  ;;  %v2903_v17 = vsub.f32 1.0, %v2902_v40 }
 0xeca   : > { %v2918_v62 = vsub.f32 %v2893_v50, %v5278_v27  ;;  %v2904_v12 = vmul.f32 %v3563_v0, %v2903_v17 }
 0xecc   : > { %v2920_v48 = vmul.f32 0.5, %v2918_v62  ;;  %v2905_v61 = vadd.f32 %v3563_v0, %v2904_v12 }
 0xece   : > { %v2922_v16 = vadd.f32 %v2920_v48, %v5278_v27  ;;  %v2909_v7 = vsel %vm2908_vm9, %v3563_v0, %v2905_v61 }
 0xecf   : > { %v2914_v55 = vsel %vm2911_vm10, %v2913_v3, %v2909_v7 }
 0xed0   : > { %vm2924_vm12 = vcmp.ge.f32.partialorder %v2922_v16, 0.5  ;;  %v2915_v11 = vmul.f32 %v2914_v55, %v2898_v19 }
 0xed1   : > { %v3282_v33 = vsel %vm2924_vm12, 1.0, %v3751_v49 }
 0xed2   : > { %v2936_v41 = vadd.f32 %v3282_v33, %v3272_v23  ;;  %v2919_v6 = vsub.f32 %v2915_v11, %v5280_v58 }
 0xed4   : > { %v2938_v45 = vmul.f32 0.5, %v2936_v41  ;;  %v2921_v27 = vmul.f32 0.5, %v2919_v6 }
 0xed6   : > { %3284 = vst [vmem:[%s4524_s20 + $0x70] sm:$0xff] %v2938_v45  ;;  %v2923_v38 = vadd.f32 %v2921_v27, %v5280_v58 }
 0xed8   : > { %vm2925_vm14 = vcmp.ge.f32.partialorder %v2923_v38, 0.5 }
 0xed9   : > { %v3283_v57 = vsel %vm2925_vm14, 1.0, %v3751_v49 }
 0xeda   : > { %v2937_v28 = vadd.f32 %v3283_v57, %v3273_v9 }
 0xedc   : > { %v2939_v46 = vmul.f32 0.5, %v2937_v28 }
 0xede   : > { %3285 = vst [vmem:[%s4524_s20 + $0x78] sm:$0xff] %v2939_v46 }
 0xedf   : > { %3681 = shalt.err (!%p3678_p0)
}
 0xee0   : > { %s3753_s11 = smov 256   ;;  %s3754_s18 = smov 512  }
 0xee1   : > { %s3755_s1 = smov 16  }
 0xee2   : > { %3303 = dma.vmem_to_hbm [thread:$0]  (%p3859_p7), %s2960_s5, 2048, %s2962_s6, %s2944_s15, %s3753_s11, %s3754_s18, %s3755_s1  }
 0xee3 PF: > { %s2976_s27 = sand.u32 1, %s3720_s12   ;;  %p3317_p3 = pnand %p3073_p11, %p3825_p6 }
 0xee4   : > { %s2977_s20 = scalar_lea.sflag [#allocation6], %s2976_s27 }
 0xee5   : > { %p3318_p5 = pneg %p3317_p3 }
 0xee7   : > { %3715 = dma.done.wait (%p3318_p5), %s2977_s20, 2048  }
 0xee8   : > { %3717 = vsyncadd (%p3318_p5), %s2977_s20, 4294965248  ;;  %s20_s17 = sadd.s32 1, %s3740_s17   ;;  %s5401_s12 = smov %s3724_s13 }
 0xee9   : > { %p17_p9 = scmp.ge.s32.totalorder %s20_s17, 4   ;;  %s5402_s13 = smov %s3728_s14 }
 0xeea   : > { %s5403_s14 = smov %s3868_s29  ;;  %s5404_s15 = smov %s3736_s16 }
 0xeeb   : > { %s5405_s16 = smov %s5407_s10  ;;  %19 = sbr.rel (!%p17_p9) target bundleno = 9 (0x9), region = 103 }
 0xef0   :  { %2983 = vsyncpa [#allocation5], 1 }
 0xef1   :  { %2985 = vsyncpa [#allocation5 + $0x1], 1 }
 0xef2   :  { %2986 = vsyncpa [#allocation8], 1 }
 0xef3   :  { %2987 = vsyncpa [#allocation6], 1 }
 0xef4   :  { %2989 = vsyncpa [#allocation6 + $0x1], 1 }

</bundles_post_ra>
